<compile_context>
chip_gen: v7x
topology: tpu7x:2x2x1
jax: 0.10.0
libtpu: 0.0.40
codegen_flags: <defaults>
</compile_context>

<pallas_src>
import functools

import jax
import jax.numpy as jnp
import numpy as np
from jax.experimental import pallas as pl
from jax.experimental.pallas import tpu as pltpu


# ------------------------------------------------------------------ fused kernel

def _basic_block_kernel(x_ref, w1_ref, b1_ref, w2_ref, b2_ref, mask_ref,
                        out_ref, o1_ref, *, HP, P, d):
    """Fused BasicBlock forward for one batch element.

    Flattened layout: a zero-padded (H+2d, W+2d, C) image is stored as
    ((H+2d)*(W+2d) + 2d, C); for output index i = y*P + x (P = W+2d) the 3x3 tap
    (ky, kx) is simply row i + (ky*P + kx)*d, so each conv is 9 contiguous
    row-shifted matmuls.  Columns x in [W, P) of each output row are wrap-around
    junk and are masked / sliced off.

    x_ref  : (1, Rx, Cin)   bf16  flattened zero-padded input (Rx = (H+2d)*P + 2d)
    w1_ref : (9, Cin, Cout) bf16  conv1 weights, BN1 scale folded, (ky,kx) major
    b1_ref : (1, Cout)      f32   BN1 shift
    w2_ref : (9, Cout,Cout) bf16  conv2 weights, BN2 scale folded
    b2_ref : (1, Cout)      f32   BN2 shift
    mask_ref:(HP, 1)        f32   1.0 on valid columns, 0.0 on junk columns
    out_ref: (1, HP, Cout)  f32   flattened output (junk columns dropped outside)
    o1_ref : (Rx, Cout)     f32   VMEM scratch: zero-padded conv1 output
    """
    # Load once; slice as 32-bit values (cheap relayouts), cast to bf16 at the MXU.
    x = x_ref[0].astype(jnp.float32)                    # (Rx, Cin)
    w1 = w1_ref[...]
    w2 = w2_ref[...]
    mask = mask_ref[...]                                # (HP, 1)

    # ---- conv1 + BN1 + ReLU: 9 shifted matmuls, f32 accumulation ----
    acc = None
    for ky in range(3):
        for kx in range(3):
            off = (ky * P + kx) * d
            a = x[off:off + HP, :].astype(jnp.bfloat16)
            t = jnp.dot(a, w1[ky * 3 + kx], preferred_element_type=jnp.float32)
            acc = t if acc is None else acc + t
    o1 = jnp.maximum(acc + b1_ref[...], 0.0) * mask     # zero wrap-around columns

    # Zero-padded conv1 output stays resident in VMEM (no HBM round-trip).
    o1_ref[...] = jnp.zeros_like(o1_ref)
    o1_ref[d * P + d:d * P + d + HP, :] = o1

    # ---- conv2 + BN2 + residual add + ReLU ----
    y = o1_ref[...]
    acc = None
    for ky in range(3):
        for kx in range(3):
            off = (ky * P + kx) * d
            a = y[off:off + HP, :].astype(jnp.bfloat16)
            t = jnp.dot(a, w2[ky * 3 + kx], preferred_element_type=jnp.float32)
            acc = t if acc is None else acc + t
    res = x[d * P + d:d * P + d + HP, :]                # identity residual
    out_ref[0] = jnp.maximum(acc + b2_ref[...] + res, 0.0).astype(out_ref.dtype)


# ------------------------------------------------------------------ glue (plain JAX)

def fold_bn(gamma, beta, running_mean, running_var, eps=1e-5):
    scale = gamma / jnp.sqrt(running_var + eps)
    shift = beta - running_mean * scale
    return scale, shift


def _prep_weights(w_oihw, scale):
    """PyTorch (Cout, Cin, 3, 3) -> (9, Cin, Cout) bf16 with BN scale folded in."""
    Cout, Cin, KH, KW = w_oihw.shape
    w = jnp.transpose(w_oihw, (2, 3, 1, 0)).reshape(KH * KW, Cin, Cout)
    return (w * scale.reshape(1, 1, Cout)).astype(jnp.bfloat16)


def basic_block_forward(x_nchw, params, *, stride=1, dilation=1):
    """BasicBlock.forward with downsample=None (requires stride==1, in_ch==out_ch)."""
    out_ch, in_ch = params["conv1_w"].shape[:2]
    assert stride == 1 and in_ch == out_ch, (
        "identity residual path requires stride == 1 and in_ch == out_ch "
        "(downsample=None in the PyTorch module)")

    d = dilation
    x = jnp.transpose(x_nchw, (0, 2, 3, 1)).astype(jnp.float32)   # NCHW -> NHWC
    N, H, W, Cin = x.shape
    Cout = out_ch
    P = W + 2 * d                      # padded row width
    HP = H * P                         # flattened output rows (incl. 2d junk cols/row)
    Rx = (H + 2 * d) * P + 2 * d       # flattened padded input rows (+2d slice overrun)

    s1, b1 = fold_bn(params["bn1_gamma"], params["bn1_beta"],
                     params["bn1_mean"], params["bn1_var"])
    s2, b2 = fold_bn(params["bn2_gamma"], params["bn2_beta"],
                     params["bn2_mean"], params["bn2_var"])
    w1 = _prep_weights(params["conv1_w"], s1)
    w2 = _prep_weights(params["conv2_w"], s2)
    b1 = b1.reshape(1, Cout).astype(jnp.float32)
    b2 = b2.reshape(1, Cout).astype(jnp.float32)

    # One pass over x: pad spatially by d, flatten rows, append 2d zero overrun
    # rows, cast to bf16.  (The 9x im2col patch matrix is never materialized.)
    x_pad = jnp.pad(x, ((0, 0), (d, d), (d, d), (0, 0)))
    x_flat = x_pad.reshape(N, (H + 2 * d) * P, Cin)
    x_flat = jnp.pad(x_flat, ((0, 0), (0, 2 * d), (0, 0))).astype(jnp.bfloat16)

    # Valid-column mask for the flattened layout (tiny, built host-side).
    mask = jnp.asarray((np.arange(HP) % P < W).astype(np.float32)).reshape(HP, 1)

    # VMEM working-set estimate -> scoped limit (headroom under v7x's 64 MiB).
    ws = (2 * Rx * Cin * 2            # input block (double-buffered, bf16)
          + 2 * HP * Cout * 4         # output block (double-buffered, f32)
          + Rx * Cout * 4             # conv1 scratch
          + Rx * Cin * 4              # in-kernel f32 copy of the input
          + 4 * HP * Cout * 4         # accumulators / slice temporaries
          + 2 * 9 * (Cin + Cout) * Cout * 2)
    vmem_limit = int(min(max(32 * 1024 * 1024, 2 * ws), 48 * 1024 * 1024))

    kernel = functools.partial(_basic_block_kernel, HP=HP, P=P, d=d)

    # TODO(synk): for very large images (working set > VMEM) tile H with a 2-row
    # halo (manual make_async_copy double-buffering) instead of one image per step.
    out_flat = pl.pallas_call(
        kernel,
        out_shape=jax.ShapeDtypeStruct((N, HP, Cout), jnp.float32),
        grid=(N,),
        in_specs=[
            pl.BlockSpec((1, Rx, Cin), lambda n: (n, 0, 0)),      # image (streamed)
            pl.BlockSpec((9, Cin, Cout), lambda n: (0, 0, 0)),    # w1 (resident)
            pl.BlockSpec((1, Cout), lambda n: (0, 0)),            # bn1 shift
            pl.BlockSpec((9, Cout, Cout), lambda n: (0, 0, 0)),   # w2 (resident)
            pl.BlockSpec((1, Cout), lambda n: (0, 0)),            # bn2 shift
            pl.BlockSpec((HP, 1), lambda n: (0, 0)),              # column mask
        ],
        out_specs=pl.BlockSpec((1, HP, Cout), lambda n: (n, 0, 0)),
        scratch_shapes=[pltpu.VMEM((Rx, Cout), jnp.float32)],
        compiler_params=pltpu.CompilerParams(
            dimension_semantics=("parallel",),
            vmem_limit_bytes=vmem_limit),
    )(x_flat, w1, b1, w2, b2, mask)

    out = out_flat.reshape(N, H, P, Cout)[:, :, :W, :]            # drop junk columns
    return jnp.transpose(out, (0, 3, 1, 2))                       # NHWC -> NCHW


# ------------------------------------------------------------------ reference (pure JAX, f32)

def im2col(x_nhwc, ksize=3, stride=1, padding=1, dilation=1):
    N, H, W, C = x_nhwc.shape
    xp = jnp.pad(x_nhwc, ((0, 0), (padding, padding), (padding, padding), (0, 0)))
    Ho = (H + 2 * padding - dilation * (ksize - 1) - 1) // stride + 1
    Wo = (W + 2 * padding - dilation * (ksize - 1) - 1) // stride + 1
    cols = []
    for ky in range(ksize):
        for kx in range(ksize):
            y0 = ky * dilation
            x0 = kx * dilation
            patch = xp[:, y0:y0 + (Ho - 1) * stride + 1:stride,
                          x0:x0 + (Wo - 1) * stride + 1:stride, :]
            cols.append(patch)
    patches = jnp.concatenate(cols, axis=-1)
    return patches.reshape(N * Ho * Wo, ksize * ksize * C), Ho, Wo


def conv_weight_to_2d(w_oihw):
    Cout, Cin, KH, KW = w_oihw.shape
    return jnp.transpose(w_oihw, (2, 3, 1, 0)).reshape(KH * KW * Cin, Cout)


def _reference_forward(x_nchw, params, *, stride=1, dilation=1):
    x = jnp.transpose(x_nchw, (0, 2, 3, 1)).astype(jnp.float32)
    N, H, W, Cin = x.shape
    w1 = conv_weight_to_2d(params["conv1_w"])
    s1, b1 = fold_bn(params["bn1_gamma"], params["bn1_beta"],
                     params["bn1_mean"], params["bn1_var"])
    w2 = conv_weight_to_2d(params["conv2_w"])
    s2, b2 = fold_bn(params["bn2_gamma"], params["bn2_beta"],
                     params["bn2_mean"], params["bn2_var"])
    Cout = params["conv1_w"].shape[0]

    p1, Ho, Wo = im2col(x, 3, stride, dilation, dilation)
    o1 = jnp.maximum(p1 @ w1 * s1 + b1, 0.0).reshape(N, Ho, Wo, Cout)
    p2, _, _ = im2col(o1, 3, 1, dilation, dilation)
    o2 = p2 @ w2 * s2 + b2 + x.reshape(N * H * W, Cin)
    o2 = jnp.maximum(o2, 0.0).reshape(N, H, W, Cout)
    return jnp.transpose(o2, (0, 3, 1, 2))


# ------------------------------------------------------------------ main

if __name__ == "__main__":
    key = jax.random.PRNGKey(0)
    N, C, H, W = 2, 4, 16, 16      # in_ch == out_ch == 4, stride=1 (downsample=None)
    in_ch = out_ch = C

    keys = jax.random.split(key, 12)
    x = jax.random.normal(keys[0], (N, C, H, W), dtype=jnp.float32)

    params = {
        "conv1_w": jax.random.normal(keys[1], (out_ch, in_ch, 3, 3), jnp.float32) * 0.1,
        "bn1_gamma": 1.0 + 0.1 * jax.random.normal(keys[2], (out_ch,), jnp.float32),
        "bn1_beta": 0.1 * jax.random.normal(keys[3], (out_ch,), jnp.float32),
        "bn1_mean": 0.1 * jax.random.normal(keys[4], (out_ch,), jnp.float32),
        "bn1_var": 1.0 + 0.1 * jnp.abs(jax.random.normal(keys[5], (out_ch,), jnp.float32)),
        "conv2_w": jax.random.normal(keys[6], (out_ch, in_ch, 3, 3), jnp.float32) * 0.1,
        "bn2_gamma": 1.0 + 0.1 * jax.random.normal(keys[7], (out_ch,), jnp.float32),
        "bn2_beta": 0.1 * jax.random.normal(keys[8], (out_ch,), jnp.float32),
        "bn2_mean": 0.1 * jax.random.normal(keys[9], (out_ch,), jnp.float32),
        "bn2_var": 1.0 + 0.1 * jnp.abs(jax.random.normal(keys[10], (out_ch,), jnp.float32)),
    }

    out = basic_block_forward(x, params, stride=1, dilation=1)
    out = jax.block_until_ready(out)

    ref = jax.block_until_ready(_reference_forward(x, params, stride=1, dilation=1))
    assert out.shape == (N, out_ch, H, W), out.shape
    # bf16 activations/weights (both convs) vs. f32 reference -> loose tolerance.
    np.testing.assert_allclose(np.asarray(out), np.asarray(ref), rtol=5e-2, atol=5e-2)

    print("KERNEL_OK")
</pallas_src>

<mosaic_0001>
module attributes {stable_mosaic.version = 11 : i64} {
  func.func @_basic_block_kernel(%arg0: i32, %arg1: memref<1x326x4xbf16, #tpu.memory_space<vmem>>, %arg2: memref<9x4x4xbf16, #tpu.memory_space<vmem>>, %arg3: memref<1x4xf32, #tpu.memory_space<vmem>>, %arg4: memref<9x4x4xbf16, #tpu.memory_space<vmem>>, %arg5: memref<1x4xf32, #tpu.memory_space<vmem>>, %arg6: memref<288x1xf32, #tpu.memory_space<vmem>>, %arg7: memref<1x288x4xf32, #tpu.memory_space<vmem>>, %arg8: memref<326x4xf32, #tpu.memory_space<vmem>>) attributes {dimension_semantics = [#tpu.dimension_semantics<parallel>], iteration_bounds = array<i64: 2>, scalar_prefetch = 0 : i64, scratch_operands = 1 : i64, tpu.core_type = #tpu.core_type<tc>, window_params = [{transform_indices = @transform_0, window_bounds = array<i64: 1, 326, 4>}, {pipeline_mode = #tpu.pipeline_mode<synchronous>, transform_indices = @transform_1, window_bounds = array<i64: 9, 4, 4>}, {pipeline_mode = #tpu.pipeline_mode<synchronous>, transform_indices = @transform_2, window_bounds = array<i64: 1, 4>}, {pipeline_mode = #tpu.pipeline_mode<synchronous>, transform_indices = @transform_3, window_bounds = array<i64: 9, 4, 4>}, {pipeline_mode = #tpu.pipeline_mode<synchronous>, transform_indices = @transform_4, window_bounds = array<i64: 1, 4>}, {pipeline_mode = #tpu.pipeline_mode<synchronous>, transform_indices = @transform_5, window_bounds = array<i64: 288, 1>}, {transform_indices = @transform_6, window_bounds = array<i64: 1, 288, 4>}]} {
    %c0 = arith.constant 0 : index
    %c0_0 = arith.constant 0 : index
    %c0_1 = arith.constant 0 : index
    %0 = vector.load %arg1[%c0, %c0_0, %c0_1] : memref<1x326x4xbf16, #tpu.memory_space<vmem>>, vector<1x326x4xbf16>
    %1 = vector.shape_cast %0 : vector<1x326x4xbf16> to vector<326x4xbf16>
    %2 = arith.extf %1 : vector<326x4xbf16> to vector<326x4xf32>
    %c0_2 = arith.constant 0 : index
    %c0_3 = arith.constant 0 : index
    %c0_4 = arith.constant 0 : index
    %3 = vector.load %arg2[%c0_2, %c0_3, %c0_4] : memref<9x4x4xbf16, #tpu.memory_space<vmem>>, vector<9x4x4xbf16>
    %c0_5 = arith.constant 0 : index
    %c0_6 = arith.constant 0 : index
    %c0_7 = arith.constant 0 : index
    %4 = vector.load %arg4[%c0_5, %c0_6, %c0_7] : memref<9x4x4xbf16, #tpu.memory_space<vmem>>, vector<9x4x4xbf16>
    %c0_8 = arith.constant 0 : index
    %c0_9 = arith.constant 0 : index
    %5 = vector.load %arg6[%c0_8, %c0_9] : memref<288x1xf32, #tpu.memory_space<vmem>>, vector<288x1xf32>
    %6 = vector.extract_strided_slice %2 {offsets = [0, 0], sizes = [288, 4], strides = [1, 1]} : vector<326x4xf32> to vector<288x4xf32>
    %7 = arith.truncf %6 : vector<288x4xf32> to vector<288x4xbf16>
    %8 = vector.extract_strided_slice %3 {offsets = [0, 0, 0], sizes = [1, 4, 4], strides = [1, 1, 1]} : vector<9x4x4xbf16> to vector<1x4x4xbf16>
    %9 = vector.shape_cast %8 : vector<1x4x4xbf16> to vector<4x4xbf16>
    %cst = arith.constant dense<0.000000e+00> : vector<288x4xf32>
    %10 = tpu.matmul %7, %9, %cst {dimension_numbers = #tpu.dot_dimension_numbers<[1], [0], [0], [1], [0, 0, 1, 1], [], []>} : vector<288x4xbf16>, vector<4x4xbf16>, vector<288x4xf32> -> vector<288x4xf32>
    %11 = vector.extract_strided_slice %2 {offsets = [1, 0], sizes = [288, 4], strides = [1, 1]} : vector<326x4xf32> to vector<288x4xf32>
    %12 = arith.truncf %11 : vector<288x4xf32> to vector<288x4xbf16>
    %13 = vector.extract_strided_slice %3 {offsets = [1, 0, 0], sizes = [1, 4, 4], strides = [1, 1, 1]} : vector<9x4x4xbf16> to vector<1x4x4xbf16>
    %14 = vector.shape_cast %13 : vector<1x4x4xbf16> to vector<4x4xbf16>
    %cst_10 = arith.constant dense<0.000000e+00> : vector<288x4xf32>
    %15 = tpu.matmul %12, %14, %cst_10 {dimension_numbers = #tpu.dot_dimension_numbers<[1], [0], [0], [1], [0, 0, 1, 1], [], []>} : vector<288x4xbf16>, vector<4x4xbf16>, vector<288x4xf32> -> vector<288x4xf32>
    %16 = arith.addf %10, %15 : vector<288x4xf32>
    %17 = vector.extract_strided_slice %2 {offsets = [2, 0], sizes = [288, 4], strides = [1, 1]} : vector<326x4xf32> to vector<288x4xf32>
    %18 = arith.truncf %17 : vector<288x4xf32> to vector<288x4xbf16>
    %19 = vector.extract_strided_slice %3 {offsets = [2, 0, 0], sizes = [1, 4, 4], strides = [1, 1, 1]} : vector<9x4x4xbf16> to vector<1x4x4xbf16>
    %20 = vector.shape_cast %19 : vector<1x4x4xbf16> to vector<4x4xbf16>
    %cst_11 = arith.constant dense<0.000000e+00> : vector<288x4xf32>
    %21 = tpu.matmul %18, %20, %cst_11 {dimension_numbers = #tpu.dot_dimension_numbers<[1], [0], [0], [1], [0, 0, 1, 1], [], []>} : vector<288x4xbf16>, vector<4x4xbf16>, vector<288x4xf32> -> vector<288x4xf32>
    %22 = arith.addf %16, %21 : vector<288x4xf32>
    %23 = vector.extract_strided_slice %2 {offsets = [18, 0], sizes = [288, 4], strides = [1, 1]} : vector<326x4xf32> to vector<288x4xf32>
    %24 = arith.truncf %23 : vector<288x4xf32> to vector<288x4xbf16>
    %25 = vector.extract_strided_slice %3 {offsets = [3, 0, 0], sizes = [1, 4, 4], strides = [1, 1, 1]} : vector<9x4x4xbf16> to vector<1x4x4xbf16>
    %26 = vector.shape_cast %25 : vector<1x4x4xbf16> to vector<4x4xbf16>
    %cst_12 = arith.constant dense<0.000000e+00> : vector<288x4xf32>
    %27 = tpu.matmul %24, %26, %cst_12 {dimension_numbers = #tpu.dot_dimension_numbers<[1], [0], [0], [1], [0, 0, 1, 1], [], []>} : vector<288x4xbf16>, vector<4x4xbf16>, vector<288x4xf32> -> vector<288x4xf32>
    %28 = arith.addf %22, %27 : vector<288x4xf32>
    %29 = vector.extract_strided_slice %2 {offsets = [19, 0], sizes = [288, 4], strides = [1, 1]} : vector<326x4xf32> to vector<288x4xf32>
    %30 = arith.truncf %29 : vector<288x4xf32> to vector<288x4xbf16>
    %31 = vector.extract_strided_slice %3 {offsets = [4, 0, 0], sizes = [1, 4, 4], strides = [1, 1, 1]} : vector<9x4x4xbf16> to vector<1x4x4xbf16>
    %32 = vector.shape_cast %31 : vector<1x4x4xbf16> to vector<4x4xbf16>
    %cst_13 = arith.constant dense<0.000000e+00> : vector<288x4xf32>
    %33 = tpu.matmul %30, %32, %cst_13 {dimension_numbers = #tpu.dot_dimension_numbers<[1], [0], [0], [1], [0, 0, 1, 1], [], []>} : vector<288x4xbf16>, vector<4x4xbf16>, vector<288x4xf32> -> vector<288x4xf32>
    %34 = arith.addf %28, %33 : vector<288x4xf32>
    %35 = vector.extract_strided_slice %2 {offsets = [20, 0], sizes = [288, 4], strides = [1, 1]} : vector<326x4xf32> to vector<288x4xf32>
    %36 = arith.truncf %35 : vector<288x4xf32> to vector<288x4xbf16>
    %37 = vector.extract_strided_slice %3 {offsets = [5, 0, 0], sizes = [1, 4, 4], strides = [1, 1, 1]} : vector<9x4x4xbf16> to vector<1x4x4xbf16>
    %38 = vector.shape_cast %37 : vector<1x4x4xbf16> to vector<4x4xbf16>
    %cst_14 = arith.constant dense<0.000000e+00> : vector<288x4xf32>
    %39 = tpu.matmul %36, %38, %cst_14 {dimension_numbers = #tpu.dot_dimension_numbers<[1], [0], [0], [1], [0, 0, 1, 1], [], []>} : vector<288x4xbf16>, vector<4x4xbf16>, vector<288x4xf32> -> vector<288x4xf32>
    %40 = arith.addf %34, %39 : vector<288x4xf32>
    %41 = vector.extract_strided_slice %2 {offsets = [36, 0], sizes = [288, 4], strides = [1, 1]} : vector<326x4xf32> to vector<288x4xf32>
    %42 = arith.truncf %41 : vector<288x4xf32> to vector<288x4xbf16>
    %43 = vector.extract_strided_slice %3 {offsets = [6, 0, 0], sizes = [1, 4, 4], strides = [1, 1, 1]} : vector<9x4x4xbf16> to vector<1x4x4xbf16>
    %44 = vector.shape_cast %43 : vector<1x4x4xbf16> to vector<4x4xbf16>
    %cst_15 = arith.constant dense<0.000000e+00> : vector<288x4xf32>
    %45 = tpu.matmul %42, %44, %cst_15 {dimension_numbers = #tpu.dot_dimension_numbers<[1], [0], [0], [1], [0, 0, 1, 1], [], []>} : vector<288x4xbf16>, vector<4x4xbf16>, vector<288x4xf32> -> vector<288x4xf32>
    %46 = arith.addf %40, %45 : vector<288x4xf32>
    %47 = vector.extract_strided_slice %2 {offsets = [37, 0], sizes = [288, 4], strides = [1, 1]} : vector<326x4xf32> to vector<288x4xf32>
    %48 = arith.truncf %47 : vector<288x4xf32> to vector<288x4xbf16>
    %49 = vector.extract_strided_slice %3 {offsets = [7, 0, 0], sizes = [1, 4, 4], strides = [1, 1, 1]} : vector<9x4x4xbf16> to vector<1x4x4xbf16>
    %50 = vector.shape_cast %49 : vector<1x4x4xbf16> to vector<4x4xbf16>
    %cst_16 = arith.constant dense<0.000000e+00> : vector<288x4xf32>
    %51 = tpu.matmul %48, %50, %cst_16 {dimension_numbers = #tpu.dot_dimension_numbers<[1], [0], [0], [1], [0, 0, 1, 1], [], []>} : vector<288x4xbf16>, vector<4x4xbf16>, vector<288x4xf32> -> vector<288x4xf32>
    %52 = arith.addf %46, %51 : vector<288x4xf32>
    %53 = vector.extract_strided_slice %2 {offsets = [38, 0], sizes = [288, 4], strides = [1, 1]} : vector<326x4xf32> to vector<288x4xf32>
    %54 = arith.truncf %53 : vector<288x4xf32> to vector<288x4xbf16>
    %55 = vector.extract_strided_slice %3 {offsets = [8, 0, 0], sizes = [1, 4, 4], strides = [1, 1, 1]} : vector<9x4x4xbf16> to vector<1x4x4xbf16>
    %56 = vector.shape_cast %55 : vector<1x4x4xbf16> to vector<4x4xbf16>
    %cst_17 = arith.constant dense<0.000000e+00> : vector<288x4xf32>
    %57 = tpu.matmul %54, %56, %cst_17 {dimension_numbers = #tpu.dot_dimension_numbers<[1], [0], [0], [1], [0, 0, 1, 1], [], []>} : vector<288x4xbf16>, vector<4x4xbf16>, vector<288x4xf32> -> vector<288x4xf32>
    %58 = arith.addf %52, %57 : vector<288x4xf32>
    %c0_18 = arith.constant 0 : index
    %c0_19 = arith.constant 0 : index
    %59 = vector.load %arg3[%c0_18, %c0_19] : memref<1x4xf32, #tpu.memory_space<vmem>>, vector<1x4xf32>
    %60 = vector.broadcast %59 : vector<1x4xf32> to vector<288x4xf32>
    %61 = arith.addf %58, %60 : vector<288x4xf32>
    %cst_20 = arith.constant 0.000000e+00 : f32
    %62 = vector.broadcast %cst_20 : f32 to vector<288x4xf32>
    %63 = arith.maximumf %61, %62 : vector<288x4xf32>
    %64 = vector.broadcast %5 : vector<288x1xf32> to vector<288x4xf32>
    %65 = arith.mulf %63, %64 : vector<288x4xf32>
    %cst_21 = arith.constant 0.000000e+00 : f32
    %66 = vector.broadcast %cst_21 : f32 to vector<326x4xf32>
    %c0_22 = arith.constant 0 : index
    %c0_23 = arith.constant 0 : index
    %67 = vector.load %arg8[%c0_22, %c0_23] : memref<326x4xf32, #tpu.memory_space<vmem>>, vector<326x4xf32>
    tpu.vector_store %arg8[%c0_22, %c0_23], %66 {strides = array<i32>} : memref<326x4xf32, #tpu.memory_space<vmem>>, vector<326x4xf32>,
    %c19 = arith.constant 19 : index
    %c0_24 = arith.constant 0 : index
    %68 = vector.load %arg8[%c19, %c0_24] : memref<326x4xf32, #tpu.memory_space<vmem>>, vector<288x4xf32>
    tpu.vector_store %arg8[%c19, %c0_24], %65 {strides = array<i32>} : memref<326x4xf32, #tpu.memory_space<vmem>>, vector<288x4xf32>,
    %c0_25 = arith.constant 0 : index
    %c0_26 = arith.constant 0 : index
    %69 = vector.load %arg8[%c0_25, %c0_26] : memref<326x4xf32, #tpu.memory_space<vmem>>, vector<326x4xf32>
    %70 = vector.extract_strided_slice %69 {offsets = [0, 0], sizes = [288, 4], strides = [1, 1]} : vector<326x4xf32> to vector<288x4xf32>
    %71 = arith.truncf %70 : vector<288x4xf32> to vector<288x4xbf16>
    %72 = vector.extract_strided_slice %4 {offsets = [0, 0, 0], sizes = [1, 4, 4], strides = [1, 1, 1]} : vector<9x4x4xbf16> to vector<1x4x4xbf16>
    %73 = vector.shape_cast %72 : vector<1x4x4xbf16> to vector<4x4xbf16>
    %cst_27 = arith.constant dense<0.000000e+00> : vector<288x4xf32>
    %74 = tpu.matmul %71, %73, %cst_27 {dimension_numbers = #tpu.dot_dimension_numbers<[1], [0], [0], [1], [0, 0, 1, 1], [], []>} : vector<288x4xbf16>, vector<4x4xbf16>, vector<288x4xf32> -> vector<288x4xf32>
    %75 = vector.extract_strided_slice %69 {offsets = [1, 0], sizes = [288, 4], strides = [1, 1]} : vector<326x4xf32> to vector<288x4xf32>
    %76 = arith.truncf %75 : vector<288x4xf32> to vector<288x4xbf16>
    %77 = vector.extract_strided_slice %4 {offsets = [1, 0, 0], sizes = [1, 4, 4], strides = [1, 1, 1]} : vector<9x4x4xbf16> to vector<1x4x4xbf16>
    %78 = vector.shape_cast %77 : vector<1x4x4xbf16> to vector<4x4xbf16>
    %cst_28 = arith.constant dense<0.000000e+00> : vector<288x4xf32>
    %79 = tpu.matmul %76, %78, %cst_28 {dimension_numbers = #tpu.dot_dimension_numbers<[1], [0], [0], [1], [0, 0, 1, 1], [], []>} : vector<288x4xbf16>, vector<4x4xbf16>, vector<288x4xf32> -> vector<288x4xf32>
    %80 = arith.addf %74, %79 : vector<288x4xf32>
    %81 = vector.extract_strided_slice %69 {offsets = [2, 0], sizes = [288, 4], strides = [1, 1]} : vector<326x4xf32> to vector<288x4xf32>
    %82 = arith.truncf %81 : vector<288x4xf32> to vector<288x4xbf16>
    %83 = vector.extract_strided_slice %4 {offsets = [2, 0, 0], sizes = [1, 4, 4], strides = [1, 1, 1]} : vector<9x4x4xbf16> to vector<1x4x4xbf16>
    %84 = vector.shape_cast %83 : vector<1x4x4xbf16> to vector<4x4xbf16>
    %cst_29 = arith.constant dense<0.000000e+00> : vector<288x4xf32>
    %85 = tpu.matmul %82, %84, %cst_29 {dimension_numbers = #tpu.dot_dimension_numbers<[1], [0], [0], [1], [0, 0, 1, 1], [], []>} : vector<288x4xbf16>, vector<4x4xbf16>, vector<288x4xf32> -> vector<288x4xf32>
    %86 = arith.addf %80, %85 : vector<288x4xf32>
    %87 = vector.extract_strided_slice %69 {offsets = [18, 0], sizes = [288, 4], strides = [1, 1]} : vector<326x4xf32> to vector<288x4xf32>
    %88 = arith.truncf %87 : vector<288x4xf32> to vector<288x4xbf16>
    %89 = vector.extract_strided_slice %4 {offsets = [3, 0, 0], sizes = [1, 4, 4], strides = [1, 1, 1]} : vector<9x4x4xbf16> to vector<1x4x4xbf16>
    %90 = vector.shape_cast %89 : vector<1x4x4xbf16> to vector<4x4xbf16>
    %cst_30 = arith.constant dense<0.000000e+00> : vector<288x4xf32>
    %91 = tpu.matmul %88, %90, %cst_30 {dimension_numbers = #tpu.dot_dimension_numbers<[1], [0], [0], [1], [0, 0, 1, 1], [], []>} : vector<288x4xbf16>, vector<4x4xbf16>, vector<288x4xf32> -> vector<288x4xf32>
    %92 = arith.addf %86, %91 : vector<288x4xf32>
    %93 = vector.extract_strided_slice %69 {offsets = [19, 0], sizes = [288, 4], strides = [1, 1]} : vector<326x4xf32> to vector<288x4xf32>
    %94 = arith.truncf %93 : vector<288x4xf32> to vector<288x4xbf16>
    %95 = vector.extract_strided_slice %4 {offsets = [4, 0, 0], sizes = [1, 4, 4], strides = [1, 1, 1]} : vector<9x4x4xbf16> to vector<1x4x4xbf16>
    %96 = vector.shape_cast %95 : vector<1x4x4xbf16> to vector<4x4xbf16>
    %cst_31 = arith.constant dense<0.000000e+00> : vector<288x4xf32>
    %97 = tpu.matmul %94, %96, %cst_31 {dimension_numbers = #tpu.dot_dimension_numbers<[1], [0], [0], [1], [0, 0, 1, 1], [], []>} : vector<288x4xbf16>, vector<4x4xbf16>, vector<288x4xf32> -> vector<288x4xf32>
    %98 = arith.addf %92, %97 : vector<288x4xf32>
    %99 = vector.extract_strided_slice %69 {offsets = [20, 0], sizes = [288, 4], strides = [1, 1]} : vector<326x4xf32> to vector<288x4xf32>
    %100 = arith.truncf %99 : vector<288x4xf32> to vector<288x4xbf16>
    %101 = vector.extract_strided_slice %4 {offsets = [5, 0, 0], sizes = [1, 4, 4], strides = [1, 1, 1]} : vector<9x4x4xbf16> to vector<1x4x4xbf16>
    %102 = vector.shape_cast %101 : vector<1x4x4xbf16> to vector<4x4xbf16>
    %cst_32 = arith.constant dense<0.000000e+00> : vector<288x4xf32>
    %103 = tpu.matmul %100, %102, %cst_32 {dimension_numbers = #tpu.dot_dimension_numbers<[1], [0], [0], [1], [0, 0, 1, 1], [], []>} : vector<288x4xbf16>, vector<4x4xbf16>, vector<288x4xf32> -> vector<288x4xf32>
    %104 = arith.addf %98, %103 : vector<288x4xf32>
    %105 = vector.extract_strided_slice %69 {offsets = [36, 0], sizes = [288, 4], strides = [1, 1]} : vector<326x4xf32> to vector<288x4xf32>
    %106 = arith.truncf %105 : vector<288x4xf32> to vector<288x4xbf16>
    %107 = vector.extract_strided_slice %4 {offsets = [6, 0, 0], sizes = [1, 4, 4], strides = [1, 1, 1]} : vector<9x4x4xbf16> to vector<1x4x4xbf16>
    %108 = vector.shape_cast %107 : vector<1x4x4xbf16> to vector<4x4xbf16>
    %cst_33 = arith.constant dense<0.000000e+00> : vector<288x4xf32>
    %109 = tpu.matmul %106, %108, %cst_33 {dimension_numbers = #tpu.dot_dimension_numbers<[1], [0], [0], [1], [0, 0, 1, 1], [], []>} : vector<288x4xbf16>, vector<4x4xbf16>, vector<288x4xf32> -> vector<288x4xf32>
    %110 = arith.addf %104, %109 : vector<288x4xf32>
    %111 = vector.extract_strided_slice %69 {offsets = [37, 0], sizes = [288, 4], strides = [1, 1]} : vector<326x4xf32> to vector<288x4xf32>
    %112 = arith.truncf %111 : vector<288x4xf32> to vector<288x4xbf16>
    %113 = vector.extract_strided_slice %4 {offsets = [7, 0, 0], sizes = [1, 4, 4], strides = [1, 1, 1]} : vector<9x4x4xbf16> to vector<1x4x4xbf16>
    %114 = vector.shape_cast %113 : vector<1x4x4xbf16> to vector<4x4xbf16>
    %cst_34 = arith.constant dense<0.000000e+00> : vector<288x4xf32>
    %115 = tpu.matmul %112, %114, %cst_34 {dimension_numbers = #tpu.dot_dimension_numbers<[1], [0], [0], [1], [0, 0, 1, 1], [], []>} : vector<288x4xbf16>, vector<4x4xbf16>, vector<288x4xf32> -> vector<288x4xf32>
    %116 = arith.addf %110, %115 : vector<288x4xf32>
    %117 = vector.extract_strided_slice %69 {offsets = [38, 0], sizes = [288, 4], strides = [1, 1]} : vector<326x4xf32> to vector<288x4xf32>
    %118 = arith.truncf %117 : vector<288x4xf32> to vector<288x4xbf16>
    %119 = vector.extract_strided_slice %4 {offsets = [8, 0, 0], sizes = [1, 4, 4], strides = [1, 1, 1]} : vector<9x4x4xbf16> to vector<1x4x4xbf16>
    %120 = vector.shape_cast %119 : vector<1x4x4xbf16> to vector<4x4xbf16>
    %cst_35 = arith.constant dense<0.000000e+00> : vector<288x4xf32>
    %121 = tpu.matmul %118, %120, %cst_35 {dimension_numbers = #tpu.dot_dimension_numbers<[1], [0], [0], [1], [0, 0, 1, 1], [], []>} : vector<288x4xbf16>, vector<4x4xbf16>, vector<288x4xf32> -> vector<288x4xf32>
    %122 = arith.addf %116, %121 : vector<288x4xf32>
    %123 = vector.extract_strided_slice %2 {offsets = [19, 0], sizes = [288, 4], strides = [1, 1]} : vector<326x4xf32> to vector<288x4xf32>
    %c0_36 = arith.constant 0 : index
    %c0_37 = arith.constant 0 : index
    %124 = vector.load %arg5[%c0_36, %c0_37] : memref<1x4xf32, #tpu.memory_space<vmem>>, vector<1x4xf32>
    %125 = vector.broadcast %124 : vector<1x4xf32> to vector<288x4xf32>
    %126 = arith.addf %122, %125 : vector<288x4xf32>
    %127 = arith.addf %126, %123 : vector<288x4xf32>
    %cst_38 = arith.constant 0.000000e+00 : f32
    %128 = vector.broadcast %cst_38 : f32 to vector<288x4xf32>
    %129 = arith.maximumf %127, %128 : vector<288x4xf32>
    %c0_39 = arith.constant 0 : index
    %c0_40 = arith.constant 0 : index
    %c0_41 = arith.constant 0 : index
    %130 = vector.load %arg7[%c0_39, %c0_40, %c0_41] : memref<1x288x4xf32, #tpu.memory_space<vmem>>, vector<1x288x4xf32>
    %131 = vector.shape_cast %130 : vector<1x288x4xf32> to vector<288x4xf32>
    %132 = vector.shape_cast %129 : vector<288x4xf32> to vector<1x288x4xf32>
    tpu.vector_store %arg7[%c0_39, %c0_40, %c0_41], %132 {strides = array<i32>} : memref<1x288x4xf32, #tpu.memory_space<vmem>>, vector<1x288x4xf32>,
    return
  }
  func.func @transform_0(%arg0: i32) -> (i32, i32, i32) {
    %c0_i32 = arith.constant 0 : i32
    %c0_i32_0 = arith.constant 0 : i32
    %c0_i32_1 = arith.constant 0 : i32
    return %arg0, %c0_i32, %c0_i32_0 : i32, i32, i32
  }
  func.func @transform_1(%arg0: i32) -> (i32, i32, i32) {
    %c0_i32 = arith.constant 0 : i32
    %c0_i32_0 = arith.constant 0 : i32
    %c0_i32_1 = arith.constant 0 : i32
    %c0_i32_2 = arith.constant 0 : i32
    return %c0_i32, %c0_i32_0, %c0_i32_1 : i32, i32, i32
  }
  func.func @transform_2(%arg0: i32) -> (i32, i32) {
    %c0_i32 = arith.constant 0 : i32
    %c0_i32_0 = arith.constant 0 : i32
    %c0_i32_1 = arith.constant 0 : i32
    return %c0_i32, %c0_i32_0 : i32, i32
  }
  func.func @transform_3(%arg0: i32) -> (i32, i32, i32) {
    %c0_i32 = arith.constant 0 : i32
    %c0_i32_0 = arith.constant 0 : i32
    %c0_i32_1 = arith.constant 0 : i32
    %c0_i32_2 = arith.constant 0 : i32
    return %c0_i32, %c0_i32_0, %c0_i32_1 : i32, i32, i32
  }
  func.func @transform_4(%arg0: i32) -> (i32, i32) {
    %c0_i32 = arith.constant 0 : i32
    %c0_i32_0 = arith.constant 0 : i32
    %c0_i32_1 = arith.constant 0 : i32
    return %c0_i32, %c0_i32_0 : i32, i32
  }
  func.func @transform_5(%arg0: i32) -> (i32, i32) {
    %c0_i32 = arith.constant 0 : i32
    %c0_i32_0 = arith.constant 0 : i32
    %c0_i32_1 = arith.constant 0 : i32
    return %c0_i32, %c0_i32_0 : i32, i32
  }
  func.func @transform_6(%arg0: i32) -> (i32, i32, i32) {
    %c0_i32 = arith.constant 0 : i32
    %c0_i32_0 = arith.constant 0 : i32
    %c0_i32_1 = arith.constant 0 : i32
    return %arg0, %c0_i32, %c0_i32_0 : i32, i32, i32
  }
}

</mosaic_0001>

<bundles_post_ra>
// kernel: tpu_custom_call.1
= control target key start
LH: loop header
LB: loop body
LE: loop exit
PB: predicated region body
PF: predicated region fallthrough
CT: control target
= control target key end

     0   :  { %s8715_s21 = smov 0   ;;  %s10737_s0 = inlined_call_operand.vmem [shape: bf16[2,326,4], index: 0, kind: input, shape index: {}]   ;;  %s10738_s1 = inlined_call_operand.vmem [shape: bf16[9,4,4], index: 1, kind: input, shape index: {}]   ;;  %s10739_s2 = inlined_call_operand.vmem [shape: f32[1,4], index: 2, kind: input, shape index: {}]   ;;  %s10740_s3 = inlined_call_operand.vmem [shape: bf16[9,4,4], index: 3, kind: input, shape index: {}]   ;;  %s10741_s4 = inlined_call_operand.vmem [shape: f32[1,4], index: 4, kind: input, shape index: {}]   ;;  %s10742_s5 = inlined_call_operand.vmem [shape: f32[288,1], index: 5, kind: input, shape index: {}]   ;;  %s10743_s6 = inlined_call_operand.vmem [shape: f32[2,288,4], index: 6, kind: output, shape index: {}]  }
   0x1 LB: > { %s6618_s22 = sadd.s32 4294967295, %s8676_s21   ;;  %p6622_p0 = scmp.ge.s32.totalorder %s8676_s21, 1  ;;  %s8676_s21 = sphi %s8715_s21, %s16_s21  }
   0x2   : > { %p212_p1 = scmp.lt.s32.totalorder %s8676_s21, 3 }
   0x4   : > { %p213_p2 = pnand %p6622_p0, %p212_p1 }
   0x6   : > { %216 = sbr.rel (%p213_p2) target bundleno = 1704 (0x6a8), region = 44 }
   0xd   : > { %v336_v0 = vld [vmem:[%s10738_s1 + $0x2] sm:$0x3]  ;;  %vm612_vm0 = vcmask 1041408   ;;  %p242_p3 = scmp.lt.s32.totalorder %s6618_s22, 1  ;;  %v335_v2 = vld [vmem:[%s10738_s1] sm:$0x3] }
   0xe   : > { %8578 = vmatprep.subr.msk.bf16.mxu0 %vm612_vm0, %v336_v0  ;;  %v614_v1 = vsel %vm612_vm0, %v336_v0, 0  ;;  %vm408_vm1 = vsmask.f32 7424  ;;  %vm557_vm2 = vcmask 31744   ;;  %v830_v23 = vsel %vm612_vm0, %v335_v2, 0 }
   0xf   : > { %7319 = vmatpush3.bf16.msra.mxu0 %v614_v1  ;;  %s10896_s22 = smov (!%p242_p3, %s6618_s22), 1  ;;  %v8804_v33 = vld [vmem:[%s10738_s1 + $0x4] sm:$0x3]  ;;  %vm1028_vm3 = vcmask 1046528   ;;  %vm1566_vm4 = vsmask.f32 6400 }
  0x10   : > { %8579 = vmatprep.subr.msk.bf16.mxu0 %vm612_vm0, %v335_v2  ;;  %s8596_s27 = smul.u32 164, %s10896_s22  ;;  %vm1922_vm5 = vcmask 1045504   ;;  %vm2460_vm6 = vsmask.f32 5376  ;;  %vm2816_vm7 = vcmask 1044480   ;;  %vm3459_vm8 = vcmask 29696  }
  0x11   : > { %s8597_s10 = smul.u32 288, %s10896_s22 }
  0x12   : > { %s8738_s30 = scalar_lea.vmem %s10737_s0, %s8596_s27 }
  0x13   : > { %v8741_v3 = vld [vmem:[%s8738_s30 + $0x8] sm:$0xff]   ;;  %v8744_v4 = vld [vmem:[%s8738_s30] sm:$0xff]   ;;  %v8747_v5 = vld [vmem:[%s8738_s30 + $0x10] sm:$0xff]   ;;  %s10580_s12 = scalar_lea.vmem %s10743_s6, %s8597_s10 }
  0x14   : > { %v8750_v6 = vld [vmem:[%s8738_s30 + $0x18] sm:$0xff]   ;;  %v8753_v7 = vld [vmem:[%s8738_s30 + $0x20] sm:$0xff]   ;;  %v410_v8 = vshrl.u32 %v8744_v4, 16  ;;  %v412_v9 = vshll.u32 %v8744_v4, 16  ;;  %v10745_v10 = vshll.u32 %v8741_v3, 16  ;;  %v10744_v11 = vshrl.u32 %v8741_v3, 16 }
  0x15   : > { %v8760_v12 = vld [vmem:[%s8738_s30 + $0x28] sm:$0xff]   ;;  %v8763_v13 = vshll.u32 %v8747_v5, 16  ;;  %v8766_v14 = vshrl.u32 %v8747_v5, 16  ;;  %v8769_v15 = vshll.u32 %v8750_v6, 16  ;;  %v8778_v22 = vshll.u32 %v8753_v7, 16  ;;  %v8786_v26 = vld [vmem:[%s8738_s30 + $0x30] sm:$0xff]  }
  0x16   : > { %10799 = vst [vmem:[#allocation3_spill] sm:$0xff] %v8760_v12  ;;  %v414_v16 = vrot.slane %v412_v9, 1  ;;  %v419_v17 = vrot.slane %v10745_v10, 1  ;;  %v8783_v25 = vshrl.u32 %v8750_v6, 16  ;;  %10800 = vst [vmem:[#allocation4_spill] sm:$0xff] %v8786_v26  ;;  %v8791_v29 = vshrl.u32 %v8753_v7, 16 }
  0x17   : > { %v427_v18 = vrot.slane %v8763_v13, 1  ;;  %v435_v19 = vrot.slane %v8769_v15, 1  ;;  %v8794_v30 = vshll.u32 %v8760_v12, 16  ;;  %v8799_v32 = vld [vmem:[%s8738_s30 + $0x38] sm:$0xff]   ;;  %v443_v34 = vrot.slane %v8778_v22, 1  ;;  %v8822_v41 = vld [vmem:[%s8738_s30 + $0x40] sm:$0xff]  }
  0x18   : > { %v415_v20 = vor.u32 %v414_v16, %v410_v8  ;;  %v423_v21 = vor.u32 %v10744_v11, %v419_v17  ;;  %10801 = vst [vmem:[#allocation5_spill] sm:$0xff] %v8799_v32  ;;  %v8815_v38 = vshll.u32 %v8786_v26, 16  ;;  %v8819_v40 = vshrl.u32 %v8760_v12, 16  ;;  %10802 = vst [vmem:[#allocation6_spill] sm:$0xff] %v8822_v41  ;;  %v8832_v45 = vld [vmem:[%s8738_s30 + $0x48] sm:$0xff]   ;;  %v8848_v53 = vld [vmem:[%s8738_s30 + $0x50] sm:$0xff]  }
  0x19   : > { %v431_v24 = vor.u32 %v8766_v14, %v427_v18  ;;  %v439_v35 = vor.u32 %v8783_v25, %v435_v19  ;;  %v447_v36 = vor.u32 %v8791_v29, %v443_v34  ;;  %v451_v37 = vrot.slane %v8794_v30, 1  ;;  %10803 = vst [vmem:[#allocation7_spill] sm:$0xff] %v8832_v45  ;;  %10804 = vst [vmem:[#allocation8_spill] sm:$0xff] %v8848_v53  ;;  %v8858_v57 = vld [vmem:[%s8738_s30 + $0x58] sm:$0xff]   ;;  %v8874_v1 = vld [vmem:[%s8738_s30 + $0x60] sm:$0xff]  }
  0x1a   : > { %v420_v27 = vsel %vm408_vm1, %v415_v20, %v419_v17  ;;  %v428_v28 = vsel %vm408_vm1, %v423_v21, %v427_v18  ;;  %v8826_v43 = vshrl.u32 %v8786_v26, 16  ;;  %v8829_v44 = vshll.u32 %v8799_v32, 16  ;;  %10805 = vst [vmem:[#allocation9_spill] sm:$0xff] %v8858_v57  ;;  %10806 = vst [vmem:[#allocation10_spill] sm:$0xff] %v8874_v1  ;;  %v8884_v16 = vld [vmem:[%s8738_s30 + $0x68] sm:$0xff]  }
  0x1b   : > { %7320 = vmatprep.mubr.msk.bf16.mxu0 %vm557_vm2, %v420_v27  ;;  %v436_v31 = vsel %vm408_vm1, %v431_v24, %v435_v19  ;;  %v444_v39 = vsel %vm408_vm1, %v439_v35, %v443_v34  ;;  %v452_v42 = vsel %vm408_vm1, %v447_v36, %v451_v37  ;;  %v459_v46 = vrot.slane %v8815_v38, 1  ;;  %10807 = vst [vmem:[#allocation11_spill] sm:$0xff] %v8884_v16  ;;  %v8900_v27 = vld [vmem:[%s8738_s30 + $0x70] sm:$0xff]   ;;  %v8910_v35 = vld [vmem:[%s8738_s30 + $0x78] sm:$0xff]  }
  0x1c   : > { %7321 = vmatmul.mubr.msk.bf16.vlgmr.msra.gmra.mrb[0].mxu0 %vm557_vm2, %v428_v28  ;;  %v455_v47 = vor.u32 %v8819_v40, %v451_v37  ;;  %v467_v49 = vrot.slane %v8829_v44, 1  ;;  %v8841_v50 = vshll.u32 %v8822_v41, 16  ;;  %v8845_v52 = vshrl.u32 %v8799_v32, 16  ;;  %10808 = vst [vmem:[#allocation12_spill] sm:$0xff] %v8900_v27 }
  0x1d   : > { %7357 = vmatpush3.bf16.msra.mxu0 %v830_v23  ;;  %7324 = vmatprep.mubr.msk.bf16.mxu0 %vm557_vm2, %v436_v31  ;;  %v463_v48 = vor.u32 %v8826_v43, %v459_v46  ;;  %v8852_v55 = vshrl.u32 %v8822_v41, 16  ;;  %v8855_v56 = vshll.u32 %v8832_v45, 16  ;;  %v8867_v62 = vshll.u32 %v8848_v53, 16 }
  0x1e   : > { %8580 = vmatprep.subr.msk.bf16.mxu0 %vm612_vm0, %v8804_v33  ;;  %v460_v51 = vsel %vm408_vm1, %v455_v47, %v459_v46  ;;  %v475_v58 = vrot.slane %v8841_v50, 1  ;;  %v471_v59 = vor.u32 %v8845_v52, %v467_v49  ;;  %v8871_v0 = vshrl.u32 %v8832_v45, 16 }
  0x1f   : > { %v468_v54 = vsel %vm408_vm1, %v463_v48, %v467_v49  ;;  %v483_v61 = vrot.slane %v8855_v56, 1  ;;  %v8878_v8 = vshrl.u32 %v8848_v53, 16  ;;  %v8881_v9 = vshll.u32 %v8858_v57, 16  ;;  %v8926_v49 = vld [vmem:[%s8738_s30 + $0x80] sm:$0xff]  }
  0x20   : > { %v479_v60 = vor.u32 %v8852_v55, %v475_v58  ;;  %v476_v63 = vsel %vm408_vm1, %v471_v59, %v475_v58  ;;  %v491_v17 = vrot.slane %v8867_v62, 1  ;;  %v8893_v21 = vshll.u32 %v8874_v1, 16  ;;  %10809 = vst [vmem:[#allocation13_spill] sm:$0xff] %v8926_v49  ;;  %v8936_v59 = vld [vmem:[%s8738_s30 + $0x88] sm:$0xff]  }
  0x21   : > { %v487_v18 = vor.u32 %v8871_v0, %v483_v61  ;;  %v499_v20 = vrot.slane %v8881_v9, 1  ;;  %v8897_v24 = vshrl.u32 %v8858_v57, 16  ;;  %v8904_v31 = vshrl.u32 %v8874_v1, 16  ;;  %10810 = vst [vmem:[#allocation14_spill] sm:$0xff] %v8936_v59 }
  0x22   : > { %v484_v2 = vsel %vm408_vm1, %v479_v60, %v483_v61  ;;  %v495_v19 = vor.u32 %v8878_v8, %v491_v17  ;;  %v8907_v34 = vshll.u32 %v8884_v16, 16  ;;  %v507_v36 = vrot.slane %v8893_v21, 1 }
  0x23   : > { %v492_v23 = vsel %vm408_vm1, %v487_v18, %v491_v17  ;;  %v503_v37 = vor.u32 %v8897_v24, %v499_v20  ;;  %v8919_v46 = vshll.u32 %v8900_v27, 16  ;;  %v8923_v48 = vshrl.u32 %v8884_v16, 16 }
  0x24   : > { %7325 = vmatmul.mubr.msk.bf16.gmra.mrb[4].mxu0 %vm557_vm2, %v444_v39  ;;  %v500_v28 = vsel %vm408_vm1, %v495_v19, %v499_v20  ;;  %v511_v39 = vor.u32 %v8904_v31, %v507_v36  ;;  %v8933_v58 = vshll.u32 %v8910_v35, 16  ;;  %v8945_v17 = vshll.u32 %v8926_v49, 16 }
  0x25   : > { %7328 = vmatprep.mubr.msk.bf16.mxu0 %vm557_vm2, %v452_v42  ;;  %v515_v42 = vrot.slane %v8907_v34, 1  ;;  %v508_v47 = vsel %vm408_vm1, %v503_v37, %v507_v36  ;;  %v523_v60 = vrot.slane %v8919_v46, 1  ;;  %v8949_v19 = vshrl.u32 %v8910_v35, 16  ;;  %v8959_v36 = vld [vmem:[%s8738_s30 + $0x90] sm:$0xf] }
  0x26   : > { %v539_v37 = vrot.slane %v8945_v17, 1 }
  0x27   : > { %v519_v61 = vor.u32 %v8923_v48, %v515_v42 }
  0x29   : > { %v524_v18 = vsel %vm408_vm1, %v519_v61, %v523_v60  ;;  %v8973_v61 = vshrl.u32 %v8936_v59, 16 }
  0x2c   : > { %7329 = vmatmul.mubr.msk.bf16.gmra.mrb[8].mxu0 %vm557_vm2, %v460_v51  ;;  %v516_v51 = vsel %vm408_vm1, %v511_v39, %v515_v42  ;;  %v8967_v42 = vcombine.low %v8959_v36, %v8959_v36 }
  0x2d   : > { %7332 = vmatprep.mubr.msk.bf16.mxu0 %vm557_vm2, %v468_v54  ;;  %v8930_v54 = vshrl.u32 %v8900_v27, 16 }
  0x34   : > { %7333 = vmatmul.mubr.msk.bf16.gmra.mrb[12].mxu0 %vm557_vm2, %v476_v63  ;;  %v527_v63 = vor.u32 %v8930_v54, %v523_v60 }
  0x35   : > { %7336 = vmatprep.mubr.msk.bf16.mxu0 %vm557_vm2, %v484_v2  ;;  %v531_v2 = vrot.slane %v8933_v58, 1 }
  0x37   : > { %v532_v20 = vsel %vm408_vm1, %v527_v63, %v531_v2  ;;  %v535_v39 = vor.u32 %v8949_v19, %v531_v2  ;;  %v553_v63 = vshll.u32 %v8967_v42, 16 }
  0x39   : > { %v540_v60 = vsel %vm408_vm1, %v535_v39, %v539_v37  ;;  %v338_v39 = vld [vmem:[%s10738_s1 + $0x6] sm:$0x3] }
  0x3c   : > { %7337 = vmatmul.mubr.msk.bf16.gmra.mrb[16].mxu0 %vm557_vm2, %v492_v23  ;;  %v8953_v23 = vshrl.u32 %v8926_v49, 16 }
  0x3d   : > { %7340 = vmatprep.mubr.msk.bf16.mxu0 %vm557_vm2, %v500_v28  ;;  %v8956_v28 = vshll.u32 %v8936_v59, 16 }
  0x44   : > { %7341 = vmatmul.mubr.msk.bf16.gmra.mrb[20].mxu0 %vm557_vm2, %v508_v47  ;;  %v543_v47 = vor.u32 %v8953_v23, %v539_v37  ;;  %v1121_v37 = vsel %vm612_vm0, %v8804_v33, 0  ;;  %v1030_v33 = vrot.slane %v8741_v3, 1 }
  0x45   : > { %7344 = vmatprep.mubr.msk.bf16.mxu0 %vm557_vm2, %v516_v51  ;;  %v547_v51 = vrot.slane %v8956_v28, 1 }
  0x47   : > { %v551_v2 = vor.u32 %v8973_v61, %v547_v51 }
  0x4c   : > { %7345 = vmatmul.mubr.msk.bf16.gmra.mrb[24].mxu0 %vm557_vm2, %v524_v18  ;;  %v548_v18 = vsel %vm408_vm1, %v543_v47, %v547_v51  ;;  %v1032_v51 = vrot.slane %v8747_v5, 1 }
  0x4d   : > { %7348 = vmatprep.mubr.msk.bf16.mxu0 %vm557_vm2, %v532_v20  ;;  %v555_v20 = vrot.slane %v553_v63, 1 }
  0x4e   : > { %v1033_v63 = vsel %vm1028_vm3, %v1030_v33, %v1032_v51 }
  0x4f   : > { %v556_v11 = vsel %vm408_vm1, %v551_v2, %v555_v20  ;;  %v339_v2 = vld [vmem:[%s10738_s1 + $0x8] sm:$0x3]  ;;  %v1036_v20 = vrot.slane %v8753_v7, 1 }
  0x54   : > { %7349 = vmatmul.mubr.msk.bf16.gmra.mrb[28].mxu0 %vm557_vm2, %v540_v60  ;;  %v1034_v60 = vrot.slane %v8750_v6, 1 }
  0x55   : > { %7352 = vmatprep.mubr.msk.bf16.mxu0 %vm557_vm2, %v548_v18  ;;  %v1351_v18 = vsel %vm612_vm0, %v338_v39, 0 }
  0x5c   : > { %7353 = vmatmul.mubr.msk.bf16.gmra.mrb[32].mxu0 %vm557_vm2, %v556_v11  ;;  %v1029_v11 = vrot.slane %v8744_v4, 1 }
  0x5d   : > { %7358 = vmatprep.mubr.msk.bf16.mxu0 %vm557_vm2, %v8744_v4  ;;  %v1035_v4 = vsel %vm1028_vm3, %v1032_v51, %v1034_v60 }
  0x5e   : > { %v1031_v47 = vsel %vm1028_vm3, %v1029_v11, %v1030_v33  ;;  %v1037_v11 = vsel %vm1028_vm3, %v1034_v60, %v1036_v20  ;;  %v1040_v33 = vrot.slane %v8786_v26, 1  ;;  %v1044_v60 = vrot.slane %v8822_v41, 1 }
  0x64   : > { %7359 = vmatmul.mubr.msk.bf16.vlgmr.msra.gmra.mrb[0].mxu0 %vm557_vm2, %v8741_v3 }
  0x65   : > { %7395 = vmatpush3.bf16.msra.mxu0 %v1121_v37  ;;  %7362 = vmatprep.mubr.msk.bf16.mxu0 %vm557_vm2, %v8747_v5  ;;  %v1038_v37 = vrot.slane %v8760_v12, 1 }
  0x66   : > { %8581 = vmatprep.subr.msk.bf16.mxu0 %vm612_vm0, %v338_v39 }
  0x67   : > { %v1039_v39 = vsel %vm1028_vm3, %v1036_v20, %v1038_v37  ;;  %v1041_v51 = vsel %vm1028_vm3, %v1038_v37, %v1040_v33  ;;  %v1046_v20 = vrot.slane %v8832_v45, 1  ;;  %v1048_v37 = vrot.slane %v8848_v53, 1 }
  0x6c   : > { %7363 = vmatmul.mubr.msk.bf16.gmra.mrb[4].mxu0 %vm557_vm2, %v8750_v6 }
  0x6d   : > { %7366 = vmatprep.mubr.msk.bf16.mxu0 %vm557_vm2, %v8753_v7 }
  0x74   : > { %7367 = vmatmul.mubr.msk.bf16.gmra.mrb[8].mxu0 %vm557_vm2, %v8760_v12  ;;  %v1047_v12 = vsel %vm1028_vm3, %v1044_v60, %v1046_v20 }
  0x75   : > { %7370 = vmatprep.mubr.msk.bf16.mxu0 %vm557_vm2, %v8786_v26 }
  0x7c   : > { %7371 = vmatmul.mubr.msk.bf16.gmra.mrb[12].mxu0 %vm557_vm2, %v8799_v32 }
  0x7d   : > { %7374 = vmatprep.mubr.msk.bf16.mxu0 %vm557_vm2, %v8822_v41 }
  0x84   : > { %7375 = vmatmul.mubr.msk.bf16.gmra.mrb[16].mxu0 %vm557_vm2, %v8832_v45 }
  0x85   : > { %7378 = vmatprep.mubr.msk.bf16.mxu0 %vm557_vm2, %v8848_v53 }
  0x8c   : > { %7379 = vmatmul.mubr.msk.bf16.gmra.mrb[20].mxu0 %vm557_vm2, %v8858_v57 }
  0x8d   : > { %7382 = vmatprep.mubr.msk.bf16.mxu0 %vm557_vm2, %v8874_v1 }
  0x94   : > { %7383 = vmatmul.mubr.msk.bf16.gmra.mrb[24].mxu0 %vm557_vm2, %v8884_v16 }
  0x95   : > { %7386 = vmatprep.mubr.msk.bf16.mxu0 %vm557_vm2, %v8900_v27 }
  0x9c   : > { %7387 = vmatmul.mubr.msk.bf16.gmra.mrb[28].mxu0 %vm557_vm2, %v8910_v35 }
  0x9d   : > { %7390 = vmatprep.mubr.msk.bf16.mxu0 %vm557_vm2, %v8926_v49 }
  0xa4   : > { %7391 = vmatmul.mubr.msk.bf16.gmra.mrb[32].mxu0 %vm557_vm2, %v8936_v59 }
  0xa5   : > { %7396 = vmatprep.mubr.msk.bf16.mxu0 %vm557_vm2, %v1031_v47  ;;  %v1042_v47 = vrot.slane %v8799_v32, 1  ;;  %v1049_v32 = vsel %vm1028_vm3, %v1046_v20, %v1048_v37  ;;  %v1056_v20 = vrot.slane %v8900_v27, 1 }
  0xa7   : > { %v1045_v10 = vsel %vm1028_vm3, %v1042_v47, %v1044_v60  ;;  %v1054_v60 = vrot.slane %v8884_v16, 1 }
  0xac   : > { %7397 = vmatmul.mubr.msk.bf16.vlgmr.msra.gmra.mrb[0].mxu0 %vm557_vm2, %v1033_v63 }
  0xad   : > { %7433 = vmatpush3.bf16.msra.mxu0 %v1351_v18  ;;  %7400 = vmatprep.mubr.msk.bf16.mxu0 %vm557_vm2, %v1035_v4  ;;  %v1043_v18 = vsel %vm1028_vm3, %v1040_v33, %v1042_v47  ;;  %v1050_v33 = vrot.slane %v8858_v57, 1  ;;  %v1052_v47 = vrot.slane %v8874_v1, 1  ;;  %v1057_v57 = vsel %vm1028_vm3, %v1054_v60, %v1056_v20 }
  0xae   : > { %8582 = vmatprep.subr.msk.bf16.mxu0 %vm612_vm0, %v339_v2 }
  0xaf   : > { %v1051_v26 = vsel %vm1028_vm3, %v1048_v37, %v1050_v33  ;;  %v1053_v45 = vsel %vm1028_vm3, %v1050_v33, %v1052_v47  ;;  %v1055_v41 = vsel %vm1028_vm3, %v1052_v47, %v1054_v60  ;;  %v1058_v37 = vrot.slane %v8910_v35, 1 }
  0xb0   : > { %v1060_v33 = vrot.slane %v8926_v49, 1  ;;  %v1062_v47 = vrot.slane %v8936_v59, 1  ;;  %v1064_v60 = vrot.slane %v8967_v42, 1  ;;  %v1707_v49 = vsel %vm612_vm0, %v339_v2, 0 }
  0xb1   : > { %v1059_v53 = vsel %vm1028_vm3, %v1056_v20, %v1058_v37 }
  0xb2   : > { %v1061_v16 = vsel %vm1028_vm3, %v1058_v37, %v1060_v33  ;;  %v1063_v1 = vsel %vm1028_vm3, %v1060_v33, %v1062_v47  ;;  %v1065_v20 = vsel %vm1028_vm3, %v1062_v47, %v1064_v60  ;;  %v340_v37 = vld [vmem:[%s10738_s1 + $0xa] sm:$0x3]  ;;  %v1578_v33 = vrot.slane %v8791_v29, 1 }
  0xb4   : > { %7401 = vmatmul.mubr.msk.bf16.gmra.mrb[4].mxu0 %vm557_vm2, %v1037_v11 }
  0xb5   : > { %7404 = vmatprep.mubr.msk.bf16.mxu0 %vm557_vm2, %v1039_v39 }
  0xbc   : > { %7405 = vmatmul.mubr.msk.bf16.gmra.mrb[8].mxu0 %vm557_vm2, %v1041_v51 }
  0xbd   : > { %7408 = vmatprep.mubr.msk.bf16.mxu0 %vm557_vm2, %v1043_v18 }
  0xc4   : > { %7409 = vmatmul.mubr.msk.bf16.gmra.mrb[12].mxu0 %vm557_vm2, %v1045_v10 }
  0xc5   : > { %7412 = vmatprep.mubr.msk.bf16.mxu0 %vm557_vm2, %v1047_v12 }
  0xcc   : > { %7413 = vmatmul.mubr.msk.bf16.gmra.mrb[16].mxu0 %vm557_vm2, %v1049_v32 }
  0xcd   : > { %7416 = vmatprep.mubr.msk.bf16.mxu0 %vm557_vm2, %v1051_v26 }
  0xd4   : > { %7417 = vmatmul.mubr.msk.bf16.gmra.mrb[20].mxu0 %vm557_vm2, %v1053_v45 }
  0xd5   : > { %7420 = vmatprep.mubr.msk.bf16.mxu0 %vm557_vm2, %v1055_v41 }
  0xdc   : > { %7421 = vmatmul.mubr.msk.bf16.gmra.mrb[24].mxu0 %vm557_vm2, %v1057_v57 }
  0xdd   : > { %7424 = vmatprep.mubr.msk.bf16.mxu0 %vm557_vm2, %v1059_v53 }
  0xe4   : > { %7425 = vmatmul.mubr.msk.bf16.gmra.mrb[28].mxu0 %vm557_vm2, %v1061_v16 }
  0xe5   : > { %7428 = vmatprep.mubr.msk.bf16.mxu0 %vm557_vm2, %v1063_v1 }
  0xec   : > { %7429 = vmatmul.mubr.msk.bf16.gmra.mrb[32].mxu0 %vm557_vm2, %v1065_v20 }
  0xed   : > { %7434 = vmatprep.mubr.msk.bf16.mxu0 %vm557_vm2, %v1033_v63 }
  0xf4   : > { %7435 = vmatmul.mubr.msk.bf16.vlgmr.msra.gmra.mrb[0].mxu0 %vm557_vm2, %v1035_v4 }
  0xf5   : > { %7471 = vmatpush3.bf16.msra.mxu0 %v1707_v49  ;;  %7438 = vmatprep.mubr.msk.bf16.mxu0 %vm557_vm2, %v1037_v11  ;;  %v290_v49 = vld [vmem:[%s8738_s30 + $0x94] sm:$0xf] }
  0xf6   : > { %8583 = vmatprep.subr.msk.bf16.mxu0 %vm612_vm0, %v340_v37  ;;  %v9104_v42 = vcombine.low %v8959_v36, %v290_v49  ;;  %v1582_v49 = vrot.slane %v8819_v40, 1 }
  0xfc   : > { %7439 = vmatmul.mubr.msk.bf16.gmra.mrb[4].mxu0 %vm557_vm2, %v1039_v39  ;;  %v1574_v39 = vrot.slane %v8783_v25, 1 }
  0xfd   : > { %7442 = vmatprep.mubr.msk.bf16.mxu0 %vm557_vm2, %v1041_v51  ;;  %v1575_v51 = vrot.slane %v8769_v15, 2 }
 0x104   : > { %7443 = vmatmul.mubr.msk.bf16.gmra.mrb[8].mxu0 %vm557_vm2, %v1043_v18 }
 0x105   : > { %7446 = vmatprep.mubr.msk.bf16.mxu0 %vm557_vm2, %v1045_v10  ;;  %v1340_v10 = vrot.slane %v9104_v42, 1 }
 0x10c   : > { %7447 = vmatmul.mubr.msk.bf16.gmra.mrb[12].mxu0 %vm557_vm2, %v1047_v12  ;;  %v9110_v12 = vld [vmem:[%s8738_s30 + $0x98] sm:$0xf] }
 0x10d   : > { %7450 = vmatprep.mubr.msk.bf16.mxu0 %vm557_vm2, %v1049_v32 }
 0x114   : > { %7451 = vmatmul.mubr.msk.bf16.gmra.mrb[16].mxu0 %vm557_vm2, %v1051_v26  ;;  %v10811_v26 = vshll.u32 %v8741_v3, 16 }
 0x115   : > { %7454 = vmatprep.mubr.msk.bf16.mxu0 %vm557_vm2, %v1053_v45  ;;  %v1341_v45 = vsel %vm1028_vm3, %v1062_v47, %v1340_v10  ;;  %v1579_v47 = vrot.slane %v8778_v22, 2 }
 0x116   : > { %v1568_v32 = vrot.slane %v10811_v26, 2  ;;  %v2015_v26 = vsel %vm612_vm0, %v340_v37, 0 }
 0x117   : > { %v1580_v60 = vor.u32 %v1579_v47, %v1578_v33  ;;  %v1598_v47 = vrot.slane %v8871_v0, 1 }
 0x11c   : > { %7455 = vmatmul.mubr.msk.bf16.gmra.mrb[20].mxu0 %vm557_vm2, %v1055_v41  ;;  %v9116_v41 = vcombine.low %v9110_v12, %v9110_v12 }
 0x11d   : > { %7458 = vmatprep.mubr.msk.bf16.mxu0 %vm557_vm2, %v1057_v57  ;;  %v10812_v57 = vshrl.u32 %v8741_v3, 16 }
 0x11e   : > { %v1342_v63 = vrot.slane %v9116_v41, 1 }
 0x11f   : > { %v1567_v36 = vrot.slane %v10812_v57, 1  ;;  %v1587_v57 = vrot.slane %v8815_v38, 2 }
 0x120   : > { %v1343_v11 = vsel %vm1028_vm3, %v1340_v10, %v1342_v63  ;;  %v1583_v10 = vrot.slane %v8794_v30, 2  ;;  %v1590_v63 = vrot.slane %v8845_v52, 1 }
 0x121   : > { %v1569_v4 = vor.u32 %v1568_v32, %v1567_v36  ;;  %v9144_v36 = vld [vmem:[%s10738_s1 + $0xc] sm:$0x3] }
 0x124   : > { %7459 = vmatmul.mubr.msk.bf16.gmra.mrb[24].mxu0 %vm557_vm2, %v1059_v53  ;;  %v1570_v53 = vrot.slane %v8766_v14, 1 }
 0x125   : > { %7462 = vmatprep.mubr.msk.bf16.mxu0 %vm557_vm2, %v1061_v16  ;;  %v1571_v16 = vrot.slane %v8763_v13, 2 }
 0x127   : > { %v1572_v2 = vor.u32 %v1571_v16, %v1570_v53  ;;  %v1584_v53 = vor.u32 %v1583_v10, %v1582_v49  ;;  %v1603_v49 = vrot.slane %v8867_v62, 2 }
 0x129   : > { %v1573_v18 = vsel %vm1566_vm4, %v1569_v4, %v1572_v2  ;;  %v1585_v37 = vsel %vm1566_vm4, %v1580_v60, %v1584_v53  ;;  %v1591_v4 = vrot.slane %v8829_v44, 2 }
 0x12c   : > { %7463 = vmatmul.mubr.msk.bf16.gmra.mrb[28].mxu0 %vm557_vm2, %v1063_v1  ;;  %v1576_v1 = vor.u32 %v1575_v51, %v1574_v39  ;;  %v1595_v39 = vrot.slane %v8841_v50, 2  ;;  %v1592_v51 = vor.u32 %v1591_v4, %v1590_v63 }
 0x12d   : > { %7466 = vmatprep.mubr.msk.bf16.mxu0 %vm557_vm2, %v1341_v45  ;;  %v1586_v45 = vrot.slane %v8826_v43, 1 }
 0x12e   : > { %v1577_v20 = vsel %vm1566_vm4, %v1572_v2, %v1576_v1  ;;  %v1581_v32 = vsel %vm1566_vm4, %v1576_v1, %v1580_v60  ;;  %v1599_v1 = vrot.slane %v8855_v56, 2 }
 0x12f   : > { %v1588_v16 = vor.u32 %v1587_v57, %v1586_v45  ;;  %v1606_v45 = vrot.slane %v8897_v24, 1  ;;  %v1607_v57 = vrot.slane %v8881_v9, 2 }
 0x130   : > { %v1600_v10 = vor.u32 %v1599_v1, %v1598_v47 }
 0x131   : > { %v1589_v2 = vsel %vm1566_vm4, %v1584_v53, %v1588_v16  ;;  %v1593_v33 = vsel %vm1566_vm4, %v1588_v16, %v1592_v51  ;;  %v1610_v16 = vrot.slane %v8904_v31, 1  ;;  %v1608_v63 = vor.u32 %v1607_v57, %v1606_v45 }
 0x134   : > { %7467 = vmatmul.mubr.msk.bf16.gmra.mrb[32].mxu0 %vm557_vm2, %v1343_v11  ;;  %v1594_v11 = vrot.slane %v8852_v55, 1 }
 0x135   : > { %7472 = vmatprep.mubr.msk.bf16.mxu0 %vm557_vm2, %v1573_v18 }
 0x136   : > { %v1596_v18 = vor.u32 %v1595_v39, %v1594_v11  ;;  %v1614_v11 = vrot.slane %v8923_v48, 1  ;;  %v1615_v39 = vrot.slane %v8907_v34, 2 }
 0x138   : > { %v1597_v60 = vsel %vm1566_vm4, %v1592_v51, %v1596_v18  ;;  %v1616_v47 = vor.u32 %v1615_v39, %v1614_v11 }
 0x13c   : > { %7473 = vmatmul.mubr.msk.bf16.vlgmr.msra.gmra.mrb[0].mxu0 %vm557_vm2, %v1577_v20  ;;  %v1602_v20 = vrot.slane %v8878_v8, 1 }
 0x13d   : > { %7509 = vmatpush3.bf16.msra.mxu0 %v2015_v26  ;;  %7476 = vmatprep.mubr.msk.bf16.mxu0 %vm557_vm2, %v1581_v32  ;;  %v1601_v32 = vsel %vm1566_vm4, %v1596_v18, %v1600_v10  ;;  %v1618_v18 = vrot.slane %v8930_v54, 1 }
 0x13e   : > { %8584 = vmatprep.subr.msk.bf16.mxu0 %vm612_vm0, %v9144_v36  ;;  %v1604_v26 = vor.u32 %v1603_v49, %v1602_v20  ;;  %v1622_v20 = vrot.slane %v8949_v19, 1  ;;  %v1623_v49 = vrot.slane %v8933_v58, 2 }
 0x140   : > { %v1605_v53 = vsel %vm1566_vm4, %v1600_v10, %v1604_v26  ;;  %v1624_v45 = vor.u32 %v1623_v49, %v1622_v20 }
 0x144   : > { %7477 = vmatmul.mubr.msk.bf16.gmra.mrb[4].mxu0 %vm557_vm2, %v1585_v37  ;;  %v1611_v37 = vrot.slane %v8893_v21, 2 }
 0x145   : > { %7480 = vmatprep.mubr.msk.bf16.mxu0 %vm557_vm2, %v1589_v2  ;;  %v1609_v2 = vsel %vm1566_vm4, %v1604_v26, %v1608_v63  ;;  %v1626_v26 = vrot.slane %v8953_v23, 1 }
 0x146   : > { %v1612_v4 = vor.u32 %v1611_v37, %v1610_v16  ;;  %v10766_v16 = vshll.u32 %v9104_v42, 16 }
 0x148   : > { %v1613_v51 = vsel %vm1566_vm4, %v1608_v63, %v1612_v4  ;;  %v1630_v63 = vrot.slane %v8973_v61, 1  ;;  %v1640_v39 = vrot.slane %v10766_v16, 2  ;;  %v10820_v16 = vld [vmem:[#allocation10_spill] sm:$0xff] }
 0x14c   : > { %7481 = vmatmul.mubr.msk.bf16.gmra.mrb[8].mxu0 %vm557_vm2, %v1593_v33  ;;  %v1619_v33 = vrot.slane %v8919_v46, 2 }
 0x14d   : > { %7484 = vmatprep.mubr.msk.bf16.mxu0 %vm557_vm2, %v1597_v60  ;;  %v1617_v60 = vsel %vm1566_vm4, %v1612_v4, %v1616_v47  ;;  %v1631_v4 = vrot.slane %v8956_v28, 2 }
 0x14e   : > { %v1620_v1 = vor.u32 %v1619_v33, %v1618_v18  ;;  %v1644_v18 = vshrl.u32 %v9116_v41, 16  ;;  %v1647_v33 = vshll.u32 %v9116_v41, 16 }
 0x150   : > { %v1621_v10 = vsel %vm1566_vm4, %v1616_v47, %v1620_v1  ;;  %v1625_v37 = vsel %vm1566_vm4, %v1620_v1, %v1624_v45  ;;  %v1649_v20 = vrot.slane %v1647_v33, 2 }
 0x154   : > { %7485 = vmatmul.mubr.msk.bf16.gmra.mrb[12].mxu0 %vm557_vm2, %v1601_v32  ;;  %v1627_v32 = vrot.slane %v8945_v17, 2 }
 0x155   : > { %7488 = vmatprep.mubr.msk.bf16.mxu0 %vm557_vm2, %v1605_v53  ;;  %v10767_v53 = vshrl.u32 %v9104_v42, 16 }
 0x156   : > { %v1628_v57 = vor.u32 %v1627_v32, %v1626_v26  ;;  %v1923_v26 = vrot.slane %v8741_v3, 2  ;;  %v1924_v32 = vrot.slane %v8747_v5, 2  ;;  %v2245_v3 = vsel %vm612_vm0, %v9144_v36, 0 }
 0x157   : > { %v1637_v11 = vrot.slane %v10767_v53, 1 }
 0x159   : > { %v1641_v47 = vor.u32 %v1640_v39, %v1637_v11  ;;  %v342_v11 = vld [vmem:[%s10738_s1 + $0xe] sm:$0x3] }
 0x15a   : > { %v10813_v39 = vld [vmem:[#allocation3_spill] sm:$0xff] }
 0x15c   : > { %7489 = vmatmul.mubr.msk.bf16.gmra.mrb[16].mxu0 %vm557_vm2, %v1609_v2  ;;  %v1629_v2 = vsel %vm1566_vm4, %v1624_v45, %v1628_v57 }
 0x15d   : > { %7492 = vmatprep.mubr.msk.bf16.mxu0 %vm557_vm2, %v1613_v51  ;;  %v1632_v51 = vor.u32 %v1631_v4, %v1630_v63  ;;  %v1928_v63 = vrot.slane %v8753_v7, 2 }
 0x15f   : > { %v1633_v1 = vsel %vm1566_vm4, %v1628_v57, %v1632_v51  ;;  %v1642_v49 = vsel %vm1566_vm4, %v1632_v51, %v1641_v47  ;;  %v1926_v57 = vrot.slane %v8750_v6, 2  ;;  %v1930_v51 = vrot.slane %v10813_v39, 2 }
 0x161   : > { %v1927_v4 = vsel %vm1922_vm5, %v1924_v32, %v1926_v57 }
 0x164   : > { %7493 = vmatmul.mubr.msk.bf16.gmra.mrb[20].mxu0 %vm557_vm2, %v1617_v60  ;;  %v1646_v60 = vrot.slane %v1644_v18, 1  ;;  %v10814_v18 = vld [vmem:[#allocation4_spill] sm:$0xff] }
 0x165   : > { %7496 = vmatprep.mubr.msk.bf16.mxu0 %vm557_vm2, %v1621_v10  ;;  %v1932_v33 = vrot.slane %v10814_v18, 2 }
 0x166   : > { %v1650_v10 = vor.u32 %v1649_v20, %v1646_v60  ;;  %v10816_v20 = vld [vmem:[#allocation6_spill] sm:$0xff] }
 0x167   : > { %v1933_v36 = vsel %vm1922_vm5, %v1930_v51, %v1932_v33 }
 0x168   : > { %v1651_v45 = vsel %vm1566_vm4, %v1641_v47, %v1650_v10  ;;  %v1931_v47 = vsel %vm1922_vm5, %v1928_v63, %v1930_v51  ;;  %v10819_v51 = vld [vmem:[#allocation9_spill] sm:$0xff] }
 0x16c   : > { %7497 = vmatmul.mubr.msk.bf16.gmra.mrb[24].mxu0 %vm557_vm2, %v1625_v37  ;;  %v1925_v37 = vsel %vm1922_vm5, %v1923_v26, %v1924_v32  ;;  %v10817_v32 = vld [vmem:[#allocation7_spill] sm:$0xff] }
 0x16d   : > { %7500 = vmatprep.mubr.msk.bf16.mxu0 %vm557_vm2, %v1629_v2  ;;  %v1929_v2 = vsel %vm1922_vm5, %v1926_v57, %v1928_v63 }
 0x174   : > { %7501 = vmatmul.mubr.msk.bf16.gmra.mrb[28].mxu0 %vm557_vm2, %v1633_v1  ;;  %v10815_v1 = vld [vmem:[#allocation5_spill] sm:$0xff] }
 0x175   : > { %7504 = vmatprep.mubr.msk.bf16.mxu0 %vm557_vm2, %v1642_v49  ;;  %v1934_v60 = vrot.slane %v10815_v1, 2  ;;  %v1936_v49 = vrot.slane %v10816_v20, 2 }
 0x177   : > { %v1935_v10 = vsel %vm1922_vm5, %v1932_v33, %v1934_v60  ;;  %v1937_v26 = vsel %vm1922_vm5, %v1934_v60, %v1936_v49  ;;  %v1942_v33 = vrot.slane %v10819_v51, 2  ;;  %v1944_v60 = vrot.slane %v10820_v16, 2  ;;  %v10822_v16 = vld [vmem:[#allocation13_spill] sm:$0xff] }
 0x179   : > { %v1945_v20 = vsel %vm1922_vm5, %v1942_v33, %v1944_v60 }
 0x17c   : > { %7505 = vmatmul.mubr.msk.bf16.gmra.mrb[32].mxu0 %vm557_vm2, %v1651_v45  ;;  %v1938_v45 = vrot.slane %v10817_v32, 2 }
 0x17d   : > { %7510 = vmatprep.mubr.msk.bf16.mxu0 %vm557_vm2, %v1925_v37  ;;  %v10818_v37 = vld [vmem:[#allocation8_spill] sm:$0xff] }
 0x17e   : > { %v1940_v57 = vrot.slane %v10818_v37, 2  ;;  %v1939_v63 = vsel %vm1922_vm5, %v1936_v49, %v1938_v45  ;;  %v10821_v37 = vld [vmem:[#allocation11_spill] sm:$0xff] }
 0x17f   : > { %v1946_v49 = vrot.slane %v10821_v37, 2 }
 0x180   : > { %v1943_v53 = vsel %vm1922_vm5, %v1940_v57, %v1942_v33  ;;  %v1952_v33 = vrot.slane %v10822_v16, 2 }
 0x181   : > { %v1947_v32 = vsel %vm1922_vm5, %v1944_v60, %v1946_v49  ;;  %v1954_v60 = vrot.slane %v8936_v59, 2  ;;  %v2601_v59 = vsel %vm612_vm0, %v342_v11, 0 }
 0x184   : > { %7511 = vmatmul.mubr.msk.bf16.vlgmr.msra.gmra.mrb[0].mxu0 %vm557_vm2, %v1927_v4 }
 0x185   : > { %7547 = vmatpush3.bf16.msra.mxu0 %v2245_v3  ;;  %7514 = vmatprep.mubr.msk.bf16.mxu0 %vm557_vm2, %v1929_v2  ;;  %v1941_v3 = vsel %vm1922_vm5, %v1938_v45, %v1940_v57  ;;  %v1948_v45 = vrot.slane %v8900_v27, 2  ;;  %v1950_v57 = vrot.slane %v8910_v35, 2  ;;  %v1955_v27 = vsel %vm1922_vm5, %v1952_v33, %v1954_v60 }
 0x186   : > { %8585 = vmatprep.subr.msk.bf16.mxu0 %vm612_vm0, %v342_v11  ;;  %v357_v11 = vld [vmem:[%s10742_s5 + $0x20] sm:$0xff] }
 0x187   : > { %v1949_v1 = vsel %vm1922_vm5, %v1946_v49, %v1948_v45  ;;  %v1951_v51 = vsel %vm1922_vm5, %v1948_v45, %v1950_v57  ;;  %v1953_v18 = vsel %vm1922_vm5, %v1950_v57, %v1952_v33  ;;  %v1956_v49 = vrot.slane %v9104_v42, 2  ;;  %v9276_v33 = vld [vmem:[%s10738_s1 + $0x10] sm:$0x3] }
 0x188   : > { %v1958_v45 = vrot.slane %v9116_v41, 2  ;;  %v355_v41 = vld [vmem:[%s10742_s5 + $0x10] sm:$0xff] }
 0x189   : > { %v1957_v37 = vsel %vm1922_vm5, %v1954_v60, %v1956_v49  ;;  %v2464_v60 = vrot.slane %v8783_v25, 2 }
 0x18a   : > { %v1959_v57 = vsel %vm1922_vm5, %v1956_v49, %v1958_v45  ;;  %v2465_v45 = vrot.slane %v8769_v15, 3  ;;  %v366_v15 = vld [vmem:[%s10742_s5 + $0x68] sm:$0xff] }
 0x18c   : > { %7515 = vmatmul.mubr.msk.bf16.gmra.mrb[4].mxu0 %vm557_vm2, %v1931_v47  ;;  %v2466_v25 = vor.u32 %v2465_v45, %v2464_v60  ;;  %v2484_v60 = vrot.slane %v8852_v55, 2  ;;  %v2485_v45 = vrot.slane %v8841_v50, 3  ;;  %v377_v55 = vld [vmem:[%s10742_s5 + $0xc0] sm:$0xff] }
 0x18d   : > { %7518 = vmatprep.mubr.msk.bf16.mxu0 %vm557_vm2, %v1933_v36 }
 0x18e   : > { %v2486_v50 = vor.u32 %v2485_v45, %v2484_v60 }
 0x194   : > { %7519 = vmatmul.mubr.msk.bf16.gmra.mrb[8].mxu0 %vm557_vm2, %v1935_v10 }
 0x195   : > { %7522 = vmatprep.mubr.msk.bf16.mxu0 %vm557_vm2, %v1937_v26 }
 0x19c   : > { %7523 = vmatmul.mubr.msk.bf16.gmra.mrb[12].mxu0 %vm557_vm2, %v1939_v63 }
 0x19d   : > { %7526 = vmatprep.mubr.msk.bf16.mxu0 %vm557_vm2, %v1941_v3 }
 0x1a4   : > { %7527 = vmatmul.mubr.msk.bf16.gmra.mrb[16].mxu0 %vm557_vm2, %v1943_v53 }
 0x1a5   : > { %7530 = vmatprep.mubr.msk.bf16.mxu0 %vm557_vm2, %v1945_v20 }
 0x1ac   : > { %7531 = vmatmul.mubr.msk.bf16.gmra.mrb[20].mxu0 %vm557_vm2, %v1947_v32 }
 0x1ad   : > { %7534 = vmatprep.mubr.msk.bf16.mxu0 %vm557_vm2, %v1949_v1 }
 0x1b4   : > { %7535 = vmatmul.mubr.msk.bf16.gmra.mrb[24].mxu0 %vm557_vm2, %v1951_v51 }
 0x1b5   : > { %7538 = vmatprep.mubr.msk.bf16.mxu0 %vm557_vm2, %v1953_v18 }
 0x1bc   : > { %7539 = vmatmul.mubr.msk.bf16.gmra.mrb[28].mxu0 %vm557_vm2, %v1955_v27 }
 0x1bd   : > { %7542 = vmatprep.mubr.msk.bf16.mxu0 %vm557_vm2, %v1957_v37 }
 0x1c4   : > { %7543 = vmatmul.mubr.msk.bf16.gmra.mrb[32].mxu0 %vm557_vm2, %v1959_v57  ;;  %v364_v57 = vld [vmem:[%s10742_s5 + $0x58] sm:$0xff] }
 0x1c5   : > { %7548 = vmatprep.mubr.msk.bf16.mxu0 %vm557_vm2, %v1927_v4  ;;  %v8678_v4 = vmov 0  }
 0x1c6   : > { %8608 = vset.pattern.permute.xlu0 %v8678_v4  ;;  %8609 = vset.pattern.permute.xlu1 %v8678_v4  ;;  %v2469_v4 = vrot.slane %v8778_v22, 3 }
 0x1c7   : > { %3215 = vperm.xlu1 %8609, %v355_v41   ;;  %v2468_v41 = vrot.slane %v8791_v29, 2  ;;  %v369_v29 = vld [vmem:[%s10742_s5 + $0x80] sm:$0xff] }
 0x1c9   : > { %v2470_v22 = vor.u32 %v2469_v4, %v2468_v41  ;;  %v2496_v4 = vrot.slane %v8897_v24, 2  ;;  %v383_v24 = vld [vmem:[%s10742_s5 + $0xf0] sm:$0xff] }
 0x1cc   : > { %7549 = vmatmul.mubr.msk.bf16.vlgmr.msra.gmra.mrb[0].mxu0 %vm557_vm2, %v1929_v2  ;;  %v356_v2 = vld [vmem:[%s10742_s5 + $0x18] sm:$0xff] }
 0x1cd   : > { %7585 = vmatpush3.bf16.msra.mxu0 %v2601_v59  ;;  %7552 = vmatprep.mubr.msk.bf16.mxu0 %vm557_vm2, %v1931_v47  ;;  %v353_v59 = vld [vmem:[%s10742_s5] sm:$0xff]  ;;  %v292_v47 = vld [vmem:[%s8738_s30 + $0x9c] sm:$0xf] }
 0x1ce   : > { %8586 = vmatprep.subr.msk.bf16.mxu0 %vm612_vm0, %v9276_v33  ;;  %3205 = vperm.xlu0 %8608, %v353_v59  }
 0x1cf   : > { %3220 = vperm.xlu1 %8609, %v356_v2   ;;  %v2472_v2 = vrot.slane %v8819_v40, 2  ;;  %v371_v40 = vld [vmem:[%s10742_s5 + $0x90] sm:$0xff] }
 0x1d4   : > { %7553 = vmatmul.mubr.msk.bf16.gmra.mrb[4].mxu0 %vm557_vm2, %v1933_v36  ;;  %v358_v36 = vld [vmem:[%s10742_s5 + $0x28] sm:$0xff] }
 0x1d5   : > { %7556 = vmatprep.mubr.msk.bf16.mxu0 %vm557_vm2, %v1935_v10  ;;  %3230 = vperm.xlu1 %8609, %v358_v36   ;;  %v360_v10 = vld [vmem:[%s10742_s5 + $0x38] sm:$0xff] }
 0x1d9   : > { %3240 = vperm.xlu1 %8609, %v360_v10   ;;  %v2476_v10 = vrot.slane %v8826_v43, 2 }
 0x1dc   : > { %7557 = vmatmul.mubr.msk.bf16.gmra.mrb[8].mxu0 %vm557_vm2, %v1937_v26  ;;  %v361_v26 = vld [vmem:[%s10742_s5 + $0x40] sm:$0xff] }
 0x1dd   : > { %7560 = vmatprep.mubr.msk.bf16.mxu0 %vm557_vm2, %v1939_v63 }
 0x1e4   : > { %7561 = vmatmul.mubr.msk.bf16.gmra.mrb[12].mxu0 %vm557_vm2, %v1941_v3  ;;  %v9334_v3 = vld [vmem:[%s8738_s30 + $0xa0] ss:$0 sps:$4 sm:$0x77]  }
 0x1e5   : > { %7564 = vmatprep.mubr.msk.bf16.mxu0 %vm557_vm2, %v1943_v53  ;;  %v354_v53 = vld [vmem:[%s10742_s5 + $0x8] sm:$0xff] }
 0x1e6   : > { %3210 = vperm.xlu0 %8608, %v354_v53  }
 0x1ea   : > { %3225 = vperm.xlu0 %8608, %v357_v11   ;;  %v2473_v11 = vrot.slane %v8794_v30, 3  ;;  %v370_v30 = vld [vmem:[%s10742_s5 + $0x88] sm:$0xff] }
 0x1ec   : > { %7565 = vmatmul.mubr.msk.bf16.gmra.mrb[16].mxu0 %vm557_vm2, %v1945_v20  ;;  %v9315_v20 = vcombine.low %v9110_v12, %v292_v47  ;;  %v362_v12 = vld [vmem:[%s10742_s5 + $0x48] sm:$0xff]  ;;  %v368_v47 = vld [vmem:[%s10742_s5 + $0x78] sm:$0xff]  ;;  %v2474_v36 = vor.u32 %v2473_v11, %v2472_v2  ;;  %v381_v11 = vld [vmem:[%s10742_s5 + $0xe0] sm:$0xff] }
 0x1ed   : > { %7568 = vmatprep.mubr.msk.bf16.mxu0 %vm557_vm2, %v1947_v32  ;;  %3250 = vperm.xlu1 %8609, %v362_v12   ;;  %v380_v2 = vld [vmem:[%s10742_s5 + $0xd8] sm:$0xff] }
 0x1ee   : > { %v2234_v32 = vrot.slane %v9315_v20, 2  ;;  %v2475_v12 = vsel %vm2460_vm6, %v2470_v22, %v2474_v36  ;;  %v2529_v45 = vshrl.u32 %v9315_v20, 16 }
 0x1f0   : > { %v2235_v63 = vsel %vm1922_vm5, %v1956_v49, %v2234_v32  ;;  %v365_v49 = vld [vmem:[%s10742_s5 + $0x60] sm:$0xff] }
 0x1f1   : > { %3260 = vperm.xlu1 %8609, %v364_v57  }
 0x1f4   : > { %7569 = vmatmul.mubr.msk.bf16.gmra.mrb[20].mxu0 %vm557_vm2, %v1949_v1  ;;  %v359_v1 = vld [vmem:[%s10742_s5 + $0x30] sm:$0xff] }
 0x1f5   : > { %7572 = vmatprep.mubr.msk.bf16.mxu0 %vm557_vm2, %v1951_v51  ;;  %3235 = vperm.xlu0 %8608, %v359_v1   ;;  %v2461_v51 = vrot.slane %v8766_v14, 2  ;;  %v2236_v14 = vrot.slane %v9334_v3, 2  ;;  %v2471_v1 = vsel %vm2460_vm6, %v2466_v25, %v2470_v22  ;;  %v2501_v22 = vrot.slane %v8893_v21, 3 }
 0x1f6   : > { %3270 = vperm.xlu1 %8609, %v366_v15  }
 0x1f7   : > { %v2237_v59 = vsel %vm1922_vm5, %v2234_v32, %v2236_v14  ;;  %v2909_v32 = vsel %vm612_vm0, %v9276_v33, 0  ;;  %v2489_v14 = vrot.slane %v8855_v56, 3  ;;  %v378_v56 = vld [vmem:[%s10742_s5 + $0xc8] sm:$0xff] }
 0x1f9   : > { %3245 = vperm.xlu0 %8608, %v361_v26   ;;  %v2477_v26 = vrot.slane %v8815_v38, 3  ;;  %v373_v38 = vld [vmem:[%s10742_s5 + $0xa0] sm:$0xff] }
 0x1fa   : > { %3280 = vperm.xlu1 %8609, %v368_v47  }
 0x1fb   : > { %v2478_v43 = vor.u32 %v2477_v26, %v2476_v10  ;;  %v385_v10 = vld [vmem:[%s10742_s5 + $0x100] sm:$0xff] }
 0x1fc   : > { %7573 = vmatmul.mubr.msk.bf16.gmra.mrb[24].mxu0 %vm557_vm2, %v1953_v18  ;;  %v363_v18 = vld [vmem:[%s10742_s5 + $0x50] sm:$0xff] }
 0x1fd   : > { %7576 = vmatprep.mubr.msk.bf16.mxu0 %vm557_vm2, %v1955_v27  ;;  %v2462_v27 = vrot.slane %v8763_v13, 3  ;;  %3255 = vperm.xlu0 %8608, %v363_v18   ;;  %v2480_v18 = vrot.slane %v8845_v52, 2  ;;  %v375_v52 = vld [vmem:[%s10742_s5 + $0xb0] sm:$0xff] }
 0x1fe   : > { %3290 = vperm.xlu1 %8609, %v370_v30   ;;  %v2504_v30 = vrot.slane %v8923_v48, 2  ;;  %v387_v48 = vld [vmem:[%s10742_s5 + $0x110] sm:$0xff] }
 0x1ff   : > { %v2463_v13 = vor.u32 %v2462_v27, %v2461_v51  ;;  %v372_v51 = vld [vmem:[%s10742_s5 + $0x98] sm:$0xff]  ;;  %v2479_v27 = vsel %vm2460_vm6, %v2474_v36, %v2478_v43 }
 0x201   : > { %3265 = vperm.xlu0 %8608, %v365_v49   ;;  %v2467_v53 = vsel %vm2460_vm6, %v2463_v13, %v2466_v25  ;;  %v2488_v49 = vrot.slane %v8871_v0, 2  ;;  %v376_v13 = vld [vmem:[%s10742_s5 + $0xb8] sm:$0xff]  ;;  %v379_v0 = vld [vmem:[%s10742_s5 + $0xd0] sm:$0xff] }
 0x202   : > { %3300 = vperm.xlu1 %8609, %v372_v51   ;;  %v2513_v51 = vrot.slane %v8933_v58, 3 }
 0x203   : > { %v2490_v25 = vor.u32 %v2489_v14, %v2488_v49  ;;  %v10824_v14 = vshll.u32 %v9104_v42, 16 }
 0x204   : > { %7577 = vmatmul.mubr.msk.bf16.gmra.mrb[28].mxu0 %vm557_vm2, %v1957_v37  ;;  %v367_v37 = vld [vmem:[%s10742_s5 + $0x70] sm:$0xff] }
 0x205   : > { %7580 = vmatprep.mubr.msk.bf16.mxu0 %vm557_vm2, %v2235_v63  ;;  %3275 = vperm.xlu0 %8608, %v367_v37   ;;  %v2481_v63 = vrot.slane %v8829_v44, 3  ;;  %v374_v44 = vld [vmem:[%s10742_s5 + $0xa8] sm:$0xff]  ;;  %v2492_v37 = vrot.slane %v8878_v8, 2  ;;  %v2491_v41 = vsel %vm2460_vm6, %v2486_v50, %v2490_v25 }
 0x206   : > { %3310 = vperm.xlu1 %8609, %v374_v44   ;;  %v2520_v44 = vrot.slane %v8973_v61, 2  ;;  %v2525_v61 = vrot.slane %v10824_v14, 3 }
 0x207   : > { %v2482_v33 = vor.u32 %v2481_v63, %v2480_v18  ;;  %v2512_v63 = vrot.slane %v8949_v19, 2  ;;  %v2517_v19 = vrot.slane %v8945_v17, 3  ;;  %v10823_v17 = vshrl.u32 %v9104_v42, 16 }
 0x209   : > { %3285 = vperm.xlu0 %8608, %v369_v29   ;;  %v2483_v57 = vsel %vm2460_vm6, %v2478_v43, %v2482_v33  ;;  %v2487_v15 = vsel %vm2460_vm6, %v2482_v33, %v2486_v50  ;;  %v2500_v29 = vrot.slane %v8904_v31, 2  ;;  %v2516_v33 = vrot.slane %v8953_v23, 2 }
 0x20a   : > { %3320 = vperm.xlu1 %8609, %v376_v13   ;;  %v2524_v49 = vrot.slane %v10823_v17, 2  ;;  %v2531_v13 = vrot.slane %v2529_v45, 2 }
 0x20b   : > { %v2502_v21 = vor.u32 %v2501_v22, %v2500_v29  ;;  %v10826_v29 = vld [vmem:[#allocation5_spill] sm:$0xff] }
 0x20c   : > { %7581 = vmatmul.mubr.msk.bf16.gmra.mrb[32].mxu0 %vm557_vm2, %v2237_v59  ;;  %v2493_v59 = vrot.slane %v8867_v62, 3  ;;  %v2526_v50 = vor.u32 %v2525_v61, %v2524_v49  ;;  %v2826_v22 = vrot.slane %v10826_v29, 3  ;;  %v8679_v61 = vmov 0.0  }
 0x20d   : > { %7586 = vmatprep.mubr.msk.bf16.mxu0 %vm557_vm2, %v2467_v53  ;;  %3295 = vperm.xlu0 %8608, %v371_v40   ;;  %v2497_v53 = vrot.slane %v8881_v9, 3  ;;  %v382_v9 = vld [vmem:[%s10742_s5 + $0xe8] sm:$0xff]  ;;  %v2505_v40 = vrot.slane %v8907_v34, 3  ;;  %3423 = vst.msk [vmem:[#allocation2 + $0x20] sm:$0xff] %vm557_vm2, %v8679_v61  ;;  %3424 = vst.msk [vmem:[#allocation2 + $0x28] sm:$0xff] %vm557_vm2, %v8679_v61 }
 0x20e   : > { %3330 = vperm.xlu1 %8609, %v378_v56   ;;  %v2494_v62 = vor.u32 %v2493_v59, %v2492_v37  ;;  %v386_v34 = vld [vmem:[%s10742_s5 + $0x108] sm:$0xff]  ;;  %v2541_v56 = vshll.u32 %v9334_v3, 16  ;;  %3419 = vst.msk [vmem:[#allocation2] sm:$0xff] %vm557_vm2, %v8679_v61  ;;  %3420 = vst.msk [vmem:[#allocation2 + $0x8] sm:$0xff] %vm557_vm2, %v8679_v61 }
 0x20f   : > { %v2498_v8 = vor.u32 %v2497_v53, %v2496_v4  ;;  %v2506_v31 = vor.u32 %v2505_v40, %v2504_v30  ;;  %v2817_v53 = vrot.slane %v8747_v5, 3  ;;  %v10825_v5 = vld [vmem:[#allocation4_spill] sm:$0xff]  ;;  %v10828_v40 = vld [vmem:[#allocation7_spill] sm:$0xff]  ;;  %3421 = vst.msk [vmem:[#allocation2 + $0x10] sm:$0xff] %vm557_vm2, %v8679_v61  ;;  %3422 = vst.msk [vmem:[#allocation2 + $0x18] sm:$0xff] %vm557_vm2, %v8679_v61 }
 0x210   : > { %v2495_v47 = vsel %vm2460_vm6, %v2490_v25, %v2494_v62  ;;  %v2538_v25 = vshrl.u32 %v9334_v3, 16  ;;  %v2543_v59 = vrot.slane %v2541_v56, 3  ;;  %3425 = vst.msk [vmem:[#allocation2 + $0x30] sm:$0xff] %vm557_vm2, %v8679_v61  ;;  %3426 = vst.msk [vmem:[#allocation2 + $0x38] sm:$0xff] %vm557_vm2, %v8679_v61 }
 0x211   : > { %3305 = vperm.xlu0 %8608, %v373_v38   ;;  %v2499_v36 = vsel %vm2460_vm6, %v2494_v62, %v2498_v8  ;;  %v2503_v26 = vsel %vm2460_vm6, %v2498_v8, %v2502_v21  ;;  %v2507_v18 = vsel %vm2460_vm6, %v2502_v21, %v2506_v31  ;;  %v388_v38 = vld [vmem:[%s10742_s5 + $0x118] sm:$0xff]  ;;  %v2820_v8 = vrot.slane %v8753_v7, 3  ;;  %v10827_v7 = vld [vmem:[#allocation6_spill] sm:$0xff]  ;;  %3427 = vst.msk [vmem:[#allocation2 + $0x40] sm:$0xff] %vm557_vm2, %v8679_v61 }
 0x212   : > { %3340 = vperm.xlu1 %8609, %v380_v2   ;;  %v2540_v37 = vrot.slane %v2538_v25, 2  ;;  %v2818_v2 = vrot.slane %v8750_v6, 3  ;;  %v2824_v6 = vrot.slane %v10825_v5, 3  ;;  %3428 = vst.msk [vmem:[#allocation2 + $0x48] sm:$0xff] %vm557_vm2, %v8679_v61  ;;  %3429 = vst.msk [vmem:[#allocation2 + $0x50] sm:$0xff] %vm557_vm2, %v8679_v61 }
 0x213   : > { %3430 = vst.msk [vmem:[#allocation2 + $0x58] sm:$0xff] %vm557_vm2, %v8679_v61  ;;  %3431 = vst.msk [vmem:[#allocation2 + $0x60] sm:$0xff] %vm557_vm2, %v8679_v61 }
 0x214   : > { %7587 = vmatmul.mubr.msk.bf16.vlgmr.msra.gmra.mrb[0].mxu0 %vm557_vm2, %v2471_v1  ;;  %v384_v1 = vld [vmem:[%s10742_s5 + $0xf8] sm:$0xff]  ;;  %v2544_v4 = vor.u32 %v2543_v59, %v2540_v37  ;;  %v2819_v62 = vsel %vm2816_vm7, %v2817_v53, %v2818_v2  ;;  %v2827_v30 = vsel %vm2816_vm7, %v2824_v6, %v2826_v22  ;;  %3432 = vst.msk [vmem:[#allocation2 + $0x68] sm:$0xff] %vm557_vm2, %v8679_v61  ;;  %3433 = vst.msk [vmem:[#allocation2 + $0x70] sm:$0xff] %vm557_vm2, %v8679_v61  ;;  %v9652_v53 = vld [vmem:[%s10739_s2] ss:$0 sm:$0xff] }
 0x215   : > { %7623 = vmatpush3.bf16.msra.mxu0 %v2909_v32  ;;  %7590 = vmatprep.mubr.msk.bf16.mxu0 %vm557_vm2, %v2475_v12  ;;  %v2508_v32 = vrot.slane %v8930_v54, 2  ;;  %v2509_v12 = vrot.slane %v8919_v46, 3  ;;  %v2514_v54 = vor.u32 %v2513_v51, %v2512_v63  ;;  %v10832_v51 = vld [vmem:[#allocation11_spill] sm:$0xff]  ;;  %3434 = vst.msk [vmem:[#allocation2 + $0x78] sm:$0xff] %vm557_vm2, %v8679_v61  ;;  %3435 = vst.msk [vmem:[#allocation2 + $0x80] sm:$0xff] %vm557_vm2, %v8679_v61 }
 0x216   : > { %3315 = vperm.xlu0 %8608, %v375_v52   ;;  %3350 = vperm.xlu1 %8609, %v382_v9   ;;  %v2521_v52 = vrot.slane %v8956_v28, 3  ;;  %v2822_v9 = vrot.slane %v10813_v39, 3  ;;  %v2828_v39 = vrot.slane %v10827_v7, 3  ;;  %3436 = vst.msk [vmem:[#allocation2 + $0x88] sm:$0xff] %vm557_vm2, %v8679_v61  ;;  %3437 = vst.msk [vmem:[#allocation2 + $0x90] sm:$0xff] %vm557_vm2, %v8679_v61  ;;  %v3498_v7 = vld [vmem:[#allocation2 + $0x8] sm:$0xff] }
 0x217   : > { %v2510_v43 = vor.u32 %v2509_v12, %v2508_v32  ;;  %3438 = vst.msk [vmem:[#allocation2 + $0x98] sm:$0xff] %vm557_vm2, %v8679_v61  ;;  %3439 = vst.msk [vmem:[#allocation2 + $0xa0] sm:$0xff] %vm557_vm2, %v8679_v61 }
 0x218   : > { %v2522_v60 = vor.u32 %v2521_v52, %v2520_v44  ;;  %v2844_v52 = vrot.slane %v10822_v16, 3  ;;  %v2852_v16 = vrot.slane %v9334_v3, 3  ;;  %3440 = vst.msk [vmem:[#allocation2 + $0xa8] sm:$0xff] %vm557_vm2, %v8679_v61  ;;  %3441 = vst.msk [vmem:[#allocation2 + $0xb0] sm:$0xff] %vm557_vm2, %v8679_v61  ;;  %v9637_v3 = vld [vmem:[%s10740_s3] sm:$0x3] }
 0x219   : > { %v2511_v46 = vsel %vm2460_vm6, %v2506_v31, %v2510_v43  ;;  %v2515_v58 = vsel %vm2460_vm6, %v2510_v43, %v2514_v54  ;;  %v10829_v31 = vld [vmem:[#allocation8_spill] sm:$0xff]  ;;  %3442 = vst.msk [vmem:[#allocation2 + $0xb8] sm:$0xff] %vm557_vm2, %v8679_v61  ;;  %3443 = vst.msk [vmem:[#allocation2 + $0xc0] sm:$0xff] %vm557_vm2, %v8679_v61 }
 0x21a   : > { %3325 = vperm.xlu0 %8608, %v377_v55   ;;  %3360 = vperm.xlu1 %8609, %v384_v1   ;;  %v2830_v1 = vrot.slane %v10828_v40, 3  ;;  %3444 = vst.msk [vmem:[#allocation2 + $0xc8] sm:$0xff] %vm557_vm2, %v8679_v61  ;;  %3445 = vst.msk [vmem:[#allocation2 + $0xd0] sm:$0xff] %vm557_vm2, %v8679_v61 }
 0x21b   : > { %3446 = vst.msk [vmem:[#allocation2 + $0xd8] sm:$0xff] %vm557_vm2, %v8679_v61  ;;  %3447 = vst.msk [vmem:[#allocation2 + $0xe0] sm:$0xff] %vm557_vm2, %v8679_v61 }
 0x21c   : > { %7591 = vmatmul.mubr.msk.bf16.gmra.mrb[4].mxu0 %vm557_vm2, %v2479_v27  ;;  %v2518_v27 = vor.u32 %v2517_v19, %v2516_v33  ;;  %v2831_v21 = vsel %vm2816_vm7, %v2828_v39, %v2830_v1  ;;  %v2842_v19 = vrot.slane %v8910_v35, 3  ;;  %v2848_v35 = vrot.slane %v9104_v42, 3  ;;  %3448 = vst.msk [vmem:[#allocation2 + $0xe8] sm:$0xff] %vm557_vm2, %v8679_v61  ;;  %3449 = vst.msk [vmem:[#allocation2 + $0xf0] sm:$0xff] %vm557_vm2, %v8679_v61  ;;  %v345_v42 = vld [vmem:[%s10740_s3 + $0x2] sm:$0x3] }
 0x21d   : > { %7594 = vmatprep.mubr.msk.bf16.mxu0 %vm557_vm2, %v2483_v57  ;;  %v2532_v57 = vshll.u32 %v9315_v20, 16  ;;  %3450 = vst.msk [vmem:[#allocation2 + $0xf8] sm:$0xff] %vm557_vm2, %v8679_v61  ;;  %3451 = vst.msk [vmem:[#allocation2 + $0x100] sm:$0xff] %vm557_vm2, %v8679_v61  ;;  %8587 = vmatprep.subr.msk.bf16.mxu1 %vm612_vm0, %v345_v42 }
 0x21e   : > { %3335 = vperm.xlu0 %8608, %v379_v0   ;;  %3370 = vperm.xlu1 %8609, %v386_v34   ;;  %v2519_v23 = vsel %vm2460_vm6, %v2514_v54, %v2518_v27  ;;  %v2523_v28 = vsel %vm2460_vm6, %v2518_v27, %v2522_v60  ;;  %v2832_v34 = vrot.slane %v10829_v31, 3  ;;  %v10834_v27 = vld [vmem:[#allocation14_spill] sm:$0xff]  ;;  %v2845_v45 = vsel %vm2816_vm7, %v2842_v19, %v2844_v52 }
 0x21f   : > { %v2534_v55 = vrot.slane %v2532_v57, 3  ;;  %3452 = vst.msk [vmem:[#allocation2 + $0x108] sm:$0xff] %vm557_vm2, %v8679_v61  ;;  %3453 = vst.msk [vmem:[#allocation2 + $0x110] sm:$0xff] %vm557_vm2, %v8679_v61 }
 0x220   : > { %v2833_v32 = vsel %vm2816_vm7, %v2830_v1, %v2832_v34  ;;  %3454 = vst.msk [vmem:[#allocation2 + $0x118] sm:$0xff] %vm557_vm2, %v8679_v61  ;;  %3455 = vst.msk [vmem:[#allocation2 + $0x120] sm:$0xff] %vm557_vm2, %v8679_v61 }
 0x221   : > { %v2535_v0 = vor.u32 %v2534_v55, %v2531_v13  ;;  %3456 = vst.msk [vmem:[#allocation2 + $0x128] sm:$0xff] %vm557_vm2, %v8679_v61  ;;  %3457 = vst.msk [vmem:[#allocation2 + $0x130] sm:$0xff] %vm557_vm2, %v8679_v61 }
 0x222   : > { %3345 = vperm.xlu0 %8608, %v381_v11   ;;  %3380 = vperm.xlu1 %8609, %v388_v38   ;;  %v2838_v38 = vrot.slane %v10832_v51, 3  ;;  %3458 = vst.msk [vmem:[#allocation2 + $0x138] sm:$0xff] %vm557_vm2, %v8679_v61 }
 0x223   : > { %v2545_v11 = vsel %vm2460_vm6, %v2535_v0, %v2544_v4  ;;  %3460 = vst.msk [vmem:[#allocation2 + $0x140] sm:$0x3f] %vm3459_vm8, %v8679_v61 }
 0x224   : > { %7595 = vmatmul.mubr.msk.bf16.gmra.mrb[8].mxu0 %vm557_vm2, %v2487_v15  ;;  %v2527_v15 = vsel %vm2460_vm6, %v2522_v60, %v2526_v50  ;;  %v2846_v60 = vrot.slane %v10834_v27, 3 }
 0x225   : > { %7598 = vmatprep.mubr.msk.bf16.mxu0 %vm557_vm2, %v2491_v41  ;;  %v2536_v41 = vsel %vm2460_vm6, %v2526_v50, %v2535_v0 }
 0x226   : > { %3355 = vperm.xlu0 %8608, %v383_v24   ;;  %v2821_v24 = vsel %vm2816_vm7, %v2818_v2, %v2820_v8  ;;  %v2847_v57 = vsel %vm2816_vm7, %v2844_v52, %v2846_v60  ;;  %v2849_v17 = vsel %vm2816_vm7, %v2846_v60, %v2848_v35 }
 0x22a   : > { %3365 = vperm.xlu0 %8608, %v385_v10   ;;  %v2829_v10 = vsel %vm2816_vm7, %v2826_v22, %v2828_v39 }
 0x22c   : > { %7599 = vmatmul.mubr.msk.bf16.gmra.mrb[12].mxu0 %vm557_vm2, %v2495_v47  ;;  %v2823_v47 = vsel %vm2816_vm7, %v2820_v8, %v2822_v9 }
 0x22d   : > { %7602 = vmatprep.mubr.msk.bf16.mxu0 %vm557_vm2, %v2499_v36  ;;  %v2825_v36 = vsel %vm2816_vm7, %v2822_v9, %v2824_v6 }
 0x22e   : > { %3375 = vperm.xlu0 %8608, %v387_v48   ;;  %v10830_v48 = vld [vmem:[#allocation9_spill] sm:$0xff] }
 0x234   : > { %7603 = vmatmul.mubr.msk.bf16.gmra.mrb[16].mxu0 %vm557_vm2, %v2503_v26  ;;  %v2834_v26 = vrot.slane %v10830_v48, 3 }
 0x235   : > { %7606 = vmatprep.mubr.msk.bf16.mxu0 %vm557_vm2, %v2507_v18  ;;  %v10831_v18 = vld [vmem:[#allocation10_spill] sm:$0xff] }
 0x236   : > { %v2835_v12 = vsel %vm2816_vm7, %v2832_v34, %v2834_v26  ;;  %v2836_v63 = vrot.slane %v10831_v18, 3 }
 0x238   : > { %v2837_v43 = vsel %vm2816_vm7, %v2834_v26, %v2836_v63  ;;  %v2839_v54 = vsel %vm2816_vm7, %v2836_v63, %v2838_v38 }
 0x23c   : > { %7607 = vmatmul.mubr.msk.bf16.gmra.mrb[20].mxu0 %vm557_vm2, %v2511_v46  ;;  %v10833_v46 = vld [vmem:[#allocation12_spill] sm:$0xff] }
 0x23d   : > { %7610 = vmatprep.mubr.msk.bf16.mxu0 %vm557_vm2, %v2515_v58  ;;  %v2840_v33 = vrot.slane %v10833_v46, 3 }
 0x23f   : > { %v2841_v58 = vsel %vm2816_vm7, %v2838_v38, %v2840_v33  ;;  %v2843_v44 = vsel %vm2816_vm7, %v2840_v33, %v2842_v19 }
 0x244   : > { %7611 = vmatmul.mubr.msk.bf16.gmra.mrb[24].mxu0 %vm557_vm2, %v2519_v23  ;;  %v2850_v23 = vrot.slane %v9315_v20, 3  ;;  %v3760_v20 = vsel %vm612_vm0, %v345_v42, 0 }
 0x245   : > { %7614 = vmatprep.mubr.msk.bf16.mxu0 %vm557_vm2, %v2523_v28  ;;  %7661 = vmatpush3.bf16.msra.mxu1 %v3760_v20 }
 0x246   : > { %v2851_v49 = vsel %vm2816_vm7, %v2848_v35, %v2850_v23  ;;  %v2853_v14 = vsel %vm2816_vm7, %v2850_v23, %v2852_v16  ;;  %8588 = vmatprep.subr.msk.bf16.mxu1 %vm612_vm0, %v9637_v3  ;;  %v3216_v13 = vpop.permute.xlu1 %3215 }
 0x24c   : > { %7615 = vmatmul.mubr.msk.bf16.gmra.mrb[28].mxu0 %vm557_vm2, %v2527_v15 }
 0x24d   : > { %7618 = vmatprep.mubr.msk.bf16.mxu0 %vm557_vm2, %v2536_v41  ;;  %v3206_v28 = vpop.permute.xlu0 %3205 }
 0x24e   : > { %v3221_v50 = vpop.permute.xlu1 %3220 }
 0x254   : > { %7619 = vmatmul.mubr.msk.bf16.gmra.mrb[32].mxu0 %vm557_vm2, %v2545_v11  ;;  %v3231_v56 = vpop.permute.xlu1 %3230 }
 0x255   : > { %7624 = vmatprep.mubr.msk.bf16.mxu0 %vm557_vm2, %v2819_v62 }
 0x258   : > { %v3241_v15 = vpop.permute.xlu1 %3240 }
 0x25c   : > { %7625 = vmatmul.mubr.msk.bf16.vlgmr.msra.gmra.mrb[0].mxu0 %vm557_vm2, %v2821_v24 }
 0x25d   : > { %7628 = vmatprep.mubr.msk.bf16.mxu0 %vm557_vm2, %v2823_v47 }
 0x264   : > { %7629 = vmatmul.mubr.msk.bf16.gmra.mrb[4].mxu0 %vm557_vm2, %v2825_v36 }
 0x265   : > { %7632 = vmatprep.mubr.msk.bf16.mxu0 %vm557_vm2, %v2827_v30  ;;  %v3211_v55 = vpop.permute.xlu0 %3210  ;;  %v3497_v30 = vld [vmem:[#allocation2] sm:$0xff] }
 0x266   : > { %v9663_v31 = vpack.c.bf16 %v3498_v7, %v3497_v30 }
 0x268   : > { %v3560_v46 = vshll.u32 %v9663_v31, 16 }
 0x269   : > { %v3226_v25 = vpop.permute.xlu0 %3225 }
 0x26a   : > { %v3562_v35 = vrot.slane %v3560_v46, 1 }
 0x26c   : > { %7633 = vmatmul.mubr.msk.bf16.gmra.mrb[8].mxu0 %vm557_vm2, %v2829_v10  ;;  %v9643_v59 = vpop.permute.xlu1 %3250 }
 0x26d   : > { %7636 = vmatprep.mubr.msk.bf16.mxu0 %vm557_vm2, %v2831_v21 }
 0x270   : > { %v9647_v4 = vpop.permute.xlu1 %3260 }
 0x274   : > { %7637 = vmatmul.mubr.msk.bf16.gmra.mrb[12].mxu0 %vm557_vm2, %v2833_v32  ;;  %v3236_v0 = vpop.permute.xlu0 %3235 }
 0x275   : > { %7640 = vmatprep.mubr.msk.bf16.mxu0 %vm557_vm2, %v2835_v12  ;;  %v9659_v29 = vpop.permute.xlu1 %3270 }
 0x278   : > { %v9641_v37 = vpop.permute.xlu0 %3245 }
 0x279   : > { %v9670_v18 = vpop.permute.xlu1 %3280 }
 0x27c   : > { %7641 = vmatmul.mubr.msk.bf16.gmra.mrb[16].mxu0 %vm557_vm2, %v2837_v43  ;;  %v9645_v41 = vpop.permute.xlu0 %3255 }
 0x27d   : > { %7644 = vmatprep.mubr.msk.bf16.mxu0 %vm557_vm2, %v2839_v54  ;;  %v9681_v23 = vpop.permute.xlu1 %3290 }
 0x280   : > { %v9655_v8 = vpop.permute.xlu0 %3265 }
 0x281   : > { %v9703_v30 = vpop.permute.xlu1 %3300 }
 0x284   : > { %7645 = vmatmul.mubr.msk.bf16.gmra.mrb[20].mxu0 %vm557_vm2, %v2841_v58  ;;  %v9665_v34 = vpop.permute.xlu0 %3275 }
 0x285   : > { %7648 = vmatprep.mubr.msk.bf16.mxu0 %vm557_vm2, %v2843_v44 }
 0x288   : > { %v9677_v52 = vpop.permute.xlu0 %3285 }
 0x28c   : > { %7649 = vmatmul.mubr.msk.bf16.gmra.mrb[24].mxu0 %vm557_vm2, %v2845_v45 }
 0x28d   : > { %7652 = vmatprep.mubr.msk.bf16.mxu0 %vm557_vm2, %v2847_v57  ;;  %v3558_v57 = vshrl.u32 %v9663_v31, 16 }
 0x294   : > { %7653 = vmatmul.mubr.msk.bf16.gmra.mrb[28].mxu0 %vm557_vm2, %v2849_v17 }
 0x295   : > { %7656 = vmatprep.mubr.msk.bf16.mxu0 %vm557_vm2, %v2851_v49 }
 0x29c   : > { %7657 = vmatmul.mubr.msk.bf16.gmra.mrb[32].mxu0 %vm557_vm2, %v2853_v14 }
 0x32f   : > { %v7626_v2 = vpop.f32.mrb[0].mxu0 }
 0x330   : > { %v3133_v11 = vadd.f32 %v7626_v2, %v9652_v53  ;;  %v2945_v62 = vpop.f32.mrb[1].mxu0 }
 0x331   : > { %v3131_v9 = vadd.f32 %v9652_v53, %v2945_v62  ;;  %v7627_v24 = vpop.f32.mrb[2].mxu0  ;;  %v9693_v62 = vpop.permute.xlu0 %3295 }
 0x332   : > { %v3169_v47 = vmax.f32 %v3133_v11, 0.0  ;;  %v3134_v5 = vadd.f32 %v7627_v24, %v9652_v53  ;;  %v2948_v6 = vpop.f32.mrb[3].mxu0  ;;  %v3563_v11 = vor.u32 %v3562_v35, %v3558_v57  ;;  %v9742_v35 = vpop.permute.xlu1 %3310 }
 0x333   : > { %v3167_v22 = vmax.f32 %v3131_v9, 0.0  ;;  %v3132_v36 = vadd.f32 %v9652_v53, %v2948_v6 }
 0x334   : > { %v3385_v39 = vmul.f32 %v3216_v13, %v3169_v47  ;;  %v3170_v40 = vmax.f32 %v3134_v5, 0.0 }
 0x335   : > { %v3383_v1 = vmul.f32 %v3206_v28, %v3167_v22  ;;  %v3168_v10 = vmax.f32 %v3132_v36, 0.0 }
 0x336   : > { %3463 = vst.msk [vmem:[#allocation2 + $0x23] sm:$0xff] %vm557_vm2, %v3385_v39  ;;  %v3386_v21 = vmul.f32 %v3221_v50, %v3170_v40 }
 0x337   : > { %3461 = vst.msk [vmem:[#allocation2 + $0x13] sm:$0xff] %vm557_vm2, %v3383_v1  ;;  %v3384_v48 = vmul.f32 %v3211_v55, %v3168_v10  ;;  %v7630_v26 = vpop.f32.mrb[4].mxu0 }
 0x338   : > { %3464 = vst.msk [vmem:[#allocation2 + $0x2b] sm:$0xff] %vm557_vm2, %v3386_v21  ;;  %v3137_v32 = vadd.f32 %v7630_v26, %v9652_v53  ;;  %v2961_v12 = vpop.f32.mrb[5].mxu0 }
 0x339   : > { %3462 = vst.msk [vmem:[#allocation2 + $0x1b] sm:$0xff] %vm557_vm2, %v3384_v48  ;;  %v3135_v63 = vadd.f32 %v9652_v53, %v2961_v12  ;;  %v7631_v51 = vpop.f32.mrb[6].mxu0 }
 0x33a   : > { %v3173_v38 = vmax.f32 %v3137_v32, 0.0  ;;  %v3138_v43 = vadd.f32 %v7631_v51, %v9652_v53  ;;  %v2964_v54 = vpop.f32.mrb[7].mxu0 }
 0x33b   : > { %v3171_v33 = vmax.f32 %v3135_v63, 0.0  ;;  %v3136_v19 = vadd.f32 %v9652_v53, %v2964_v54  ;;  %v3976_v63 = vsel %vm612_vm0, %v9637_v3, 0  ;;  %v9733_v3 = vld [vmem:[%s10740_s3 + $0x4] sm:$0x3] }
 0x33c   : > { %v3389_v58 = vmul.f32 %v3236_v0, %v3173_v38  ;;  %v3174_v44 = vmax.f32 %v3138_v43, 0.0  ;;  %v9721_v43 = vpop.permute.xlu0 %3305 }
 0x33d   : > { %v3387_v27 = vmul.f32 %v3226_v25, %v3171_v33  ;;  %v3172_v60 = vmax.f32 %v3136_v19, 0.0 }
 0x33e   : > { %3467 = vst.msk [vmem:[#allocation2 + $0x43] sm:$0xff] %vm557_vm2, %v3389_v58  ;;  %v3390_v45 = vmul.f32 %v3241_v15, %v3174_v44  ;;  %v3499_v20 = vld [vmem:[#allocation2 + $0x10] sm:$0xff] }
 0x33f   : > { %3465 = vst.msk [vmem:[#allocation2 + $0x33] sm:$0xff] %vm557_vm2, %v3387_v27  ;;  %v3388_v17 = vmul.f32 %v3231_v56, %v3172_v60  ;;  %v7634_v49 = vpop.f32.mrb[8].mxu0  ;;  %v3502_v16 = vld [vmem:[#allocation2 + $0x28] sm:$0xff] }
 0x340   : > { %3468 = vst.msk [vmem:[#allocation2 + $0x4b] sm:$0xff] %vm557_vm2, %v3390_v45  ;;  %v3141_v14 = vadd.f32 %v7634_v49, %v9652_v53  ;;  %v2977_v42 = vpop.f32.mrb[9].mxu0  ;;  %v3500_v28 = vld [vmem:[#allocation2 + $0x18] sm:$0xff]  ;;  %v3501_v13 = vld [vmem:[#allocation2 + $0x20] sm:$0xff] }
 0x341   : > { %3466 = vst.msk [vmem:[#allocation2 + $0x3b] sm:$0xff] %vm557_vm2, %v3388_v17  ;;  %v3139_v55 = vadd.f32 %v9652_v53, %v2977_v42  ;;  %v7635_v50 = vpop.f32.mrb[10].mxu0  ;;  %v9688_v25 = vpack.c.bf16 %v3500_v28, %v3499_v20  ;;  %v9690_v0 = vpack.c.bf16 %v3502_v16, %v3501_v13 }
 0x342   : > { %v3177_v56 = vmax.f32 %v3141_v14, 0.0  ;;  %v3142_v15 = vadd.f32 %v7635_v50, %v9652_v53  ;;  %v2980_v2 = vpop.f32.mrb[11].mxu0 }
 0x343   : > { %v3175_v9 = vmax.f32 %v3139_v55, 0.0  ;;  %v3140_v24 = vadd.f32 %v9652_v53, %v2980_v2  ;;  %v3565_v47 = vshll.u32 %v9688_v25, 16  ;;  %v3569_v5 = vshrl.u32 %v9688_v25, 16 }
 0x344   : > { %v3393_v6 = vmul.f32 %v9645_v41, %v3177_v56  ;;  %v3178_v22 = vmax.f32 %v3142_v15, 0.0  ;;  %v9701_v36 = vshll.u32 %v9690_v0, 16  ;;  %v9738_v45 = vshrl.u32 %v9690_v0, 16  ;;  %v9762_v15 = vpop.permute.xlu0 %3315 }
 0x345   : > { %v3391_v7 = vmul.f32 %v9641_v37, %v3175_v9  ;;  %v3176_v39 = vmax.f32 %v3140_v24, 0.0  ;;  %v3567_v40 = vrot.slane %v3565_v47, 1  ;;  %v9708_v10 = vrot.slane %v3565_v47, 2 }
 0x346   : > { %10835 = vst [vmem:[#allocation3_spill] sm:$0xff] %v9701_v36  ;;  %3471 = vst.msk [vmem:[#allocation2 + $0x63] sm:$0xff] %vm557_vm2, %v3393_v6  ;;  %v3394_v1 = vmul.f32 %v9647_v4, %v3178_v22  ;;  %v3575_v61 = vrot.slane %v9701_v36, 1  ;;  %v9714_v37 = vrot.slane %v3569_v5, 1  ;;  %v3503_v51 = vld [vmem:[#allocation2 + $0x30] sm:$0xff] }
 0x347   : > { %10836 = vst [vmem:[#allocation13_spill] sm:$0xff] %v9708_v10  ;;  %3469 = vst.msk [vmem:[#allocation2 + $0x53] sm:$0xff] %vm557_vm2, %v3391_v7  ;;  %v3392_v41 = vmul.f32 %v9643_v59, %v3176_v39  ;;  %v7638_v21 = vpop.f32.mrb[12].mxu0  ;;  %v3568_v48 = vsel %vm408_vm1, %v3563_v11, %v3567_v40  ;;  %v3571_v26 = vor.u32 %v3569_v5, %v3567_v40  ;;  %v3506_v32 = vld [vmem:[#allocation2 + $0x48] sm:$0xff]  ;;  %v9772_v39 = vpop.permute.xlu1 %3320 }
 0x348   : > { %10837 = vst [vmem:[#allocation4_spill] sm:$0xff] %v9714_v37  ;;  %3472 = vst.msk [vmem:[#allocation2 + $0x6b] sm:$0xff] %vm557_vm2, %v3394_v1  ;;  %v3145_v12 = vadd.f32 %v7638_v21, %v9652_v53  ;;  %v2993_v4 = vpop.f32.mrb[13].mxu0  ;;  %7662 = vmatprep.mubr.msk.bf16.mxu1 %vm557_vm2, %v3568_v48  ;;  %v3504_v38 = vld [vmem:[#allocation2 + $0x38] sm:$0xff]  ;;  %v3505_v59 = vld [vmem:[#allocation2 + $0x40] sm:$0xff]  ;;  %v3579_v20 = vor.u32 %v9738_v45, %v3575_v61 }
 0x349   : > { %3470 = vst.msk [vmem:[#allocation2 + $0x5b] sm:$0xff] %vm557_vm2, %v3392_v41  ;;  %v3143_v54 = vadd.f32 %v9652_v53, %v2993_v4  ;;  %v7639_v46 = vpop.f32.mrb[14].mxu0  ;;  %v3576_v33 = vsel %vm408_vm1, %v3571_v26, %v3575_v61  ;;  %v9726_v19 = vpack.c.bf16 %v3504_v38, %v3503_v51  ;;  %v9728_v58 = vpack.c.bf16 %v3506_v32, %v3505_v59 }
 0x34a   : > { %v3181_v44 = vmax.f32 %v3145_v12, 0.0  ;;  %v3146_v27 = vadd.f32 %v7639_v46, %v9652_v53  ;;  %v2996_v60 = vpop.f32.mrb[15].mxu0  ;;  %7663 = vmatmul.mubr.msk.bf16.vlgmr.msra.gmra.mrb[0].mxu1 %vm557_vm2, %v3576_v33  ;;  %10838 = vst [vmem:[#allocation5_spill] sm:$0xff] %v9738_v45  ;;  %v9795_v46 = vpop.permute.xlu0 %3325 }
 0x34b   : > { %v3179_v17 = vmax.f32 %v3143_v54, 0.0  ;;  %v3144_v49 = vadd.f32 %v9652_v53, %v2996_v60  ;;  %7699 = vmatpush3.bf16.msra.mxu1 %v3976_v63  ;;  %v9746_v16 = vshll.u32 %v9726_v19, 16  ;;  %v9751_v28 = vshll.u32 %v9728_v58, 16 }
 0x34c   : > { %v3397_v14 = vmul.f32 %v9665_v34, %v3181_v44  ;;  %v3182_v42 = vmax.f32 %v3146_v27, 0.0  ;;  %8589 = vmatprep.subr.msk.bf16.mxu1 %vm612_vm0, %v9733_v3  ;;  %v9758_v56 = vshrl.u32 %v9726_v19, 16  ;;  %v9784_v32 = vshrl.u32 %v9728_v58, 16 }
 0x34d   : > { %10839 = vst [vmem:[#allocation6_spill] sm:$0xff] %v9746_v16  ;;  %10840 = vst [vmem:[#allocation7_spill] sm:$0xff] %v9751_v28  ;;  %v3395_v13 = vmul.f32 %v9655_v8, %v3179_v17  ;;  %v3180_v55 = vmax.f32 %v3144_v49, 0.0  ;;  %v3583_v50 = vrot.slane %v9746_v16, 1  ;;  %v3591_v24 = vrot.slane %v9751_v28, 1  ;;  %v9804_v17 = vpop.permute.xlu1 %3330 }
 0x34e   : > { %10841 = vst [vmem:[#allocation8_spill] sm:$0xff] %v9758_v56  ;;  %3475 = vst.msk [vmem:[#allocation2 + $0x83] sm:$0xff] %vm557_vm2, %v3397_v14  ;;  %v3398_v34 = vmul.f32 %v9670_v18, %v3182_v42  ;;  %v3507_v18 = vld [vmem:[#allocation2 + $0x50] sm:$0xff] }
 0x34f   : > { %3473 = vst.msk [vmem:[#allocation2 + $0x73] sm:$0xff] %vm557_vm2, %v3395_v13  ;;  %v3396_v2 = vmul.f32 %v9659_v29, %v3180_v55  ;;  %v7642_v11 = vpop.f32.mrb[16].mxu0  ;;  %v3584_v9 = vsel %vm408_vm1, %v3579_v20, %v3583_v50  ;;  %v3587_v8 = vor.u32 %v9758_v56, %v3583_v50  ;;  %v3510_v47 = vld [vmem:[#allocation2 + $0x68] sm:$0xff]  ;;  %10842 = vst [vmem:[#allocation9_spill] sm:$0xff] %v9784_v32 }
 0x350   : > { %3476 = vst.msk [vmem:[#allocation2 + $0x8b] sm:$0xff] %vm557_vm2, %v3398_v34  ;;  %v3149_v5 = vadd.f32 %v7642_v11, %v9652_v53  ;;  %v3009_v6 = vpop.f32.mrb[17].mxu0  ;;  %7666 = vmatprep.mubr.msk.bf16.mxu1 %vm557_vm2, %v3584_v9  ;;  %v3508_v22 = vld [vmem:[#allocation2 + $0x58] sm:$0xff]  ;;  %v3509_v7 = vld [vmem:[#allocation2 + $0x60] sm:$0xff]  ;;  %v3595_v59 = vor.u32 %v9784_v32, %v3591_v24 }
 0x351   : > { %3474 = vst.msk [vmem:[#allocation2 + $0x7b] sm:$0xff] %vm557_vm2, %v3396_v2  ;;  %v3147_v29 = vadd.f32 %v9652_v53, %v3009_v6  ;;  %v7643_v40 = vpop.f32.mrb[18].mxu0  ;;  %v3592_v1 = vsel %vm408_vm1, %v3587_v8, %v3591_v24  ;;  %v9777_v61 = vpack.c.bf16 %v3508_v22, %v3507_v18  ;;  %v9779_v41 = vpack.c.bf16 %v3510_v47, %v3509_v7  ;;  %v3336_v22 = vpop.permute.xlu0 %3335 }
 0x352   : > { %v3185_v21 = vmax.f32 %v3149_v5, 0.0  ;;  %v3150_v48 = vadd.f32 %v7643_v40, %v9652_v53  ;;  %v3012_v26 = vpop.f32.mrb[19].mxu0  ;;  %7667 = vmatmul.mubr.msk.bf16.gmra.mrb[4].mxu1 %vm557_vm2, %v3592_v1 }
 0x353   : > { %v3183_v12 = vmax.f32 %v3147_v29, 0.0  ;;  %v3148_v4 = vadd.f32 %v9652_v53, %v3012_v26  ;;  %v9788_v63 = vshll.u32 %v9777_v61, 16  ;;  %v9793_v54 = vshll.u32 %v9779_v41, 16 }
 0x354   : > { %v3401_v51 = vmul.f32 %v9693_v62, %v3185_v21  ;;  %v3186_v38 = vmax.f32 %v3150_v48, 0.0  ;;  %v9800_v60 = vshrl.u32 %v9777_v61, 16  ;;  %v9824_v18 = vshrl.u32 %v9779_v41, 16 }
 0x355   : > { %10843 = vst [vmem:[#allocation10_spill] sm:$0xff] %v9788_v63  ;;  %10844 = vst [vmem:[#allocation11_spill] sm:$0xff] %v9793_v54  ;;  %v3399_v33 = vmul.f32 %v9677_v52, %v3183_v12  ;;  %v3184_v44 = vmax.f32 %v3148_v4, 0.0  ;;  %v3599_v27 = vrot.slane %v9788_v63, 1  ;;  %v3607_v20 = vrot.slane %v9793_v54, 1  ;;  %v3341_v12 = vpop.permute.xlu1 %3340 }
 0x356   : > { %10845 = vst [vmem:[#allocation12_spill] sm:$0xff] %v9800_v60  ;;  %3479 = vst.msk [vmem:[#allocation2 + $0xa3] sm:$0xff] %vm557_vm2, %v3401_v51  ;;  %v3402_v62 = vmul.f32 %v9703_v30, %v3186_v38  ;;  %v3511_v30 = vld [vmem:[#allocation2 + $0x70] sm:$0xff] }
 0x357   : > { %3477 = vst.msk [vmem:[#allocation2 + $0x93] sm:$0xff] %vm557_vm2, %v3399_v33  ;;  %v3400_v49 = vmul.f32 %v9681_v23, %v3184_v44  ;;  %v7646_v14 = vpop.f32.mrb[20].mxu0  ;;  %v3600_v42 = vsel %vm408_vm1, %v3595_v59, %v3599_v27  ;;  %v3603_v52 = vor.u32 %v9800_v60, %v3599_v27  ;;  %v3514_v13 = vld [vmem:[#allocation2 + $0x88] sm:$0xff]  ;;  %10846 = vst [vmem:[#allocation14_spill] sm:$0xff] %v9824_v18 }
 0x358   : > { %3480 = vst.msk [vmem:[#allocation2 + $0xab] sm:$0xff] %vm557_vm2, %v3402_v62  ;;  %v3153_v55 = vadd.f32 %v7646_v14, %v9652_v53  ;;  %v3025_v50 = vpop.f32.mrb[21].mxu0  ;;  %7670 = vmatprep.mubr.msk.bf16.mxu1 %vm557_vm2, %v3600_v42  ;;  %v3512_v34 = vld [vmem:[#allocation2 + $0x78] sm:$0xff]  ;;  %v3513_v2 = vld [vmem:[#allocation2 + $0x80] sm:$0xff]  ;;  %v3611_v48 = vor.u32 %v9824_v18, %v3607_v20 }
 0x359   : > { %3478 = vst.msk [vmem:[#allocation2 + $0x9b] sm:$0xff] %vm557_vm2, %v3400_v49  ;;  %v3151_v23 = vadd.f32 %v9652_v53, %v3025_v50  ;;  %v7647_v11 = vpop.f32.mrb[22].mxu0  ;;  %v3608_v9 = vsel %vm408_vm1, %v3603_v52, %v3607_v20  ;;  %v9817_v8 = vpack.c.bf16 %v3512_v34, %v3511_v30  ;;  %v9819_v24 = vpack.c.bf16 %v3514_v13, %v3513_v2  ;;  %v3346_v13 = vpop.permute.xlu0 %3345 }
 0x35a   : > { %v3189_v47 = vmax.f32 %v3153_v55, 0.0  ;;  %v3154_v5 = vadd.f32 %v7647_v11, %v9652_v53  ;;  %v3028_v6 = vpop.f32.mrb[23].mxu0  ;;  %7671 = vmatmul.mubr.msk.bf16.gmra.mrb[8].mxu1 %vm557_vm2, %v3608_v9 }
 0x35b   : > { %v3187_v7 = vmax.f32 %v3151_v23, 0.0  ;;  %v3152_v29 = vadd.f32 %v9652_v53, %v3028_v6  ;;  %v9828_v40 = vshll.u32 %v9817_v8, 16  ;;  %v9833_v26 = vshll.u32 %v9819_v24, 16 }
 0x35c   : > { %v3405_v1 = vmul.f32 %v9762_v15, %v3189_v47  ;;  %v3190_v21 = vmax.f32 %v3154_v5, 0.0  ;;  %v9838_v59 = vshrl.u32 %v9817_v8, 16  ;;  %v9860_v9 = vshrl.u32 %v9819_v24, 16  ;;  %v3351_v47 = vpop.permute.xlu1 %3350 }
 0x35d   : > { %v3403_v4 = vmul.f32 %v9721_v43, %v3187_v7  ;;  %v3188_v51 = vmax.f32 %v3152_v29, 0.0  ;;  %v3615_v38 = vrot.slane %v9828_v40, 1  ;;  %v3623_v43 = vrot.slane %v9833_v26, 1 }
 0x35e   : > { %3483 = vst.msk [vmem:[#allocation2 + $0xc3] sm:$0xff] %vm557_vm2, %v3405_v1  ;;  %v3406_v33 = vmul.f32 %v9772_v39, %v3190_v21  ;;  %v3515_v39 = vld [vmem:[#allocation2 + $0x90] sm:$0xff] }
 0x35f   : > { %3481 = vst.msk [vmem:[#allocation2 + $0xb3] sm:$0xff] %vm557_vm2, %v3403_v4  ;;  %v3404_v15 = vmul.f32 %v9742_v35, %v3188_v51  ;;  %v7650_v44 = vpop.f32.mrb[24].mxu0  ;;  %v3616_v27 = vsel %vm408_vm1, %v3611_v48, %v3615_v38  ;;  %v3619_v62 = vor.u32 %v9838_v59, %v3615_v38  ;;  %v3518_v49 = vld [vmem:[#allocation2 + $0xa8] sm:$0xff]  ;;  %v3627_v21 = vor.u32 %v9860_v9, %v3623_v43 }
 0x360   : > { %3484 = vst.msk [vmem:[#allocation2 + $0xcb] sm:$0xff] %vm557_vm2, %v3406_v33  ;;  %v3157_v14 = vadd.f32 %v7650_v44, %v9652_v53  ;;  %v3041_v42 = vpop.f32.mrb[25].mxu0  ;;  %7674 = vmatprep.mubr.msk.bf16.mxu1 %vm557_vm2, %v3616_v27  ;;  %v3516_v52 = vld [vmem:[#allocation2 + $0x98] sm:$0xff]  ;;  %v3517_v20 = vld [vmem:[#allocation2 + $0xa0] sm:$0xff]  ;;  %v3356_v44 = vpop.permute.xlu0 %3355 }
 0x361   : > { %3482 = vst.msk [vmem:[#allocation2 + $0xbb] sm:$0xff] %vm557_vm2, %v3404_v15  ;;  %v3155_v35 = vadd.f32 %v9652_v53, %v3041_v42  ;;  %v7651_v55 = vpop.f32.mrb[26].mxu0  ;;  %v3624_v50 = vsel %vm408_vm1, %v3619_v62, %v3623_v43  ;;  %v9853_v30 = vpack.c.bf16 %v3516_v52, %v3515_v39  ;;  %v9855_v34 = vpack.c.bf16 %v3518_v49, %v3517_v20  ;;  %v3361_v20 = vpop.permute.xlu1 %3360 }
 0x362   : > { %v3193_v2 = vmax.f32 %v3157_v14, 0.0  ;;  %v3158_v23 = vadd.f32 %v7651_v55, %v9652_v53  ;;  %v3044_v11 = vpop.f32.mrb[27].mxu0  ;;  %7675 = vmatmul.mubr.msk.bf16.gmra.mrb[12].mxu1 %vm557_vm2, %v3624_v50 }
 0x363   : > { %v3191_v5 = vmax.f32 %v3155_v35, 0.0  ;;  %v3156_v6 = vadd.f32 %v9652_v53, %v3044_v11  ;;  %v9864_v7 = vshll.u32 %v9853_v30, 16  ;;  %v9868_v48 = vshll.u32 %v9855_v34, 16 }
 0x364   : > { %v3409_v29 = vmul.f32 %v3336_v22, %v3193_v2  ;;  %v3194_v1 = vmax.f32 %v3158_v23, 0.0  ;;  %v9873_v33 = vshrl.u32 %v9853_v30, 16 }
 0x365   : > { %v3407_v4 = vmul.f32 %v9795_v46, %v3191_v5  ;;  %v3192_v51 = vmax.f32 %v3156_v6, 0.0  ;;  %v3631_v38 = vrot.slane %v9864_v7, 1  ;;  %v3639_v46 = vrot.slane %v9868_v48, 1 }
 0x366   : > { %3487 = vst.msk [vmem:[#allocation2 + $0xe3] sm:$0xff] %vm557_vm2, %v3409_v29  ;;  %v3410_v15 = vmul.f32 %v3341_v12, %v3194_v1  ;;  %v3519_v12 = vld [vmem:[#allocation2 + $0xb0] sm:$0xff]  ;;  %v9894_v6 = vshrl.u32 %v9855_v34, 16 }
 0x367   : > { %3485 = vst.msk [vmem:[#allocation2 + $0xd3] sm:$0xff] %vm557_vm2, %v3407_v4  ;;  %v3408_v22 = vmul.f32 %v9804_v17, %v3192_v51  ;;  %v7654_v27 = vpop.f32.mrb[28].mxu0  ;;  %v3632_v62 = vsel %vm408_vm1, %v3627_v21, %v3631_v38  ;;  %v3635_v43 = vor.u32 %v9873_v33, %v3631_v38  ;;  %v3522_v49 = vld [vmem:[#allocation2 + $0xc8] sm:$0xff] }
 0x368   : > { %3488 = vst.msk [vmem:[#allocation2 + $0xeb] sm:$0xff] %vm557_vm2, %v3410_v15  ;;  %v3161_v14 = vadd.f32 %v7654_v27, %v9652_v53  ;;  %v3057_v42 = vpop.f32.mrb[29].mxu0  ;;  %7678 = vmatprep.mubr.msk.bf16.mxu1 %vm557_vm2, %v3632_v62  ;;  %v3520_v39 = vld [vmem:[#allocation2 + $0xb8] sm:$0xff]  ;;  %v3521_v52 = vld [vmem:[#allocation2 + $0xc0] sm:$0xff]  ;;  %v3643_v38 = vor.u32 %v9894_v6, %v3639_v46 }
 0x369   : > { %3486 = vst.msk [vmem:[#allocation2 + $0xdb] sm:$0xff] %vm557_vm2, %v3408_v22  ;;  %v3159_v17 = vadd.f32 %v9652_v53, %v3057_v42  ;;  %v7655_v35 = vpop.f32.mrb[30].mxu0  ;;  %v3640_v55 = vsel %vm408_vm1, %v3635_v43, %v3639_v46  ;;  %v9887_v50 = vpack.c.bf16 %v3520_v39, %v3519_v12  ;;  %v9889_v2 = vpack.c.bf16 %v3522_v49, %v3521_v52  ;;  %v3366_v22 = vpop.permute.xlu0 %3365 }
 0x36a   : > { %v3197_v23 = vmax.f32 %v3161_v14, 0.0  ;;  %v3162_v11 = vadd.f32 %v7655_v35, %v9652_v53  ;;  %v3060_v5 = vpop.f32.mrb[31].mxu0  ;;  %7679 = vmatmul.mubr.msk.bf16.gmra.mrb[16].mxu1 %vm557_vm2, %v3640_v55  ;;  %v3371_v42 = vpop.permute.xlu1 %3370 }
 0x36b   : > { %v3195_v29 = vmax.f32 %v3159_v17, 0.0  ;;  %v3160_v1 = vadd.f32 %v9652_v53, %v3060_v5  ;;  %v9898_v21 = vshll.u32 %v9887_v50, 16  ;;  %v9902_v15 = vshll.u32 %v9889_v2, 16 }
 0x36c   : > { %v3413_v4 = vmul.f32 %v3356_v44, %v3197_v23  ;;  %v3198_v51 = vmax.f32 %v3162_v11, 0.0  ;;  %v9906_v49 = vshrl.u32 %v9887_v50, 16 }
 0x36d   : > { %v3411_v27 = vmul.f32 %v3346_v13, %v3195_v29  ;;  %v3196_v62 = vmax.f32 %v3160_v1, 0.0  ;;  %v3647_v43 = vrot.slane %v9898_v21, 1  ;;  %v3655_v13 = vrot.slane %v9902_v15, 1 }
 0x36e   : > { %3491 = vst.msk [vmem:[#allocation2 + $0x103] sm:$0xff] %vm557_vm2, %v3413_v4  ;;  %v3414_v14 = vmul.f32 %v3361_v20, %v3198_v51  ;;  %v3523_v20 = vld [vmem:[#allocation2 + $0xd0] sm:$0xff] }
 0x36f   : > { %3489 = vst.msk [vmem:[#allocation2 + $0xf3] sm:$0xff] %vm557_vm2, %v3411_v27  ;;  %v3412_v44 = vmul.f32 %v3351_v47, %v3196_v62  ;;  %v7658_v12 = vpop.f32.mrb[32].mxu0  ;;  %v3648_v46 = vsel %vm408_vm1, %v3643_v38, %v3647_v43  ;;  %v3651_v39 = vor.u32 %v9906_v49, %v3647_v43  ;;  %v3526_v52 = vld [vmem:[#allocation2 + $0xe8] sm:$0xff]  ;;  %v9926_v27 = vshrl.u32 %v9889_v2, 16  ;;  %v3376_v62 = vpop.permute.xlu0 %3375 }
 0x370   : > { %3492 = vst.msk [vmem:[#allocation2 + $0x10b] sm:$0xff] %vm557_vm2, %v3414_v14  ;;  %v3165_v17 = vadd.f32 %v7658_v12, %v9652_v53  ;;  %v3073_v35 = vpop.f32.mrb[33].mxu0  ;;  %7682 = vmatprep.mubr.msk.bf16.mxu1 %vm557_vm2, %v3648_v46  ;;  %v3524_v55 = vld [vmem:[#allocation2 + $0xd8] sm:$0xff]  ;;  %v3525_v23 = vld [vmem:[#allocation2 + $0xe0] sm:$0xff] }
 0x371   : > { %3490 = vst.msk [vmem:[#allocation2 + $0xfb] sm:$0xff] %vm557_vm2, %v3412_v44  ;;  %v3163_v47 = vadd.f32 %v9652_v53, %v3073_v35  ;;  %v7659_v11 = vpop.f32.mrb[34].mxu0  ;;  %v3656_v5 = vsel %vm408_vm1, %v3651_v39, %v3655_v13  ;;  %v9919_v29 = vpack.c.bf16 %v3524_v55, %v3523_v20  ;;  %v9921_v1 = vpack.c.bf16 %v3526_v52, %v3525_v23 }
 0x372   : > { %v3201_v4 = vmax.f32 %v3165_v17, 0.0  ;;  %v3166_v51 = vadd.f32 %v7659_v11, %v9652_v53  ;;  %v3076_v38 = vpop.f32.mrb[35].mxu0  ;;  %7683 = vmatmul.mubr.msk.bf16.gmra.mrb[20].mxu1 %vm557_vm2, %v3656_v5  ;;  %v3659_v39 = vor.u32 %v9926_v27, %v3655_v13  ;;  %v3381_v17 = vpop.permute.xlu1 %3380 }
 0x373   : > { %v3199_v43 = vmax.f32 %v3163_v47, 0.0  ;;  %v3164_v14 = vadd.f32 %v9652_v53, %v3076_v38  ;;  %v9930_v44 = vshll.u32 %v9919_v29, 16  ;;  %v9934_v52 = vshll.u32 %v9921_v1, 16 }
 0x374   : > { %v3417_v12 = vmul.f32 %v3376_v62, %v3201_v4  ;;  %v3202_v46 = vmax.f32 %v3166_v51, 0.0  ;;  %v9938_v23 = vshrl.u32 %v9919_v29, 16  ;;  %v4734_v47 = vrot.slane %v9838_v59, 1 }
 0x375   : > { %v3415_v35 = vmul.f32 %v3366_v22, %v3199_v43  ;;  %v3200_v20 = vmax.f32 %v3164_v14, 0.0  ;;  %v3663_v55 = vrot.slane %v9930_v44, 1  ;;  %v3671_v22 = vrot.slane %v9934_v52, 1 }
 0x376   : > { %3495 = vst.msk [vmem:[#allocation2 + $0x123] sm:$0xff] %vm557_vm2, %v3417_v12  ;;  %v3418_v53 = vmul.f32 %v3381_v17, %v3202_v46  ;;  %v3527_v51 = vld [vmem:[#allocation2 + $0xf0] sm:$0xff]  ;;  %v4735_v43 = vrot.slane %v9828_v40, 2  ;;  %v4738_v14 = vrot.slane %v9860_v9, 1  ;;  %v9959_v17 = vshrl.u32 %v9921_v1, 16 }
 0x377   : > { %3493 = vst.msk [vmem:[#allocation2 + $0x113] sm:$0xff] %vm557_vm2, %v3415_v35  ;;  %v3416_v11 = vmul.f32 %v3371_v42, %v3200_v20  ;;  %v3664_v13 = vsel %vm408_vm1, %v3659_v39, %v3663_v55  ;;  %v3667_v5 = vor.u32 %v9938_v23, %v3663_v55  ;;  %v3530_v4 = vld [vmem:[#allocation2 + $0x108] sm:$0xff]  ;;  %v4739_v39 = vrot.slane %v9833_v26, 2 }
 0x378   : > { %3496 = vst.msk [vmem:[#allocation2 + $0x12b] sm:$0xff] %vm557_vm2, %v3418_v53  ;;  %7686 = vmatprep.mubr.msk.bf16.mxu1 %vm557_vm2, %v3664_v13  ;;  %v3528_v38 = vld [vmem:[#allocation2 + $0xf8] sm:$0xff]  ;;  %v3529_v62 = vld [vmem:[#allocation2 + $0x100] sm:$0xff]  ;;  %v9961_v35 = vor.u32 %v4735_v43, %v4734_v47  ;;  %v4742_v20 = vrot.slane %v9873_v33, 1  ;;  %v4743_v55 = vrot.slane %v9864_v7, 2  ;;  %v3675_v13 = vor.u32 %v9959_v17, %v3671_v22 }
 0x379   : > { %3494 = vst.msk [vmem:[#allocation2 + $0x11b] sm:$0xff] %vm557_vm2, %v3416_v11  ;;  %v3672_v42 = vsel %vm408_vm1, %v3667_v5, %v3671_v22  ;;  %v9952_v12 = vpack.c.bf16 %v3528_v38, %v3527_v51  ;;  %v9954_v46 = vpack.c.bf16 %v3530_v4, %v3529_v62  ;;  %v4740_v5 = vor.u32 %v4739_v39, %v4738_v14 }
 0x37a   : > { %7687 = vmatmul.mubr.msk.bf16.gmra.mrb[24].mxu1 %vm557_vm2, %v3672_v42  ;;  %10847 = vst [vmem:[#allocation15_spill] sm:$0xff] %v9961_v35  ;;  %v4746_v4 = vrot.slane %v9894_v6, 1  ;;  %v4744_v38 = vor.u32 %v4743_v55, %v4742_v20  ;;  %v4747_v62 = vrot.slane %v9868_v48, 2  ;;  %v4750_v42 = vrot.slane %v9906_v49, 1 }
 0x37b   : > { %v9966_v53 = vshll.u32 %v9952_v12, 16  ;;  %v9969_v11 = vshll.u32 %v9954_v46, 16  ;;  %v9975_v47 = vshrl.u32 %v9952_v12, 16  ;;  %v9980_v43 = vsel %vm1566_vm4, %v9961_v35, %v4740_v5 }
 0x37c   : > { %10848 = vst [vmem:[#allocation16_spill] sm:$0xff] %v9980_v43  ;;  %v9987_v54 = vsel %vm1566_vm4, %v4740_v5, %v4744_v38  ;;  %v4748_v63 = vor.u32 %v4747_v62, %v4746_v4  ;;  %v4751_v43 = vrot.slane %v9898_v21, 2  ;;  %v4754_v35 = vrot.slane %v9926_v27, 1 }
 0x37d   : > { %v3679_v51 = vrot.slane %v9966_v53, 1  ;;  %v3687_v14 = vrot.slane %v9969_v11, 1  ;;  %10849 = vst [vmem:[#allocation17_spill] sm:$0xff] %v9987_v54  ;;  %v4755_v4 = vrot.slane %v9902_v15, 2  ;;  %v10005_v62 = vshrl.u32 %v9954_v46, 16 }
 0x37e   : > { %v3531_v20 = vld [vmem:[#allocation2 + $0x110] sm:$0xff]  ;;  %v4752_v5 = vor.u32 %v4751_v43, %v4750_v42  ;;  %v4767_v16 = vrot.slane %v9966_v53, 2 }
 0x37f   : > { %v3680_v57 = vsel %vm408_vm1, %v3675_v13, %v3679_v51  ;;  %v3683_v22 = vor.u32 %v9975_v47, %v3679_v51  ;;  %v3534_v39 = vld [vmem:[#allocation2 + $0x128] sm:$0xff]  ;;  %v4756_v43 = vor.u32 %v4755_v4, %v4754_v35  ;;  %v3691_v42 = vor.u32 %v10005_v62, %v3687_v14 }
 0x380   : > { %7690 = vmatprep.mubr.msk.bf16.mxu1 %vm557_vm2, %v3680_v57  ;;  %v3532_v55 = vld [vmem:[#allocation2 + $0x118] sm:$0xff]  ;;  %v3533_v18 = vld [vmem:[#allocation2 + $0x120] sm:$0xff]  ;;  %v10001_v57 = vsel %vm1566_vm4, %v4744_v38, %v4748_v63  ;;  %v10016_v38 = vsel %vm1566_vm4, %v4748_v63, %v4752_v5  ;;  %v4759_v4 = vrot.slane %v9930_v44, 2  ;;  %v4770_v56 = vrot.slane %v10005_v62, 1 }
 0x381   : > { %v3688_v13 = vsel %vm408_vm1, %v3683_v22, %v3687_v14  ;;  %v9993_v60 = vpack.c.bf16 %v3532_v55, %v3531_v20  ;;  %v9995_v51 = vpack.c.bf16 %v3533_v18, %v3533_v18  ;;  %v9997_v28 = vpack.c.bf16 %v3534_v39, %v3533_v18  ;;  %10851 = vst [vmem:[#allocation19_spill] sm:$0xff] %v10001_v57  ;;  %v3535_v18 = vld [vmem:[#allocation2 + $0x130] sm:$0xff] }
 0x382   : > { %7691 = vmatmul.mubr.msk.bf16.gmra.mrb[28].mxu1 %vm557_vm2, %v3688_v13  ;;  %10852 = vst [vmem:[#allocation20_spill] sm:$0xff] %v10016_v38  ;;  %v4758_v57 = vrot.slane %v9938_v23, 1  ;;  %v10030_v10 = vpack.c.bf16 %v3535_v18, %v3535_v18  ;;  %v10033_v63 = vsel %vm1566_vm4, %v4752_v5, %v4756_v43  ;;  %v4762_v38 = vrot.slane %v9959_v17, 1 }
 0x383   : > { %10850 = vst [vmem:[#allocation18_spill] sm:$0xff] %v9995_v51  ;;  %v10008_v54 = vshll.u32 %v9993_v60, 16  ;;  %v3701_v22 = vshll.u32 %v9995_v51, 16  ;;  %v10012_v20 = vrot.slane %v9993_v60, 1  ;;  %v10785_v39 = vrot.slane %v9997_v28, 1  ;;  %10854 = vst [vmem:[#allocation22_spill] sm:$0xff] %v10033_v63 }
 0x384   : > { %v10021_v13 = vshrl.u32 %v9993_v60, 16  ;;  %v4760_v63 = vor.u32 %v4759_v4, %v4758_v57  ;;  %v10796_v45 = vshrl.u32 %v9997_v28, 16  ;;  %v10795_v57 = vshll.u32 %v9997_v28, 16 }
 0x385   : > { %v3695_v55 = vrot.slane %v10008_v54, 1  ;;  %v3703_v32 = vrot.slane %v3701_v22, 1  ;;  %v10028_v37 = vsel %vm1028_vm3, %v10012_v20, %v10785_v39  ;;  %v4763_v22 = vrot.slane %v9934_v52, 2 }
 0x386   : > { %10853 = vst [vmem:[#allocation21_spill] sm:$0xff] %v10028_v37  ;;  %v4766_v39 = vrot.slane %v9975_v47, 1  ;;  %v10053_v51 = vsel %vm1566_vm4, %v4756_v43, %v4760_v63 }
 0x387   : > { %v3696_v35 = vsel %vm408_vm1, %v3691_v42, %v3695_v55  ;;  %v3699_v14 = vor.u32 %v10021_v13, %v3695_v55  ;;  %v4771_v42 = vrot.slane %v9969_v11, 2  ;;  %v4774_v55 = vrot.slane %v10021_v13, 1 }
 0x388   : > { %7694 = vmatprep.mubr.msk.bf16.mxu1 %vm557_vm2, %v3696_v35  ;;  %v4764_v37 = vor.u32 %v4763_v22, %v4762_v38  ;;  %v4768_v36 = vor.u32 %v4767_v16, %v4766_v39  ;;  %v4775_v35 = vrot.slane %v10008_v54, 2  ;;  %v4781_v38 = vrot.slane %v10796_v45, 1 }
 0x389   : > { %v3704_v5 = vsel %vm408_vm1, %v3699_v14, %v3703_v32  ;;  %v4772_v32 = vor.u32 %v4771_v42, %v4770_v56  ;;  %v4788_v14 = vshrl.u32 %v10030_v10, 16  ;;  %v4784_v56 = vrot.slane %v10795_v57, 2 }
 0x38a   : > { %7695 = vmatmul.mubr.msk.bf16.gmra.mrb[32].mxu1 %vm557_vm2, %v3704_v5  ;;  %v10058_v4 = vsel %vm1566_vm4, %v4760_v63, %v4764_v37  ;;  %v10061_v16 = vsel %vm1566_vm4, %v4764_v37, %v4768_v36  ;;  %v4776_v39 = vor.u32 %v4775_v35, %v4774_v55  ;;  %v4791_v5 = vshll.u32 %v10030_v10, 16  ;;  %v10079_v55 = vld [vmem:[%s10740_s3 + $0x6] sm:$0x3] }
 0x38b   : > { %7700 = vmatprep.mubr.msk.bf16.mxu1 %vm557_vm2, %v9663_v31  ;;  %10855 = vst [vmem:[#allocation23_spill] sm:$0xff] %v10058_v4  ;;  %v10066_v22 = vsel %vm1566_vm4, %v4768_v36, %v4772_v32  ;;  %v4790_v43 = vrot.slane %v4788_v14, 1  ;;  %v4785_v63 = vor.u32 %v4784_v56, %v4781_v38  ;;  %v4266_v37 = vsel %vm612_vm0, %v9733_v3, 0  ;;  %v3536_v3 = vld [vmem:[#allocation2 + $0x138] sm:$0xff] }
 0x38c   : > { %v10072_v42 = vsel %vm1566_vm4, %v4772_v32, %v4776_v39  ;;  %v4793_v4 = vrot.slane %v4791_v5, 2  ;;  %v10094_v14 = vrot.slane %v9997_v28, 2  ;;  %v5623_v5 = vrot.slane %v9828_v40, 3 }
 0x38d   : > { %v10082_v36 = vsel %vm1566_vm4, %v4776_v39, %v4785_v63  ;;  %v5101_v39 = vrot.slane %v10030_v10, 2  ;;  %v5631_v45 = vrot.slane %v9864_v7, 3 }
 0x38e   : > { %v4794_v35 = vor.u32 %v4793_v4, %v4790_v43  ;;  %v10097_v4 = vpack.c.bf16 %v3536_v3, %v3535_v18  ;;  %v5622_v18 = vrot.slane %v9838_v59, 2  ;;  %v5638_v59 = vrot.slane %v9906_v49, 2 }
 0x38f   : > { %v10101_v38 = vsel %vm1922_vm5, %v10094_v14, %v5101_v39  ;;  %v5630_v39 = vrot.slane %v9873_v33, 2  ;;  %v5639_v33 = vrot.slane %v9898_v21, 3  ;;  %v5646_v49 = vrot.slane %v9938_v23, 2 }
 0x390   : > { %v10089_v32 = vsel %vm1566_vm4, %v4785_v63, %v4794_v35  ;;  %10856 = vst [vmem:[#allocation24_spill] sm:$0xff] %v10101_v38  ;;  %v10797_v56 = vrot.slane %v10097_v4, 2  ;;  %v5626_v63 = vrot.slane %v9860_v9, 2  ;;  %v3537_v35 = vld [vmem:[#allocation2 + $0x140] sm:$0x3f]  ;;  %v10118_v3 = vor.u32 %v5623_v5, %v5622_v18 }
 0x391   : > { %v5634_v38 = vrot.slane %v9894_v6, 2  ;;  %v10127_v40 = vpack.c.bf16 %v3537_v35, %v3537_v35  ;;  %v5632_v9 = vor.u32 %v5631_v45, %v5630_v39  ;;  %v5643_v6 = vrot.slane %v9902_v15, 3 }
 0x392   : > { %7701 = vmatmul.mubr.msk.bf16.vlgmr.msra.gmra.mrb[0].mxu1 %vm557_vm2, %v9688_v25  ;;  %v10112_v43 = vsel %vm1922_vm5, %v10094_v14, %v10797_v56  ;;  %v5635_v56 = vrot.slane %v9868_v48, 3  ;;  %v5642_v48 = vrot.slane %v9926_v27, 2  ;;  %v5640_v5 = vor.u32 %v5639_v33, %v5638_v59 }
 0x393   : > { %7737 = vmatpush3.bf16.msra.mxu1 %v4266_v37  ;;  %7704 = vmatprep.mubr.msk.bf16.mxu1 %vm557_vm2, %v9690_v0  ;;  %v5627_v37 = vrot.slane %v9833_v26, 3  ;;  %v5650_v45 = vrot.slane %v9959_v17, 2  ;;  %v5654_v27 = vrot.slane %v9975_v47, 2  ;;  %v5659_v35 = vrot.slane %v9969_v11, 3 }
 0x394   : > { %8590 = vmatprep.subr.msk.bf16.mxu1 %vm612_vm0, %v10079_v55  ;;  %v5636_v7 = vor.u32 %v5635_v56, %v5634_v38  ;;  %v5651_v38 = vrot.slane %v9934_v52, 3  ;;  %v5658_v56 = vrot.slane %v10005_v62, 2  ;;  %v5662_v39 = vrot.slane %v10021_v13, 2 }
 0x395   : > { %v5628_v57 = vor.u32 %v5627_v37, %v5626_v63  ;;  %v5647_v63 = vrot.slane %v9930_v44, 3  ;;  %v5644_v37 = vor.u32 %v5643_v6, %v5642_v48  ;;  %v5663_v59 = vrot.slane %v10008_v54, 3 }
 0x396   : > { %v10145_v21 = vsel %vm2460_vm6, %v5632_v9, %v5636_v7  ;;  %v10150_v15 = vsel %vm2460_vm6, %v5636_v7, %v5640_v5  ;;  %v5652_v17 = vor.u32 %v5651_v38, %v5650_v45  ;;  %v5660_v62 = vor.u32 %v5659_v35, %v5658_v56 }
 0x397   : > { %v10131_v26 = vsel %vm2460_vm6, %v10118_v3, %v5628_v57  ;;  %v10140_v18 = vsel %vm2460_vm6, %v5628_v57, %v5632_v9  ;;  %v5648_v23 = vor.u32 %v5647_v63, %v5646_v49  ;;  %v5655_v57 = vrot.slane %v9966_v53, 3 }
 0x398   : > { %v10155_v44 = vsel %vm2460_vm6, %v5640_v5, %v5644_v37  ;;  %v10857_v9 = vshrl.u32 %v9997_v28, 16  ;;  %v10858_v7 = vshll.u32 %v9997_v28, 16  ;;  %v5671_v11 = vshrl.u32 %v10097_v4, 16 }
 0x399   : > { %v10160_v52 = vsel %vm2460_vm6, %v5644_v37, %v5648_v23  ;;  %v5656_v47 = vor.u32 %v5655_v57, %v5654_v27  ;;  %v10166_v53 = vsel %vm2460_vm6, %v5648_v23, %v5652_v17  ;;  %v5664_v6 = vor.u32 %v5663_v59, %v5662_v39 }
 0x39a   : > { %7705 = vmatmul.mubr.msk.bf16.gmra.mrb[4].mxu1 %vm557_vm2, %v9726_v19  ;;  %v5666_v33 = vrot.slane %v10857_v9, 2  ;;  %v5667_v48 = vrot.slane %v10858_v7, 3  ;;  %v5674_v54 = vshll.u32 %v10097_v4, 16  ;;  %v5680_v49 = vshrl.u32 %v10127_v40, 16 }
 0x39b   : > { %7708 = vmatprep.mubr.msk.bf16.mxu1 %vm557_vm2, %v9728_v58  ;;  %v10174_v13 = vsel %vm2460_vm6, %v5652_v17, %v5656_v47  ;;  %v10181_v5 = vsel %vm2460_vm6, %v5656_v47, %v5660_v62  ;;  %v5673_v45 = vrot.slane %v5671_v11, 2  ;;  %v5683_v37 = vshll.u32 %v10127_v40, 16 }
 0x39c   : > { %v5668_v63 = vor.u32 %v5667_v48, %v5666_v33  ;;  %v10185_v38 = vsel %vm2460_vm6, %v5660_v62, %v5664_v6  ;;  %v5676_v27 = vrot.slane %v5674_v54, 3  ;;  %v5682_v23 = vrot.slane %v5680_v49, 2 }
 0x39d   : > { %v5685_v56 = vrot.slane %v5683_v37, 3  ;;  %v10798_v59 = vrot.slane %v9997_v28, 3  ;;  %v5991_v9 = vrot.slane %v10097_v4, 3  ;;  %v5993_v33 = vrot.slane %v10127_v40, 3 }
 0x39e   : > { %v10188_v57 = vsel %vm2460_vm6, %v5664_v6, %v5668_v63  ;;  %v5677_v17 = vor.u32 %v5676_v27, %v5673_v45  ;;  %v4174_v48 = vrot.slane %v9663_v31, 1  ;;  %v4175_v11 = vrot.slane %v9688_v25, 1  ;;  %v348_v31 = vld [vmem:[%s10740_s3 + $0x8] sm:$0x3] }
 0x39f   : > { %10859 = vst [vmem:[#allocation25_spill] sm:$0xff] %v10188_v57  ;;  %v5686_v35 = vor.u32 %v5685_v56, %v5682_v23  ;;  %v10206_v62 = vsel %vm2816_vm7, %v10798_v59, %v5991_v9  ;;  %v10209_v7 = vsel %vm2816_vm7, %v5991_v9, %v5993_v33  ;;  %v4177_v54 = vrot.slane %v9690_v0, 1 }
 0x3a0   : > { %v10191_v39 = vsel %vm2460_vm6, %v5668_v63, %v5677_v17  ;;  %10862 = vst [vmem:[#allocation28_spill] sm:$0xff] %v10206_v62  ;;  %10863 = vst [vmem:[#allocation29_spill] sm:$0xff] %v10209_v7  ;;  %v4176_v6 = vsel %vm1028_vm3, %v4174_v48, %v4175_v11  ;;  %v4179_v49 = vrot.slane %v9726_v19, 1  ;;  %v4496_v63 = vsel %vm612_vm0, %v10079_v55, 0 }
 0x3a1   : > { %10860 = vst [vmem:[#allocation26_spill] sm:$0xff] %v10191_v39  ;;  %v10194_v47 = vsel %vm2460_vm6, %v5677_v17, %v5686_v35  ;;  %v4178_v45 = vsel %vm1028_vm3, %v4175_v11, %v4177_v54  ;;  %v4181_v27 = vrot.slane %v9728_v58, 1  ;;  %v4183_v23 = vrot.slane %v9777_v61, 1  ;;  %v10864_v39 = vld [vmem:[#allocation18_spill] sm:$0xff] }
 0x3a2   : > { %7709 = vmatmul.mubr.msk.bf16.gmra.mrb[8].mxu1 %vm557_vm2, %v9777_v61  ;;  %10861 = vst [vmem:[#allocation27_spill] sm:$0xff] %v10194_v47  ;;  %v4180_v37 = vsel %vm1028_vm3, %v4177_v54, %v4179_v49  ;;  %v4185_v17 = vrot.slane %v9779_v41, 1  ;;  %v4187_v35 = vrot.slane %v9817_v8, 1  ;;  %v4189_v48 = vrot.slane %v9819_v24, 1 }
 0x3a3   : > { %7712 = vmatprep.mubr.msk.bf16.mxu1 %vm557_vm2, %v9779_v41  ;;  %v4182_v55 = vsel %vm1028_vm3, %v4179_v49, %v4181_v27  ;;  %v4184_v56 = vsel %vm1028_vm3, %v4181_v27, %v4183_v23  ;;  %v4191_v11 = vrot.slane %v9853_v30, 1  ;;  %v4193_v49 = vrot.slane %v9855_v34, 1 }
 0x3a4   : > { %v4186_v9 = vsel %vm1028_vm3, %v4183_v23, %v4185_v17  ;;  %v4188_v33 = vsel %vm1028_vm3, %v4185_v17, %v4187_v35  ;;  %v4197_v17 = vrot.slane %v9889_v2, 1  ;;  %v4203_v7 = vrot.slane %v9952_v12, 1 }
 0x3a5   : > { %v4192_v54 = vsel %vm1028_vm3, %v4189_v48, %v4191_v11  ;;  %v4194_v27 = vsel %vm1028_vm3, %v4191_v11, %v4193_v49  ;;  %v4201_v11 = vrot.slane %v9921_v1, 1  ;;  %v4209_v57 = vrot.slane %v10864_v39, 1  ;;  %v10866_v39 = vld [vmem:[#allocation3_spill] sm:$0xff] }
 0x3a7   : > { %v4204_v62 = vsel %vm1028_vm3, %v4201_v11, %v4203_v7 }
 0x3aa   : > { %7713 = vmatmul.mubr.msk.bf16.gmra.mrb[12].mxu1 %vm557_vm2, %v9817_v8 }
 0x3ab   : > { %7716 = vmatprep.mubr.msk.bf16.mxu1 %vm557_vm2, %v9819_v24 }
 0x3b2   : > { %7717 = vmatmul.mubr.msk.bf16.gmra.mrb[16].mxu1 %vm557_vm2, %v9853_v30 }
 0x3b3   : > { %7720 = vmatprep.mubr.msk.bf16.mxu1 %vm557_vm2, %v9855_v34 }
 0x3ba   : > { %7721 = vmatmul.mubr.msk.bf16.gmra.mrb[20].mxu1 %vm557_vm2, %v9887_v50 }
 0x3bb   : > { %7724 = vmatprep.mubr.msk.bf16.mxu1 %vm557_vm2, %v9889_v2 }
 0x3c2   : > { %7725 = vmatmul.mubr.msk.bf16.gmra.mrb[24].mxu1 %vm557_vm2, %v9919_v29 }
 0x3c3   : > { %7728 = vmatprep.mubr.msk.bf16.mxu1 %vm557_vm2, %v9921_v1 }
 0x3ca   : > { %7729 = vmatmul.mubr.msk.bf16.gmra.mrb[28].mxu1 %vm557_vm2, %v9952_v12 }
 0x3cb   : > { %7732 = vmatprep.mubr.msk.bf16.mxu1 %vm557_vm2, %v9954_v46 }
 0x3d2   : > { %7733 = vmatmul.mubr.msk.bf16.gmra.mrb[32].mxu1 %vm557_vm2, %v9993_v60 }
 0x3d3   : > { %7738 = vmatprep.mubr.msk.bf16.mxu1 %vm557_vm2, %v4176_v6  ;;  %v4190_v6 = vsel %vm1028_vm3, %v4187_v35, %v4189_v48  ;;  %v4199_v35 = vrot.slane %v9919_v29, 1 }
 0x3d5   : > { %v4200_v59 = vsel %vm1028_vm3, %v4197_v17, %v4199_v35 }
 0x3da   : > { %7739 = vmatmul.mubr.msk.bf16.vlgmr.msra.gmra.mrb[0].mxu1 %vm557_vm2, %v4178_v45 }
 0x3db   : > { %7775 = vmatpush3.bf16.msra.mxu1 %v4496_v63  ;;  %7742 = vmatprep.mubr.msk.bf16.mxu1 %vm557_vm2, %v4180_v37  ;;  %v4195_v63 = vrot.slane %v9887_v50, 1 }
 0x3dc   : > { %8591 = vmatprep.subr.msk.bf16.mxu1 %vm612_vm0, %v348_v31 }
 0x3dd   : > { %v4196_v23 = vsel %vm1028_vm3, %v4193_v49, %v4195_v63  ;;  %v4198_v48 = vsel %vm1028_vm3, %v4195_v63, %v4197_v17  ;;  %v4202_v49 = vsel %vm1028_vm3, %v4199_v35, %v4201_v11  ;;  %v4205_v63 = vrot.slane %v9954_v46, 1 }
 0x3de   : > { %v4210_v35 = vsel %vm1028_vm3, %v10012_v20, %v4209_v57  ;;  %v4851_v11 = vsel %vm612_vm0, %v348_v31, 0  ;;  %v10867_v31 = vld [vmem:[#allocation21_spill] sm:$0xff] }
 0x3df   : > { %v4206_v47 = vsel %vm1028_vm3, %v4203_v7, %v4205_v63  ;;  %v4208_v17 = vsel %vm1028_vm3, %v4205_v63, %v10012_v20  ;;  %v349_v7 = vld [vmem:[%s10740_s3 + $0xa] sm:$0x3]  ;;  %v10865_v20 = vld [vmem:[#allocation5_spill] sm:$0xff] }
 0x3e0   : > { %v4714_v57 = vrot.slane %v10865_v20, 1  ;;  %v10875_v63 = vld [vmem:[#allocation7_spill] sm:$0xff] }
 0x3e2   : > { %7743 = vmatmul.mubr.msk.bf16.gmra.mrb[4].mxu1 %vm557_vm2, %v4182_v55 }
 0x3e3   : > { %7746 = vmatprep.mubr.msk.bf16.mxu1 %vm557_vm2, %v4184_v56 }
 0x3ea   : > { %7747 = vmatmul.mubr.msk.bf16.gmra.mrb[8].mxu1 %vm557_vm2, %v4186_v9 }
 0x3eb   : > { %7750 = vmatprep.mubr.msk.bf16.mxu1 %vm557_vm2, %v4188_v33 }
 0x3f2   : > { %7751 = vmatmul.mubr.msk.bf16.gmra.mrb[12].mxu1 %vm557_vm2, %v4190_v6 }
 0x3f3   : > { %7754 = vmatprep.mubr.msk.bf16.mxu1 %vm557_vm2, %v4192_v54 }
 0x3fa   : > { %7755 = vmatmul.mubr.msk.bf16.gmra.mrb[16].mxu1 %vm557_vm2, %v4194_v27 }
 0x3fb   : > { %7758 = vmatprep.mubr.msk.bf16.mxu1 %vm557_vm2, %v4196_v23 }
 0x402   : > { %7759 = vmatmul.mubr.msk.bf16.gmra.mrb[20].mxu1 %vm557_vm2, %v4198_v48 }
 0x403   : > { %7762 = vmatprep.mubr.msk.bf16.mxu1 %vm557_vm2, %v4200_v59 }
 0x40a   : > { %7763 = vmatmul.mubr.msk.bf16.gmra.mrb[24].mxu1 %vm557_vm2, %v4202_v49 }
 0x40b   : > { %7766 = vmatprep.mubr.msk.bf16.mxu1 %vm557_vm2, %v4204_v62 }
 0x412   : > { %7767 = vmatmul.mubr.msk.bf16.gmra.mrb[28].mxu1 %vm557_vm2, %v4206_v47 }
 0x413   : > { %7770 = vmatprep.mubr.msk.bf16.mxu1 %vm557_vm2, %v4208_v17 }
 0x41a   : > { %7771 = vmatmul.mubr.msk.bf16.gmra.mrb[32].mxu1 %vm557_vm2, %v4210_v35 }
 0x41b   : > { %7776 = vmatprep.mubr.msk.bf16.mxu1 %vm557_vm2, %v4178_v45  ;;  %v4715_v45 = vrot.slane %v10866_v39, 2 }
 0x422   : > { %7777 = vmatmul.mubr.msk.bf16.vlgmr.msra.gmra.mrb[0].mxu1 %vm557_vm2, %v4180_v37  ;;  %v4487_v37 = vrot.slane %v10030_v10, 1  ;;  %v4723_v10 = vrot.slane %v10875_v63, 2 }
 0x423   : > { %7813 = vmatpush3.bf16.msra.mxu1 %v4851_v11  ;;  %7780 = vmatprep.mubr.msk.bf16.mxu1 %vm557_vm2, %v4182_v55  ;;  %v4716_v55 = vor.u32 %v4715_v45, %v4714_v57  ;;  %v5158_v11 = vsel %vm612_vm0, %v349_v7, 0  ;;  %v10876_v45 = vld [vmem:[#allocation12_spill] sm:$0xff] }
 0x424   : > { %8592 = vmatprep.subr.msk.bf16.mxu1 %vm612_vm0, %v349_v7 }
 0x42a   : > { %7781 = vmatmul.mubr.msk.bf16.gmra.mrb[4].mxu1 %vm557_vm2, %v4184_v56 }
 0x42b   : > { %7784 = vmatprep.mubr.msk.bf16.mxu1 %vm557_vm2, %v4186_v9  ;;  %v10869_v9 = vld [vmem:[#allocation8_spill] sm:$0xff] }
 0x432   : > { %7785 = vmatmul.mubr.msk.bf16.gmra.mrb[8].mxu1 %vm557_vm2, %v4188_v33  ;;  %v10870_v33 = vld [vmem:[#allocation6_spill] sm:$0xff] }
 0x433   : > { %7788 = vmatprep.mubr.msk.bf16.mxu1 %vm557_vm2, %v4190_v6  ;;  %v10871_v6 = vld [vmem:[#allocation13_spill] sm:$0xff] }
 0x43a   : > { %7789 = vmatmul.mubr.msk.bf16.gmra.mrb[12].mxu1 %vm557_vm2, %v4192_v54  ;;  %v10872_v54 = vld [vmem:[#allocation4_spill] sm:$0xff] }
 0x43b   : > { %7792 = vmatprep.mubr.msk.bf16.mxu1 %vm557_vm2, %v4194_v27  ;;  %v10873_v27 = vor.u32 %v10871_v6, %v10872_v54  ;;  %v10878_v54 = vld [vmem:[#allocation14_spill] sm:$0xff] }
 0x442   : > { %7793 = vmatmul.mubr.msk.bf16.gmra.mrb[16].mxu1 %vm557_vm2, %v4196_v23  ;;  %v4717_v23 = vsel %vm1566_vm4, %v10873_v27, %v4716_v55  ;;  %v4730_v27 = vrot.slane %v10878_v54, 1 }
 0x443   : > { %7796 = vmatprep.mubr.msk.bf16.mxu1 %vm557_vm2, %v4198_v48  ;;  %v10874_v48 = vld [vmem:[#allocation9_spill] sm:$0xff] }
 0x44a   : > { %7797 = vmatmul.mubr.msk.bf16.gmra.mrb[20].mxu1 %vm557_vm2, %v4200_v59  ;;  %v10868_v59 = vrot.slane %v9997_v28, 1 }
 0x44b   : > { %7800 = vmatprep.mubr.msk.bf16.mxu1 %vm557_vm2, %v4202_v49  ;;  %v4722_v49 = vrot.slane %v10874_v48, 1 }
 0x44c   : > { %v4488_v56 = vsel %vm1028_vm3, %v10868_v59, %v4487_v37  ;;  %v10877_v37 = vld [vmem:[#allocation10_spill] sm:$0xff] }
 0x44d   : > { %v4724_v35 = vor.u32 %v4723_v10, %v4722_v49  ;;  %v4727_v59 = vrot.slane %v10877_v37, 2  ;;  %v10880_v10 = vld [vmem:[#allocation15_spill] sm:$0xff] }
 0x452   : > { %7801 = vmatmul.mubr.msk.bf16.gmra.mrb[24].mxu1 %vm557_vm2, %v4204_v62  ;;  %v4718_v62 = vrot.slane %v10869_v9, 1 }
 0x453   : > { %7804 = vmatprep.mubr.msk.bf16.mxu1 %vm557_vm2, %v4206_v47  ;;  %v4719_v47 = vrot.slane %v10870_v33, 2 }
 0x45a   : > { %7805 = vmatmul.mubr.msk.bf16.gmra.mrb[28].mxu1 %vm557_vm2, %v4208_v17  ;;  %v4720_v17 = vor.u32 %v4719_v47, %v4718_v62  ;;  %v10879_v62 = vld [vmem:[#allocation11_spill] sm:$0xff] }
 0x45b   : > { %7808 = vmatprep.mubr.msk.bf16.mxu1 %vm557_vm2, %v10867_v31  ;;  %v4726_v31 = vrot.slane %v10876_v45, 1  ;;  %v4731_v47 = vrot.slane %v10879_v62, 2 }
 0x45c   : > { %v4721_v57 = vsel %vm1566_vm4, %v4716_v55, %v4720_v17  ;;  %v4725_v6 = vsel %vm1566_vm4, %v4720_v17, %v4724_v35 }
 0x45d   : > { %v4728_v7 = vor.u32 %v4727_v59, %v4726_v31  ;;  %v4732_v55 = vor.u32 %v4731_v47, %v4730_v27  ;;  %v10883_v31 = vld [vmem:[#allocation19_spill] sm:$0xff]  ;;  %v10885_v59 = vld [vmem:[#allocation22_spill] sm:$0xff]  ;;  %v5066_v27 = vrot.slane %v9688_v25, 2  ;;  %v5067_v47 = vrot.slane %v9690_v0, 2 }
 0x45e   : > { %v351_v25 = vld [vmem:[%s10740_s3 + $0xe] sm:$0x3] }
 0x45f   : > { %v4733_v49 = vsel %vm1566_vm4, %v4728_v7, %v4732_v55  ;;  %v4737_v17 = vsel %vm1566_vm4, %v4732_v55, %v10880_v10  ;;  %v5075_v55 = vrot.slane %v9779_v41, 2  ;;  %v5079_v10 = vrot.slane %v9819_v24, 2 }
 0x462   : > { %7809 = vmatmul.mubr.msk.bf16.gmra.mrb[32].mxu1 %vm557_vm2, %v4488_v56  ;;  %v350_v56 = vld [vmem:[%s10740_s3 + $0xc] sm:$0x3] }
 0x463   : > { %7814 = vmatprep.mubr.msk.bf16.mxu1 %vm557_vm2, %v4717_v23  ;;  %v4729_v23 = vsel %vm1566_vm4, %v4724_v35, %v4728_v7  ;;  %v10884_v35 = vld [vmem:[#allocation20_spill] sm:$0xff] }
 0x46a   : > { %7815 = vmatmul.mubr.msk.bf16.vlgmr.msra.gmra.mrb[0].mxu1 %vm557_vm2, %v4721_v57  ;;  %v10882_v57 = vld [vmem:[#allocation17_spill] sm:$0xff] }
 0x46b   : > { %7851 = vmatpush3.bf16.msra.mxu1 %v5158_v11  ;;  %7818 = vmatprep.mubr.msk.bf16.mxu1 %vm557_vm2, %v4725_v6  ;;  %v10881_v11 = vld [vmem:[#allocation16_spill] sm:$0xff]  ;;  %v10886_v6 = vld [vmem:[#allocation23_spill] sm:$0xff] }
 0x46c   : > { %8593 = vmatprep.subr.msk.bf16.mxu1 %vm612_vm0, %v350_v56 }
 0x472   : > { %7819 = vmatmul.mubr.msk.bf16.gmra.mrb[4].mxu1 %vm557_vm2, %v4729_v23 }
 0x473   : > { %7822 = vmatprep.mubr.msk.bf16.mxu1 %vm557_vm2, %v4733_v49  ;;  %v5077_v49 = vrot.slane %v9817_v8, 2 }
 0x47a   : > { %7823 = vmatmul.mubr.msk.bf16.gmra.mrb[8].mxu1 %vm557_vm2, %v4737_v17  ;;  %v5078_v17 = vsel %vm1922_vm5, %v5075_v55, %v5077_v49 }
 0x47b   : > { %7826 = vmatprep.mubr.msk.bf16.mxu1 %vm557_vm2, %v10881_v11  ;;  %v5080_v11 = vsel %vm1922_vm5, %v5077_v49, %v5079_v10  ;;  %v5095_v49 = vrot.slane %v9954_v46, 2 }
 0x482   : > { %7827 = vmatmul.mubr.msk.bf16.gmra.mrb[12].mxu1 %vm557_vm2, %v10882_v57  ;;  %v5081_v57 = vrot.slane %v9853_v30, 2 }
 0x483   : > { %7830 = vmatprep.mubr.msk.bf16.mxu1 %vm557_vm2, %v10883_v31  ;;  %v5083_v31 = vrot.slane %v9855_v34, 2 }
 0x48a   : > { %7831 = vmatmul.mubr.msk.bf16.gmra.mrb[16].mxu1 %vm557_vm2, %v10884_v35  ;;  %v5082_v35 = vsel %vm1922_vm5, %v5079_v10, %v5081_v57 }
 0x48b   : > { %7834 = vmatprep.mubr.msk.bf16.mxu1 %vm557_vm2, %v10885_v59  ;;  %v5084_v59 = vsel %vm1922_vm5, %v5081_v57, %v5083_v31 }
 0x492   : > { %7835 = vmatmul.mubr.msk.bf16.gmra.mrb[20].mxu1 %vm557_vm2, %v10053_v51  ;;  %v5068_v51 = vsel %vm1922_vm5, %v5066_v27, %v5067_v47  ;;  %v5087_v27 = vrot.slane %v9889_v2, 2 }
 0x493   : > { %7838 = vmatprep.mubr.msk.bf16.mxu1 %vm557_vm2, %v10886_v6  ;;  %v5085_v6 = vrot.slane %v9887_v50, 2 }
 0x49a   : > { %7839 = vmatmul.mubr.msk.bf16.gmra.mrb[24].mxu1 %vm557_vm2, %v10061_v16  ;;  %v5069_v16 = vrot.slane %v9726_v19, 2 }
 0x49b   : > { %7842 = vmatprep.mubr.msk.bf16.mxu1 %vm557_vm2, %v10066_v22  ;;  %v5071_v22 = vrot.slane %v9728_v58, 2 }
 0x49c   : > { %v5070_v7 = vsel %vm1922_vm5, %v5067_v47, %v5069_v16  ;;  %v5086_v47 = vsel %vm1922_vm5, %v5083_v31, %v5085_v6  ;;  %v5097_v31 = vrot.slane %v9993_v60, 2 }
 0x4a2   : > { %7843 = vmatmul.mubr.msk.bf16.gmra.mrb[28].mxu1 %vm557_vm2, %v10072_v42  ;;  %v5388_v42 = vsel %vm612_vm0, %v350_v56, 0 }
 0x4a3   : > { %7846 = vmatprep.mubr.msk.bf16.mxu1 %vm557_vm2, %v10082_v36  ;;  %v5072_v36 = vsel %vm1922_vm5, %v5069_v16, %v5071_v22  ;;  %v5089_v16 = vrot.slane %v9919_v29, 2 }
 0x4aa   : > { %7847 = vmatmul.mubr.msk.bf16.gmra.mrb[32].mxu1 %vm557_vm2, %v10089_v32  ;;  %v5073_v32 = vrot.slane %v9777_v61, 2 }
 0x4ab   : > { %7852 = vmatprep.mubr.msk.bf16.mxu1 %vm557_vm2, %v5068_v51  ;;  %v5088_v51 = vsel %vm1922_vm5, %v5085_v6, %v5087_v27  ;;  %v5098_v6 = vsel %vm1922_vm5, %v5095_v49, %v5097_v31 }
 0x4ac   : > { %v5074_v56 = vsel %vm1922_vm5, %v5071_v22, %v5073_v32  ;;  %v5076_v23 = vsel %vm1922_vm5, %v5073_v32, %v5075_v55  ;;  %v5091_v22 = vrot.slane %v9921_v1, 2  ;;  %v5093_v55 = vrot.slane %v9952_v12, 2 }
 0x4ae   : > { %v5092_v32 = vsel %vm1922_vm5, %v5089_v16, %v5091_v22  ;;  %v5094_v10 = vsel %vm1922_vm5, %v5091_v22, %v5093_v55  ;;  %v5096_v57 = vsel %vm1922_vm5, %v5093_v55, %v5095_v49  ;;  %v5743_v22 = vsel %vm612_vm0, %v351_v25, 0  ;;  %v352_v55 = vld [vmem:[%s10740_s3 + $0x10] sm:$0x3] }
 0x4b2   : > { %7853 = vmatmul.mubr.msk.bf16.vlgmr.msra.gmra.mrb[0].mxu1 %vm557_vm2, %v5070_v7 }
 0x4b3   : > { %7889 = vmatpush3.bf16.msra.mxu1 %v5388_v42  ;;  %7856 = vmatprep.mubr.msk.bf16.mxu1 %vm557_vm2, %v5072_v36  ;;  %v5090_v42 = vsel %vm1922_vm5, %v5087_v27, %v5089_v16  ;;  %v5100_v27 = vsel %vm1922_vm5, %v5097_v31, %v10094_v14  ;;  %v10887_v16 = vld [vmem:[#allocation24_spill] sm:$0xff]  ;;  %v5606_v14 = vrot.slane %v10869_v9, 2  ;;  %v5611_v9 = vrot.slane %v10875_v63, 3 }
 0x4b4   : > { %8594 = vmatprep.subr.msk.bf16.mxu1 %vm612_vm0, %v351_v25  ;;  %v5603_v25 = vrot.slane %v10865_v20, 2  ;;  %v5614_v20 = vrot.slane %v10876_v45, 2  ;;  %v5619_v63 = vrot.slane %v10879_v62, 3  ;;  %v5983_v31 = vrot.slane %v9952_v12, 3 }
 0x4b5   : > { %v10892_v12 = vrot.slane %v9997_v28, 3 }
 0x4ba   : > { %7857 = vmatmul.mubr.msk.bf16.gmra.mrb[4].mxu1 %vm557_vm2, %v5074_v56 }
 0x4bb   : > { %7860 = vmatprep.mubr.msk.bf16.mxu1 %vm557_vm2, %v5076_v23 }
 0x4c2   : > { %7861 = vmatmul.mubr.msk.bf16.gmra.mrb[8].mxu1 %vm557_vm2, %v5078_v17 }
 0x4c3   : > { %7864 = vmatprep.mubr.msk.bf16.mxu1 %vm557_vm2, %v5080_v11 }
 0x4ca   : > { %7865 = vmatmul.mubr.msk.bf16.gmra.mrb[12].mxu1 %vm557_vm2, %v5082_v35 }
 0x4cb   : > { %7868 = vmatprep.mubr.msk.bf16.mxu1 %vm557_vm2, %v5084_v59 }
 0x4d2   : > { %7869 = vmatmul.mubr.msk.bf16.gmra.mrb[16].mxu1 %vm557_vm2, %v5086_v47 }
 0x4d3   : > { %7872 = vmatprep.mubr.msk.bf16.mxu1 %vm557_vm2, %v5088_v51 }
 0x4da   : > { %7873 = vmatmul.mubr.msk.bf16.gmra.mrb[20].mxu1 %vm557_vm2, %v5090_v42 }
 0x4db   : > { %7876 = vmatprep.mubr.msk.bf16.mxu1 %vm557_vm2, %v5092_v32 }
 0x4e2   : > { %7877 = vmatmul.mubr.msk.bf16.gmra.mrb[24].mxu1 %vm557_vm2, %v5094_v10 }
 0x4e3   : > { %7880 = vmatprep.mubr.msk.bf16.mxu1 %vm557_vm2, %v5096_v57 }
 0x4ea   : > { %7881 = vmatmul.mubr.msk.bf16.gmra.mrb[28].mxu1 %vm557_vm2, %v5098_v6 }
 0x4eb   : > { %7884 = vmatprep.mubr.msk.bf16.mxu1 %vm557_vm2, %v5100_v27 }
 0x4f2   : > { %7885 = vmatmul.mubr.msk.bf16.gmra.mrb[32].mxu1 %vm557_vm2, %v10887_v16 }
 0x4f3   : > { %7890 = vmatprep.mubr.msk.bf16.mxu1 %vm557_vm2, %v5070_v7  ;;  %v5607_v7 = vrot.slane %v10870_v33, 3 }
 0x4fa   : > { %7891 = vmatmul.mubr.msk.bf16.vlgmr.msra.gmra.mrb[0].mxu1 %vm557_vm2, %v5072_v36  ;;  %v5604_v36 = vrot.slane %v10866_v39, 3  ;;  %v5615_v39 = vrot.slane %v10877_v37, 3 }
 0x4fb   : > { %7927 = vmatpush3.bf16.msra.mxu1 %v5743_v22  ;;  %7894 = vmatprep.mubr.msk.bf16.mxu1 %vm557_vm2, %v5074_v56  ;;  %v5379_v56 = vrot.slane %v10127_v40, 2 }
 0x4fc   : > { %8595 = vmatprep.subr.msk.bf16.mxu1 %vm612_vm0, %v352_v55  ;;  %v5616_v33 = vor.u32 %v5615_v39, %v5614_v20 }
 0x502   : > { %7895 = vmatmul.mubr.msk.bf16.gmra.mrb[4].mxu1 %vm557_vm2, %v5076_v23  ;;  %v5608_v23 = vor.u32 %v5607_v7, %v5606_v14 }
 0x503   : > { %7898 = vmatprep.mubr.msk.bf16.mxu1 %vm557_vm2, %v5078_v17  ;;  %v5605_v17 = vor.u32 %v5604_v36, %v5603_v25  ;;  %v8651_v25 = vld [vmem:[%s8738_s30 + $0x8] sm:$0xff]  }
 0x504   : > { %v296_v36 = vunpack.c.l.bf16 %v8651_v25 }
 0x50a   : > { %7899 = vmatmul.mubr.msk.bf16.gmra.mrb[8].mxu1 %vm557_vm2, %v5080_v11  ;;  %v10888_v11 = vrot.slane %v10097_v4, 2  ;;  %v6050_v4 = vsel %vm612_vm0, %v352_v55, 0  ;;  %v10893_v55 = vld [vmem:[#allocation28_spill] sm:$0xff] }
 0x50b   : > { %7902 = vmatprep.mubr.msk.bf16.mxu1 %vm557_vm2, %v5082_v35 }
 0x50c   : > { %v5380_v35 = vsel %vm1922_vm5, %v10888_v11, %v5379_v56  ;;  %v297_v56 = vunpack.c.h.bf16 %v8651_v25 }
 0x512   : > { %7903 = vmatmul.mubr.msk.bf16.gmra.mrb[12].mxu1 %vm557_vm2, %v5084_v59  ;;  %v5610_v59 = vrot.slane %v10874_v48, 2  ;;  %v5618_v48 = vrot.slane %v10878_v54, 2  ;;  %v5971_v54 = vrot.slane %v9853_v30, 3  ;;  %v5977_v30 = vrot.slane %v9889_v2, 3 }
 0x513   : > { %7906 = vmatprep.mubr.msk.bf16.mxu1 %vm557_vm2, %v5086_v47 }
 0x514   : > { %v5612_v40 = vor.u32 %v5611_v9, %v5610_v59  ;;  %v5620_v45 = vor.u32 %v5619_v63, %v5618_v48  ;;  %v6347_v59 = vrot.slane %v297_v56, 3  ;;  %v10565_v9 = vld [vmem:[%s10741_s4] ss:$0 sm:$0xff] }
 0x516   : > { %v5613_v47 = vsel %vm2460_vm6, %v5608_v23, %v5612_v40  ;;  %v5621_v37 = vsel %vm2460_vm6, %v5616_v33, %v5620_v45 }
 0x51a   : > { %7907 = vmatmul.mubr.msk.bf16.gmra.mrb[16].mxu1 %vm557_vm2, %v5088_v51  ;;  %v5617_v51 = vsel %vm2460_vm6, %v5612_v40, %v5616_v33  ;;  %v8653_v40 = vld [vmem:[%s8738_s30 + $0x20] sm:$0xff]  }
 0x51b   : > { %7910 = vmatprep.mubr.msk.bf16.mxu1 %vm557_vm2, %v5090_v42  ;;  %v5625_v42 = vsel %vm2460_vm6, %v5620_v45, %v10118_v3  ;;  %v10889_v3 = vld [vmem:[#allocation25_spill] sm:$0xff]  ;;  %v302_v33 = vunpack.c.l.bf16 %v8653_v40 }
 0x522   : > { %7911 = vmatmul.mubr.msk.bf16.gmra.mrb[20].mxu1 %vm557_vm2, %v5092_v32  ;;  %v5975_v32 = vrot.slane %v9887_v50, 3  ;;  %v5981_v50 = vrot.slane %v9921_v1, 3 }
 0x523   : > { %7914 = vmatprep.mubr.msk.bf16.mxu1 %vm557_vm2, %v5094_v10  ;;  %v5979_v10 = vrot.slane %v9919_v29, 3  ;;  %v5985_v29 = vrot.slane %v9954_v46, 3  ;;  %v10894_v46 = vld [vmem:[#allocation29_spill] sm:$0xff] }
 0x524   : > { %v5984_v2 = vsel %vm2816_vm7, %v5981_v50, %v5983_v31 }
 0x525   : > { %v5986_v16 = vsel %vm2816_vm7, %v5983_v31, %v5985_v29 }
 0x52a   : > { %7915 = vmatmul.mubr.msk.bf16.gmra.mrb[24].mxu1 %vm557_vm2, %v5096_v57  ;;  %v5978_v57 = vsel %vm2816_vm7, %v5975_v32, %v5977_v30 }
 0x52b   : > { %7918 = vmatprep.mubr.msk.bf16.mxu1 %vm557_vm2, %v5098_v6  ;;  %v5982_v6 = vsel %vm2816_vm7, %v5979_v10, %v5981_v50 }
 0x532   : > { %7919 = vmatmul.mubr.msk.bf16.gmra.mrb[28].mxu1 %vm557_vm2, %v5100_v27  ;;  %v5987_v27 = vrot.slane %v9993_v60, 3  ;;  %v8650_v60 = vld [vmem:[%s8738_s30 + $0x10] sm:$0xff]  }
 0x533   : > { %7922 = vmatprep.mubr.msk.bf16.mxu1 %vm557_vm2, %v10112_v43  ;;  %v5609_v43 = vsel %vm2460_vm6, %v5605_v17, %v5608_v23  ;;  %v298_v14 = vunpack.c.l.bf16 %v8650_v60  ;;  %v299_v7 = vunpack.c.h.bf16 %v8650_v60  ;;  %v8652_v23 = vld [vmem:[%s8738_s30 + $0x18] sm:$0xff]  }
 0x534   : > { %v5988_v1 = vsel %vm2816_vm7, %v5985_v29, %v5987_v27  ;;  %v5990_v22 = vsel %vm2816_vm7, %v5987_v27, %v10892_v12  ;;  %v300_v28 = vunpack.c.l.bf16 %v8652_v23  ;;  %v8656_v29 = vld [vmem:[%s8738_s30 + $0x38] sm:$0xff]  }
 0x535   : > { %v6349_v17 = vrot.slane %v298_v14, 3  ;;  %v6351_v11 = vrot.slane %v299_v7, 3  ;;  %v308_v27 = vunpack.c.l.bf16 %v8656_v29 }
 0x537   : > { %v6352_v39 = vsel %vm2816_vm7, %v6349_v17, %v6351_v11 }
 0x53a   : > { %7923 = vmatmul.mubr.msk.bf16.gmra.mrb[32].mxu1 %vm557_vm2, %v5380_v35  ;;  %v6346_v35 = vrot.slane %v296_v36, 3 }
 0x53b   : > { %7928 = vmatprep.mubr.msk.bf16.mxu1 %vm557_vm2, %v5609_v43  ;;  %v6353_v43 = vrot.slane %v300_v28, 3  ;;  %v6369_v28 = vrot.slane %v308_v27, 3 }
 0x53c   : > { %v6348_v63 = vsel %vm2816_vm7, %v6346_v35, %v6347_v59 }
 0x542   : > { %7929 = vmatmul.mubr.msk.bf16.vlgmr.msra.gmra.mrb[0].mxu1 %vm557_vm2, %v5613_v47 }
 0x543   : > { %7965 = vmatpush3.bf16.msra.mxu1 %v6050_v4  ;;  %7932 = vmatprep.mubr.msk.bf16.mxu1 %vm557_vm2, %v5617_v51  ;;  %v303_v4 = vunpack.c.h.bf16 %v8653_v40  ;;  %v301_v51 = vunpack.c.h.bf16 %v8652_v23 }
 0x54a   : > { %7933 = vmatmul.mubr.msk.bf16.gmra.mrb[4].mxu1 %vm557_vm2, %v5621_v37 }
 0x54b   : > { %7936 = vmatprep.mubr.msk.bf16.mxu1 %vm557_vm2, %v5625_v42  ;;  %v6354_v42 = vsel %vm2816_vm7, %v6351_v11, %v6353_v43 }
 0x552   : > { %7937 = vmatmul.mubr.msk.bf16.gmra.mrb[8].mxu1 %vm557_vm2, %v10131_v26  ;;  %v10890_v26 = vld [vmem:[#allocation26_spill] sm:$0xff] }
 0x553   : > { %7940 = vmatprep.mubr.msk.bf16.mxu1 %vm557_vm2, %v10140_v18  ;;  %v5959_v18 = vrot.slane %v9726_v19, 3  ;;  %v5967_v19 = vrot.slane %v9817_v8, 3  ;;  %v5973_v8 = vrot.slane %v9855_v34, 3  ;;  %v5980_v34 = vsel %vm2816_vm7, %v5977_v30, %v5979_v10 }
 0x555   : > { %v5974_v49 = vsel %vm2816_vm7, %v5971_v54, %v5973_v8 }
 0x55a   : > { %7941 = vmatmul.mubr.msk.bf16.gmra.mrb[12].mxu1 %vm557_vm2, %v10145_v21  ;;  %v5958_v21 = vrot.slane %v9690_v0, 3  ;;  %v5965_v0 = vrot.slane %v9779_v41, 3 }
 0x55b   : > { %7944 = vmatprep.mubr.msk.bf16.mxu1 %vm557_vm2, %v10150_v15  ;;  %v10891_v15 = vld [vmem:[#allocation27_spill] sm:$0xff] }
 0x562   : > { %7945 = vmatmul.mubr.msk.bf16.gmra.mrb[16].mxu1 %vm557_vm2, %v10155_v44  ;;  %v5960_v44 = vsel %vm2816_vm7, %v5958_v21, %v5959_v18 }
 0x563   : > { %7948 = vmatprep.mubr.msk.bf16.mxu1 %vm557_vm2, %v10160_v52  ;;  %v5961_v52 = vrot.slane %v9728_v58, 3  ;;  %v5968_v58 = vsel %vm2816_vm7, %v5965_v0, %v5967_v19 }
 0x56a   : > { %7949 = vmatmul.mubr.msk.bf16.gmra.mrb[20].mxu1 %vm557_vm2, %v10166_v53  ;;  %v5963_v53 = vrot.slane %v9777_v61, 3  ;;  %v5969_v61 = vrot.slane %v9819_v24, 3  ;;  %v5976_v24 = vsel %vm2816_vm7, %v5973_v8, %v5975_v32 }
 0x56b   : > { %7952 = vmatprep.mubr.msk.bf16.mxu1 %vm557_vm2, %v10174_v13  ;;  %v5962_v13 = vsel %vm2816_vm7, %v5959_v18, %v5961_v52 }
 0x56c   : > { %v5970_v62 = vsel %vm2816_vm7, %v5967_v19, %v5969_v61  ;;  %v5972_v41 = vsel %vm2816_vm7, %v5969_v61, %v5971_v54 }
 0x572   : > { %7953 = vmatmul.mubr.msk.bf16.gmra.mrb[24].mxu1 %vm557_vm2, %v10181_v5  ;;  %v5964_v5 = vsel %vm2816_vm7, %v5961_v52, %v5963_v53 }
 0x573   : > { %7956 = vmatprep.mubr.msk.bf16.mxu1 %vm557_vm2, %v10185_v38  ;;  %v5966_v38 = vsel %vm2816_vm7, %v5963_v53, %v5965_v0 }
 0x57a   : > { %7957 = vmatmul.mubr.msk.bf16.gmra.mrb[28].mxu1 %vm557_vm2, %v10889_v3  ;;  %v8654_v3 = vld [vmem:[%s8738_s30 + $0x28] sm:$0xff]  }
 0x57b   : > { %7960 = vmatprep.mubr.msk.bf16.mxu1 %vm557_vm2, %v10890_v26  ;;  %v304_v26 = vunpack.c.l.bf16 %v8654_v3  ;;  %v305_v50 = vunpack.c.h.bf16 %v8654_v3 }
 0x57d   : > { %v6361_v54 = vrot.slane %v304_v26, 3  ;;  %v6363_v36 = vrot.slane %v305_v50, 3 }
 0x582   : > { %7961 = vmatmul.mubr.msk.bf16.gmra.mrb[32].mxu1 %vm557_vm2, %v10891_v15 }
 0x583   : > { %7966 = vmatprep.mubr.msk.bf16.mxu1 %vm557_vm2, %v5960_v44  ;;  %v6350_v44 = vsel %vm2816_vm7, %v6347_v59, %v6349_v17 }
 0x58a   : > { %7967 = vmatmul.mubr.msk.bf16.vlgmr.msra.gmra.mrb[0].mxu1 %vm557_vm2, %v5962_v13  ;;  %v6357_v13 = vrot.slane %v302_v33, 3 }
 0x58b   : > { %7970 = vmatprep.mubr.msk.bf16.mxu1 %vm557_vm2, %v5964_v5  ;;  %v6359_v5 = vrot.slane %v303_v4, 3  ;;  %v6364_v4 = vsel %vm2816_vm7, %v6361_v54, %v6363_v36 }
 0x58d   : > { %v6360_v32 = vsel %vm2816_vm7, %v6357_v13, %v6359_v5 }
 0x592   : > { %7971 = vmatmul.mubr.msk.bf16.gmra.mrb[4].mxu1 %vm557_vm2, %v5966_v38  ;;  %v6355_v38 = vrot.slane %v301_v51, 3 }
 0x593   : > { %7974 = vmatprep.mubr.msk.bf16.mxu1 %vm557_vm2, %v5968_v58 }
 0x59a   : > { %7975 = vmatmul.mubr.msk.bf16.gmra.mrb[8].mxu1 %vm557_vm2, %v5970_v62 }
 0x59b   : > { %7978 = vmatprep.mubr.msk.bf16.mxu1 %vm557_vm2, %v5972_v41 }
 0x5a2   : > { %7979 = vmatmul.mubr.msk.bf16.gmra.mrb[12].mxu1 %vm557_vm2, %v5974_v49  ;;  %v8655_v49 = vld [vmem:[%s8738_s30 + $0x30] sm:$0xff]  }
 0x5a3   : > { %7982 = vmatprep.mubr.msk.bf16.mxu1 %vm557_vm2, %v5976_v24  ;;  %v306_v24 = vunpack.c.l.bf16 %v8655_v49  ;;  %v307_v30 = vunpack.c.h.bf16 %v8655_v49 }
 0x5a5   : > { %v6365_v60 = vrot.slane %v306_v24, 3  ;;  %v6367_v14 = vrot.slane %v307_v30, 3 }
 0x5a7   : > { %v6368_v59 = vsel %vm2816_vm7, %v6365_v60, %v6367_v14  ;;  %v6370_v51 = vsel %vm2816_vm7, %v6367_v14, %v6369_v28 }
 0x5aa   : > { %7983 = vmatmul.mubr.msk.bf16.gmra.mrb[16].mxu1 %vm557_vm2, %v5978_v57 }
 0x5ab   : > { %7986 = vmatprep.mubr.msk.bf16.mxu1 %vm557_vm2, %v5980_v34  ;;  %v6356_v34 = vsel %vm2816_vm7, %v6353_v43, %v6355_v38  ;;  %v8657_v43 = vld [vmem:[%s8738_s30 + $0x40] sm:$0xff]  }
 0x5b2   : > { %7987 = vmatmul.mubr.msk.bf16.gmra.mrb[20].mxu1 %vm557_vm2, %v5982_v6 }
 0x5b3   : > { %7990 = vmatprep.mubr.msk.bf16.mxu1 %vm557_vm2, %v5984_v2  ;;  %v6362_v2 = vsel %vm2816_vm7, %v6359_v5, %v6361_v54 }
 0x5ba   : > { %7991 = vmatmul.mubr.msk.bf16.gmra.mrb[24].mxu1 %vm557_vm2, %v5986_v16 }
 0x5bb   : > { %7994 = vmatprep.mubr.msk.bf16.mxu1 %vm557_vm2, %v5988_v1 }
 0x5c2   : > { %7995 = vmatmul.mubr.msk.bf16.gmra.mrb[28].mxu1 %vm557_vm2, %v5990_v22  ;;  %v6358_v22 = vsel %vm2816_vm7, %v6355_v38, %v6357_v13 }
 0x5c3   : > { %7998 = vmatprep.mubr.msk.bf16.mxu1 %vm557_vm2, %v10893_v55 }
 0x5ca   : > { %7999 = vmatmul.mubr.msk.bf16.gmra.mrb[32].mxu1 %vm557_vm2, %v10894_v46 }
 0x65d   : > { %v7968_v20 = vpop.f32.mrb[0].mxu1 }
 0x65e   : > { %v6274_v47 = vadd.f32 %v7968_v20, %v10565_v9  ;;  %v6086_v48 = vpop.f32.mrb[1].mxu1  ;;  %v310_v20 = vunpack.c.l.bf16 %v8657_v43 }
 0x65f   : > { %v6272_v45 = vadd.f32 %v10565_v9, %v6086_v48  ;;  %v7969_v37 = vpop.f32.mrb[2].mxu1 }
 0x660   : > { %v6457_v18 = vadd.f32 %v6352_v39, %v6274_v47  ;;  %v6275_v21 = vadd.f32 %v7969_v37, %v10565_v9  ;;  %v6089_v15 = vpop.f32.mrb[3].mxu1  ;;  %v311_v39 = vunpack.c.h.bf16 %v8657_v43  ;;  %v309_v47 = vunpack.c.h.bf16 %v8656_v29 }
 0x661   : > { %v6455_v52 = vadd.f32 %v6348_v63, %v6272_v45  ;;  %v6273_v53 = vadd.f32 %v10565_v9, %v6089_v15  ;;  %v8658_v45 = vld [vmem:[%s8738_s30 + $0x48] sm:$0xff]  }
 0x662   : > { %v6493_v0 = vmax.f32 %v6457_v18, 0.0  ;;  %v6458_v19 = vadd.f32 %v6354_v42, %v6275_v21  ;;  %v312_v37 = vunpack.c.l.bf16 %v8658_v45  ;;  %v6366_v18 = vsel %vm2816_vm7, %v6363_v36, %v6365_v60 }
 0x663   : > { %v6491_v58 = vmax.f32 %v6455_v52, 0.0  ;;  %v6456_v61 = vadd.f32 %v6350_v44, %v6273_v53  ;;  %v6373_v44 = vrot.slane %v310_v20, 3  ;;  %v6375_v52 = vrot.slane %v311_v39, 3 }
 0x664   : > { %6529 = vst.msk [vmem:[%s10580_s12 + $0x10] sm:$0xff] %vm557_vm2, %v6493_v0  ;;  %v6494_v62 = vmax.f32 %v6458_v19, 0.0  ;;  %v6371_v5 = vrot.slane %v309_v47, 3  ;;  %v6377_v38 = vrot.slane %v312_v37, 3 }
 0x665   : > { %6527 = vst.msk [vmem:[%s10580_s12] sm:$0xff] %vm557_vm2, %v6491_v58  ;;  %v6492_v41 = vmax.f32 %v6456_v61, 0.0  ;;  %v7972_v8 = vpop.f32.mrb[4].mxu1 }
 0x666   : > { %6530 = vst.msk [vmem:[%s10580_s12 + $0x18] sm:$0xff] %vm557_vm2, %v6494_v62  ;;  %v6278_v10 = vadd.f32 %v7972_v8, %v10565_v9  ;;  %v6102_v57 = vpop.f32.mrb[5].mxu1  ;;  %v6376_v62 = vsel %vm2816_vm7, %v6373_v44, %v6375_v52  ;;  %v6372_v30 = vsel %vm2816_vm7, %v6369_v28, %v6371_v5  ;;  %v6378_v50 = vsel %vm2816_vm7, %v6375_v52, %v6377_v38 }
 0x667   : > { %6528 = vst.msk [vmem:[%s10580_s12 + $0x8] sm:$0xff] %vm557_vm2, %v6492_v41  ;;  %v6276_v31 = vadd.f32 %v10565_v9, %v6102_v57  ;;  %v7973_v6 = vpop.f32.mrb[6].mxu1  ;;  %v8659_v41 = vld [vmem:[%s8738_s30 + $0x50] sm:$0xff]  }
 0x668   : > { %v6461_v16 = vadd.f32 %v6360_v32, %v6278_v10  ;;  %v6279_v1 = vadd.f32 %v7973_v6, %v10565_v9  ;;  %v6105_v12 = vpop.f32.mrb[7].mxu1  ;;  %v314_v8 = vunpack.c.l.bf16 %v8659_v41  ;;  %v315_v32 = vunpack.c.h.bf16 %v8659_v41 }
 0x669   : > { %v6459_v55 = vadd.f32 %v6356_v34, %v6276_v31  ;;  %v6277_v46 = vadd.f32 %v10565_v9, %v6105_v12  ;;  %v313_v10 = vunpack.c.h.bf16 %v8658_v45  ;;  %v8660_v31 = vld [vmem:[%s8738_s30 + $0x58] sm:$0xff]  }
 0x66a   : > { %v6497_v7 = vmax.f32 %v6461_v16, 0.0  ;;  %v6462_v25 = vadd.f32 %v6362_v2, %v6279_v1  ;;  %v316_v6 = vunpack.c.l.bf16 %v8660_v31  ;;  %v6374_v16 = vsel %vm2816_vm7, %v6371_v5, %v6373_v44 }
 0x66b   : > { %v6495_v56 = vmax.f32 %v6459_v55, 0.0  ;;  %v6460_v23 = vadd.f32 %v6358_v22, %v6277_v46  ;;  %v6381_v22 = vrot.slane %v314_v8, 3  ;;  %v6383_v55 = vrot.slane %v315_v32, 3 }
 0x66c   : > { %6533 = vst.msk [vmem:[%s10580_s12 + $0x30] sm:$0xff] %vm557_vm2, %v6497_v7  ;;  %v6498_v17 = vmax.f32 %v6462_v25, 0.0  ;;  %v6379_v14 = vrot.slane %v313_v10, 3  ;;  %v6385_v36 = vrot.slane %v316_v6, 3 }
 0x66d   : > { %6531 = vst.msk [vmem:[%s10580_s12 + $0x20] sm:$0xff] %vm557_vm2, %v6495_v56  ;;  %v6496_v11 = vmax.f32 %v6460_v23, 0.0  ;;  %v7976_v35 = vpop.f32.mrb[8].mxu1 }
 0x66e   : > { %6534 = vst.msk [vmem:[%s10580_s12 + $0x38] sm:$0xff] %vm557_vm2, %v6498_v17  ;;  %v6282_v40 = vadd.f32 %v7976_v35, %v10565_v9  ;;  %v6118_v33 = vpop.f32.mrb[9].mxu1  ;;  %v6384_v17 = vsel %vm2816_vm7, %v6381_v22, %v6383_v55  ;;  %v6380_v39 = vsel %vm2816_vm7, %v6377_v38, %v6379_v14  ;;  %v6386_v47 = vsel %vm2816_vm7, %v6383_v55, %v6385_v36 }
 0x66f   : > { %6532 = vst.msk [vmem:[%s10580_s12 + $0x28] sm:$0xff] %vm557_vm2, %v6496_v11  ;;  %v6280_v48 = vadd.f32 %v10565_v9, %v6118_v33  ;;  %v7977_v63 = vpop.f32.mrb[10].mxu1  ;;  %v8661_v11 = vld [vmem:[%s8738_s30 + $0x60] sm:$0xff]  }
 0x670   : > { %v6465_v42 = vadd.f32 %v6368_v59, %v6282_v40  ;;  %v6283_v3 = vadd.f32 %v7977_v63, %v10565_v9  ;;  %v6121_v26 = vpop.f32.mrb[11].mxu1  ;;  %v318_v35 = vunpack.c.l.bf16 %v8661_v11  ;;  %v319_v59 = vunpack.c.h.bf16 %v8661_v11 }
 0x671   : > { %v6463_v21 = vadd.f32 %v6364_v4, %v6280_v48  ;;  %v6281_v15 = vadd.f32 %v10565_v9, %v6121_v26  ;;  %v317_v40 = vunpack.c.h.bf16 %v8660_v31  ;;  %v8662_v48 = vld [vmem:[%s8738_s30 + $0x68] sm:$0xff]  }
 0x672   : > { %v6501_v53 = vmax.f32 %v6465_v42, 0.0  ;;  %v6466_v13 = vadd.f32 %v6370_v51, %v6283_v3  ;;  %v320_v63 = vunpack.c.l.bf16 %v8662_v48  ;;  %v6382_v42 = vsel %vm2816_vm7, %v6379_v14, %v6381_v22 }
 0x673   : > { %v6499_v0 = vmax.f32 %v6463_v21, 0.0  ;;  %v6464_v19 = vadd.f32 %v6366_v18, %v6281_v15  ;;  %v6389_v18 = vrot.slane %v318_v35, 3  ;;  %v6391_v21 = vrot.slane %v319_v59, 3 }
 0x674   : > { %6537 = vst.msk [vmem:[%s10580_s12 + $0x50] sm:$0xff] %vm557_vm2, %v6501_v53  ;;  %v6502_v58 = vmax.f32 %v6466_v13, 0.0  ;;  %v6387_v52 = vrot.slane %v317_v40, 3  ;;  %v6393_v5 = vrot.slane %v320_v63, 3 }
 0x675   : > { %6535 = vst.msk [vmem:[%s10580_s12 + $0x40] sm:$0xff] %vm557_vm2, %v6499_v0  ;;  %v6500_v61 = vmax.f32 %v6464_v19, 0.0  ;;  %v7980_v54 = vpop.f32.mrb[12].mxu1 }
 0x676   : > { %6538 = vst.msk [vmem:[%s10580_s12 + $0x58] sm:$0xff] %vm557_vm2, %v6502_v58  ;;  %v6286_v49 = vadd.f32 %v7980_v54, %v10565_v9  ;;  %v6134_v24 = vpop.f32.mrb[13].mxu1  ;;  %v6392_v58 = vsel %vm2816_vm7, %v6389_v18, %v6391_v21  ;;  %v6388_v32 = vsel %vm2816_vm7, %v6385_v36, %v6387_v52  ;;  %v6394_v10 = vsel %vm2816_vm7, %v6391_v21, %v6393_v5 }
 0x677   : > { %6536 = vst.msk [vmem:[%s10580_s12 + $0x48] sm:$0xff] %vm557_vm2, %v6500_v61  ;;  %v6284_v57 = vadd.f32 %v10565_v9, %v6134_v24  ;;  %v7981_v34 = vpop.f32.mrb[14].mxu1  ;;  %v8663_v61 = vld [vmem:[%s8738_s30 + $0x70] sm:$0xff]  }
 0x678   : > { %v6469_v2 = vadd.f32 %v6376_v62, %v6286_v49  ;;  %v6287_v29 = vadd.f32 %v7981_v34, %v10565_v9  ;;  %v6137_v27 = vpop.f32.mrb[15].mxu1  ;;  %v322_v54 = vunpack.c.l.bf16 %v8663_v61  ;;  %v323_v62 = vunpack.c.h.bf16 %v8663_v61 }
 0x679   : > { %v6467_v1 = vadd.f32 %v6372_v30, %v6284_v57  ;;  %v6285_v12 = vadd.f32 %v10565_v9, %v6137_v27  ;;  %v321_v49 = vunpack.c.h.bf16 %v8662_v48  ;;  %v8664_v57 = vld [vmem:[%s8738_s30 + $0x78] sm:$0xff]  }
 0x67a   : > { %v6505_v46 = vmax.f32 %v6469_v2, 0.0  ;;  %v6470_v60 = vadd.f32 %v6378_v50, %v6287_v29  ;;  %v324_v34 = vunpack.c.l.bf16 %v8664_v57  ;;  %v6390_v2 = vsel %vm2816_vm7, %v6387_v52, %v6389_v18 }
 0x67b   : > { %v6503_v7 = vmax.f32 %v6467_v1, 0.0  ;;  %v6468_v25 = vadd.f32 %v6374_v16, %v6285_v12  ;;  %v6397_v16 = vrot.slane %v322_v54, 3  ;;  %v6399_v1 = vrot.slane %v323_v62, 3 }
 0x67c   : > { %6541 = vst.msk [vmem:[%s10580_s12 + $0x70] sm:$0xff] %vm557_vm2, %v6505_v46  ;;  %v6506_v56 = vmax.f32 %v6470_v60, 0.0  ;;  %v6395_v55 = vrot.slane %v321_v49, 3  ;;  %v6401_v14 = vrot.slane %v324_v34, 3 }
 0x67d   : > { %6539 = vst.msk [vmem:[%s10580_s12 + $0x60] sm:$0xff] %vm557_vm2, %v6503_v7  ;;  %v6504_v23 = vmax.f32 %v6468_v25, 0.0  ;;  %v7984_v28 = vpop.f32.mrb[16].mxu1 }
 0x67e   : > { %6542 = vst.msk [vmem:[%s10580_s12 + $0x78] sm:$0xff] %vm557_vm2, %v6506_v56  ;;  %v6290_v43 = vadd.f32 %v7984_v28, %v10565_v9  ;;  %v6150_v20 = vpop.f32.mrb[17].mxu1  ;;  %v6400_v56 = vsel %vm2816_vm7, %v6397_v16, %v6399_v1  ;;  %v6396_v59 = vsel %vm2816_vm7, %v6393_v5, %v6395_v55  ;;  %v6402_v40 = vsel %vm2816_vm7, %v6399_v1, %v6401_v14 }
 0x67f   : > { %6540 = vst.msk [vmem:[%s10580_s12 + $0x68] sm:$0xff] %vm557_vm2, %v6504_v23  ;;  %v6288_v33 = vadd.f32 %v10565_v9, %v6150_v20  ;;  %v7985_v4 = vpop.f32.mrb[18].mxu1  ;;  %v8665_v23 = vld [vmem:[%s8738_s30 + $0x80] sm:$0xff]  }
 0x680   : > { %v6473_v51 = vadd.f32 %v6384_v17, %v6290_v43  ;;  %v6291_v45 = vadd.f32 %v7985_v4, %v10565_v9  ;;  %v6153_v37 = vpop.f32.mrb[19].mxu1  ;;  %v326_v28 = vunpack.c.l.bf16 %v8665_v23  ;;  %v327_v17 = vunpack.c.h.bf16 %v8665_v23 }
 0x681   : > { %v6471_v3 = vadd.f32 %v6380_v39, %v6288_v33  ;;  %v6289_v26 = vadd.f32 %v10565_v9, %v6153_v37  ;;  %v325_v43 = vunpack.c.h.bf16 %v8664_v57  ;;  %v8666_v33 = vld [vmem:[%s8738_s30 + $0x88] sm:$0xff]  }
 0x682   : > { %v6509_v15 = vmax.f32 %v6473_v51, 0.0  ;;  %v6474_v44 = vadd.f32 %v6386_v47, %v6291_v45  ;;  %v328_v4 = vunpack.c.l.bf16 %v8666_v33  ;;  %v6398_v51 = vsel %vm2816_vm7, %v6395_v55, %v6397_v16 }
 0x683   : > { %v6507_v53 = vmax.f32 %v6471_v3, 0.0  ;;  %v6472_v13 = vadd.f32 %v6382_v42, %v6289_v26  ;;  %v6405_v42 = vrot.slane %v326_v28, 3  ;;  %v6407_v3 = vrot.slane %v327_v17, 3 }
 0x684   : > { %6545 = vst.msk [vmem:[%s10580_s12 + $0x90] sm:$0xff] %vm557_vm2, %v6509_v15  ;;  %v6510_v0 = vmax.f32 %v6474_v44, 0.0  ;;  %v6403_v21 = vrot.slane %v325_v43, 3  ;;  %v6409_v52 = vrot.slane %v328_v4, 3 }
 0x685   : > { %6543 = vst.msk [vmem:[%s10580_s12 + $0x80] sm:$0xff] %vm557_vm2, %v6507_v53  ;;  %v6508_v19 = vmax.f32 %v6472_v13, 0.0  ;;  %v7988_v38 = vpop.f32.mrb[20].mxu1 }
 0x686   : > { %6546 = vst.msk [vmem:[%s10580_s12 + $0x98] sm:$0xff] %vm557_vm2, %v6510_v0  ;;  %v6294_v41 = vadd.f32 %v7988_v38, %v10565_v9  ;;  %v6166_v8 = vpop.f32.mrb[21].mxu1  ;;  %v6408_v0 = vsel %vm2816_vm7, %v6405_v42, %v6407_v3 }
 0x687   : > { %6544 = vst.msk [vmem:[%s10580_s12 + $0x88] sm:$0xff] %vm557_vm2, %v6508_v19  ;;  %v6292_v24 = vadd.f32 %v10565_v9, %v6166_v8  ;;  %v7989_v30 = vpop.f32.mrb[22].mxu1  ;;  %v8667_v19 = vld [vmem:[%s8738_s30 + $0x90] sm:$0xf]  ;;  %v329_v8 = vunpack.c.h.bf16 %v8666_v33 }
 0x688   : > { %v6477_v50 = vadd.f32 %v6392_v58, %v6294_v41  ;;  %v6295_v31 = vadd.f32 %v7989_v30, %v10565_v9  ;;  %v6169_v6 = vpop.f32.mrb[23].mxu1  ;;  %v330_v38 = vunpack.c.l.bf16 %v8667_v19  ;;  %v8668_v58 = vld [vmem:[%s8738_s30 + $0x94] sm:$0xf]  ;;  %v6404_v41 = vsel %vm2816_vm7, %v6401_v14, %v6403_v21  ;;  %v8669_v30 = vld [vmem:[%s8738_s30 + $0x98] sm:$0xf] }
 0x689   : > { %v6475_v29 = vadd.f32 %v6388_v32, %v6292_v24  ;;  %v6293_v27 = vadd.f32 %v10565_v9, %v6169_v6  ;;  %v331_v61 = vunpack.c.l.bf16 %v8668_v58  ;;  %v6410_v24 = vsel %vm2816_vm7, %v6407_v3, %v6409_v52 }
 0x68a   : > { %v6513_v12 = vmax.f32 %v6477_v50, 0.0  ;;  %v6478_v22 = vadd.f32 %v6394_v10, %v6295_v31  ;;  %v332_v10 = vunpack.c.l.bf16 %v8669_v30  ;;  %v6406_v31 = vsel %vm2816_vm7, %v6403_v21, %v6405_v42 }
 0x68b   : > { %v6511_v46 = vmax.f32 %v6475_v29, 0.0  ;;  %v6476_v60 = vadd.f32 %v6390_v2, %v6293_v27  ;;  %v6413_v29 = vrot.slane %v330_v38, 3  ;;  %v6415_v27 = vrot.slane %v331_v61, 3 }
 0x68c   : > { %6549 = vst.msk [vmem:[%s10580_s12 + $0xb0] sm:$0xff] %vm557_vm2, %v6513_v12  ;;  %v6514_v7 = vmax.f32 %v6478_v22, 0.0  ;;  %v6411_v12 = vrot.slane %v329_v8, 3 }
 0x68d   : > { %6547 = vst.msk [vmem:[%s10580_s12 + $0xa0] sm:$0xff] %vm557_vm2, %v6511_v46  ;;  %v6512_v25 = vmax.f32 %v6476_v60, 0.0  ;;  %v7992_v36 = vpop.f32.mrb[24].mxu1  ;;  %v6417_v46 = vrot.slane %v332_v10, 3 }
 0x68e   : > { %6550 = vst.msk [vmem:[%s10580_s12 + $0xb8] sm:$0xff] %vm557_vm2, %v6514_v7  ;;  %v6298_v11 = vadd.f32 %v7992_v36, %v10565_v9  ;;  %v6182_v35 = vpop.f32.mrb[25].mxu1  ;;  %v6412_v23 = vsel %vm2816_vm7, %v6409_v52, %v6411_v12 }
 0x68f   : > { %6548 = vst.msk [vmem:[%s10580_s12 + $0xa8] sm:$0xff] %vm557_vm2, %v6512_v25  ;;  %v6296_v20 = vadd.f32 %v10565_v9, %v6182_v35  ;;  %v7993_v39 = vpop.f32.mrb[26].mxu1  ;;  %v6416_v25 = vsel %vm2816_vm7, %v6413_v29, %v6415_v27 }
 0x690   : > { %v6481_v47 = vadd.f32 %v6400_v56, %v6298_v11  ;;  %v6299_v48 = vadd.f32 %v7993_v39, %v10565_v9  ;;  %v6185_v63 = vpop.f32.mrb[27].mxu1  ;;  %v6418_v11 = vsel %vm2816_vm7, %v6415_v27, %v6417_v46 }
 0x691   : > { %v6479_v45 = vadd.f32 %v6396_v59, %v6296_v20  ;;  %v6297_v37 = vadd.f32 %v10565_v9, %v6185_v63  ;;  %v6414_v20 = vsel %vm2816_vm7, %v6411_v12, %v6413_v29 }
 0x692   : > { %v6517_v26 = vmax.f32 %v6481_v47, 0.0  ;;  %v6482_v18 = vadd.f32 %v6402_v40, %v6299_v48 }
 0x693   : > { %v6515_v15 = vmax.f32 %v6479_v45, 0.0  ;;  %v6480_v44 = vadd.f32 %v6398_v51, %v6297_v37 }
 0x694   : > { %6553 = vst.msk [vmem:[%s10580_s12 + $0xd0] sm:$0xff] %vm557_vm2, %v6517_v26  ;;  %v6518_v53 = vmax.f32 %v6482_v18, 0.0 }
 0x695   : > { %6551 = vst.msk [vmem:[%s10580_s12 + $0xc0] sm:$0xff] %vm557_vm2, %v6515_v15  ;;  %v6516_v13 = vmax.f32 %v6480_v44, 0.0  ;;  %v7996_v5 = vpop.f32.mrb[28].mxu1 }
 0x696   : > { %6554 = vst.msk [vmem:[%s10580_s12 + $0xd8] sm:$0xff] %vm557_vm2, %v6518_v53  ;;  %v6302_v54 = vadd.f32 %v7996_v5, %v10565_v9  ;;  %v6198_v62 = vpop.f32.mrb[29].mxu1 }
 0x697   : > { %6552 = vst.msk [vmem:[%s10580_s12 + $0xc8] sm:$0xff] %vm557_vm2, %v6516_v13  ;;  %v6300_v32 = vadd.f32 %v10565_v9, %v6198_v62  ;;  %v7997_v49 = vpop.f32.mrb[30].mxu1 }
 0x698   : > { %v6485_v57 = vadd.f32 %v6408_v0, %v6302_v54  ;;  %v6303_v34 = vadd.f32 %v7997_v49, %v10565_v9  ;;  %v6201_v50 = vpop.f32.mrb[31].mxu1 }
 0x699   : > { %v6483_v6 = vadd.f32 %v6404_v41, %v6300_v32  ;;  %v6301_v2 = vadd.f32 %v10565_v9, %v6201_v50 }
 0x69a   : > { %v6521_v16 = vmax.f32 %v6485_v57, 0.0  ;;  %v6486_v1 = vadd.f32 %v6410_v24, %v6303_v34 }
 0x69b   : > { %v6519_v22 = vmax.f32 %v6483_v6, 0.0  ;;  %v6484_v55 = vadd.f32 %v6406_v31, %v6301_v2 }
 0x69c   : > { %6557 = vst.msk [vmem:[%s10580_s12 + $0xf0] sm:$0xff] %vm557_vm2, %v6521_v16  ;;  %v6522_v60 = vmax.f32 %v6486_v1, 0.0 }
 0x69d   : > { %6555 = vst.msk [vmem:[%s10580_s12 + $0xe0] sm:$0xff] %vm557_vm2, %v6519_v22  ;;  %v6520_v14 = vmax.f32 %v6484_v55, 0.0  ;;  %v8000_v7 = vpop.f32.mrb[32].mxu1 }
 0x69e   : > { %6558 = vst.msk [vmem:[%s10580_s12 + $0xf8] sm:$0xff] %vm557_vm2, %v6522_v60  ;;  %v6306_v36 = vadd.f32 %v8000_v7, %v10565_v9  ;;  %v6214_v56 = vpop.f32.mrb[33].mxu1 }
 0x69f   : > { %6556 = vst.msk [vmem:[%s10580_s12 + $0xe8] sm:$0xff] %vm557_vm2, %v6520_v14  ;;  %v6304_v28 = vadd.f32 %v10565_v9, %v6214_v56  ;;  %v8001_v17 = vpop.f32.mrb[34].mxu1 }
 0x6a0   : > { %v6489_v35 = vadd.f32 %v6416_v25, %v6306_v36  ;;  %v6307_v59 = vadd.f32 %v8001_v17, %v10565_v9  ;;  %v6217_v43 = vpop.f32.mrb[35].mxu1 }
 0x6a1   : > { %v6487_v39 = vadd.f32 %v6412_v23, %v6304_v28  ;;  %v6305_v40 = vadd.f32 %v10565_v9, %v6217_v43 }
 0x6a2   : > { %v6525_v33 = vmax.f32 %v6489_v35, 0.0  ;;  %v6490_v4 = vadd.f32 %v6418_v11, %v6307_v59 }
 0x6a3   : > { %v6523_v47 = vmax.f32 %v6487_v39, 0.0  ;;  %v6488_v48 = vadd.f32 %v6414_v20, %v6305_v40 }
 0x6a4   : > { %6561 = vst.msk [vmem:[%s10580_s12 + $0x110] sm:$0xff] %vm557_vm2, %v6525_v33  ;;  %v6526_v63 = vmax.f32 %v6490_v4, 0.0 }
 0x6a5   : > { %6559 = vst.msk [vmem:[%s10580_s12 + $0x100] sm:$0xff] %vm557_vm2, %v6523_v47  ;;  %v6524_v51 = vmax.f32 %v6488_v48, 0.0 }
 0x6a6   : > { %6562 = vst.msk [vmem:[%s10580_s12 + $0x118] sm:$0xff] %vm557_vm2, %v6526_v63 }
 0x6a7   : > { %6560 = vst.msk [vmem:[%s10580_s12 + $0x108] sm:$0xff] %vm557_vm2, %v6524_v51 }
 0x6a8 PF: > { %s16_s21 = sadd.s32 1, %s8676_s21  }
 0x6a9   : > { %p13_p4 = scmp.ge.s32.totalorder %s16_s21, 4  }
 0x6ab   :  { %15 = sbr.rel (!%p13_p4) target bundleno = 1 (0x1), region = 74 }

</bundles_post_ra>
